<compile_context>
chip_gen: v5e
topology: v5e:2x2
jax: 0.10.0
libtpu: 0.0.40
codegen_flags: <defaults>
</compile_context>

<pallas_src>
import functools

import jax
import jax.numpy as jnp
from jax.experimental import pallas as pl
from jax.experimental.pallas import tpu as pltpu


LANE = 128   # TPU lane width; channel-like minor dims are zero-padded to this
SUB = 8      # sublane granularity used for flat row counts


def _round_up(n, m):
    return (n + m - 1) // m * m


def _basic_block_kernel(x_ref, w1_ref, b1_ref, w2_ref, b2_ref,
                        wse1_ref, wse2_ref, o_ref, mid_ref,
                        *, Ho, Wo, Wm, taps1, seon):
    """One batch element per grid step.  All spatial data is flat row-major.

    x_ref   : (1, Nin, Cip)     bf16, space-to-depth'd input, row pitch Wm
    w1_ref  : (T1, Cip, Pp)     bf16 conv1 per-tap weights (BN1 scale folded)
    b1_ref  : (1, Pp)           f32 folded BN1 bias
    w2_ref  : (9, Pp, Pp)       bf16 conv2 per-tap weights (BN2 scale folded)
    b2_ref  : (1, Pp)           f32 folded BN2 bias
    wse1_ref: (Pp, HID)         f32 SE fc[0] weight (transposed, padded)
    wse2_ref: (HID, Pp)         f32 SE fc[2] weight (transposed, padded)
    o_ref   : (1, Ho*Wm, Pp)    bf16 output (junk cols dropped in the wrapper)
    mid_ref : (Nmid, Pp)        bf16 scratch: zero-padded conv1 output, pitch Wm
    """
    M = Ho * Wm                       # over-width output rows per conv
    Pp = b1_ref.shape[-1]

    # --- conv1: shift-and-accumulate over contiguous flat windows (K = Cip) ---
    acc1 = jnp.zeros((M, Pp), jnp.float32)
    for t, (dh, dw) in enumerate(taps1):
        win = x_ref[0, pl.ds(dh * Wm + dw, M), :]            # contiguous window
        acc1 = acc1 + jnp.dot(win, w1_ref[t],
                              preferred_element_type=jnp.float32)
    h1 = jnp.maximum(acc1 + b1_ref[...], 0.0)                 # folded bias + relu

    # Mask the over-width junk columns: when stored with a +（Wm+1) offset these
    # zeros land exactly on the left/right halo of the conv2 padded frame.
    col = jax.lax.broadcasted_iota(jnp.int32, (M, 1), 0) % Wm
    valid = col < Wo
    h1 = jnp.where(valid, h1, 0.0)

    # --- stage conv1 output into the flat zero-padded scratch (conv2 pad=1) ---
    top = Wm + 1                                             # top row + 1st halo
    mid_ref[pl.ds(0, top), :] = jnp.zeros((top, Pp), mid_ref.dtype)
    mid_ref[pl.ds(top, M), :] = h1.astype(mid_ref.dtype)     # one contiguous store
    bot = (Ho + 1) * Wm + 1
    nbot = mid_ref.shape[0] - bot                            # bottom row + slack
    mid_ref[pl.ds(bot, nbot), :] = jnp.zeros((nbot, Pp), mid_ref.dtype)

    # --- conv2: 9 contiguous windows, K = Pp, accumulate in f32 ---
    acc2 = jnp.zeros((M, Pp), jnp.float32)
    t = 0
    for kh in range(3):
        for kw in range(3):
            win = mid_ref[pl.ds(kh * Wm + kw, M), :]
            acc2 = acc2 + jnp.dot(win, w2_ref[t],
                                  preferred_element_type=jnp.float32)
            t += 1
    h2 = jnp.maximum(acc2 + b2_ref[...], 0.0)                 # folded bias + relu

    if seon:
        # SE: masked global avg pool -> fc -> relu -> fc -> sigmoid -> scale.
        pooled = jnp.sum(jnp.where(valid, h2, 0.0), axis=0,
                         keepdims=True) * (1.0 / (Ho * Wo))   # (1, Pp)
        z = jnp.maximum(jnp.dot(pooled, wse1_ref[...],
                                preferred_element_type=jnp.float32), 0.0)
        gate = jax.nn.sigmoid(jnp.dot(z, wse2_ref[...],
                                      preferred_element_type=jnp.float32))
        h2 = h2 * gate                                        # broadcast (1, Pp)

    o_ref[0] = h2.astype(o_ref.dtype)                         # lane-dense bf16 store


def basic_block_forward(x_nchw, params, *, stride=1, seon=False, eps=1e-5):
    """PyTorch NCHW in/out; params are PyTorch-shaped (OIHW conv, [out,in] fc)."""
    B, Cin, H, W = x_nchw.shape
    P = params["w1"].shape[0]
    hidden = params["wfc1"].shape[0]

    Ho = (H - 3) // stride + 1
    Wo = (W - 3) // stride + 1
    Wm = Wo + 2                                   # flat row pitch == padded conv2 width
    KH = KW = (3 + stride - 1) // stride          # taps per axis after space-to-depth
    Ci = stride * stride * Cin                    # channels after space-to-depth
    Pp = _round_up(P, LANE)
    Cip = _round_up(Ci, LANE)
    HID = _round_up(max(hidden, 1), LANE)
    M = Ho * Wm

    # --- fold BN into conv weights / biases ---
    s1 = params["g1"] / jnp.sqrt(params["v1"] + eps)
    s2 = params["g2"] / jnp.sqrt(params["v2"] + eps)
    b1 = jnp.pad((params["b1"] - params["m1"] * s1)[None, :],
                 ((0, 0), (0, Pp - P))).astype(jnp.float32)
    b2 = jnp.pad((params["b2"] - params["m2"] * s2)[None, :],
                 ((0, 0), (0, Pp - P))).astype(jnp.float32)

    # conv1 weights -> per-(dh,dw) matrices over the space-to-depth channel dim
    w_hwio = jnp.transpose(params["w1"] * s1[:, None, None, None], (2, 3, 1, 0))  # (3,3,Cin,P)
    we = jnp.zeros((KH, KW, stride, stride, Cin, P), jnp.float32)
    for dh in range(KH):
        for dw in range(KW):
            for rh in range(stride):
                for rw in range(stride):
                    kh, kw = stride * dh + rh, stride * dw + rw
                    if kh < 3 and kw < 3:
                        we = we.at[dh, dw, rh, rw].set(w_hwio[kh, kw])
    w1 = we.reshape(KH * KW, Ci, P)
    w1 = jnp.pad(w1, ((0, 0), (0, Cip - Ci), (0, Pp - P))).astype(jnp.bfloat16)

    # conv2 weights -> 9 per-tap (Pp, Pp) matrices
    w2 = jnp.transpose(params["w2"] * s2[:, None, None, None], (2, 3, 1, 0))       # (3,3,P,P)
    w2 = jnp.pad(w2, ((0, 0), (0, 0), (0, Pp - P), (0, Pp - P)))
    w2 = w2.reshape(9, Pp, Pp).astype(jnp.bfloat16)

    # SE weights, hidden dim lane-padded (keeps the tiny FCs lane-dense)
    wse1 = jnp.pad(jnp.transpose(params["wfc1"]),
                   ((0, Pp - P), (0, HID - hidden))).astype(jnp.float32)            # (Pp, HID)
    wse2 = jnp.pad(jnp.transpose(params["wfc2"]),
                   ((0, HID - hidden), (0, Pp - P))).astype(jnp.float32)            # (HID, Pp)

    # --- input: NHWC, space-to-depth (unit-stride taps), pitch Wm, lane-padded ---
    x = jnp.transpose(x_nchw, (0, 2, 3, 1))                                         # NHWC
    if stride > 1:
        Hp, Wp = _round_up(H, stride), _round_up(W, stride)
        x = jnp.pad(x, ((0, 0), (0, Hp - H), (0, Wp - W), (0, 0)))
        x = x.reshape(B, Hp // stride, stride, Wp // stride, stride, Cin)
        x = x.transpose(0, 1, 3, 2, 4, 5).reshape(B, Hp // stride, Wp // stride, Ci)
    Hs, Ws = x.shape[1], x.shape[2]
    x = jnp.pad(x, ((0, 0), (0, 0), (0, Wm - Ws), (0, Cip - Ci)))                   # pitch = Wm
    x = x.reshape(B, Hs * Wm, Cip)
    Nin = _round_up(max(Hs * Wm, (KH - 1) * Wm + (KW - 1) + M), SUB)
    x = jnp.pad(x, ((0, 0), (0, Nin - Hs * Wm), (0, 0))).astype(jnp.bfloat16)

    Nmid = _round_up((Ho + 2) * Wm + 2, SUB)      # padded conv2 frame + window slack
    taps1 = tuple((dh, dw) for dh in range(KH) for dw in range(KW))

    def _const(shape):
        nd = len(shape)
        return pl.BlockSpec(shape, lambda b: (0,) * nd)

    out = pl.pallas_call(
        functools.partial(_basic_block_kernel, Ho=Ho, Wo=Wo, Wm=Wm,
                          taps1=taps1, seon=seon),
        grid=(B,),
        out_shape=jax.ShapeDtypeStruct((B, M, Pp), jnp.bfloat16),
        in_specs=[
            pl.BlockSpec((1, Nin, Cip), lambda b: (b, 0, 0)),
            _const((KH * KW, Cip, Pp)),
            _const((1, Pp)),
            _const((9, Pp, Pp)),
            _const((1, Pp)),
            _const((Pp, HID)),
            _const((HID, Pp)),
        ],
        out_specs=pl.BlockSpec((1, M, Pp), lambda b: (b, 0, 0)),
        scratch_shapes=[pltpu.VMEM((Nmid, Pp), jnp.bfloat16)],
        compiler_params=pltpu.CompilerParams(
            dimension_semantics=("parallel",),      # shard batch across TCs (v7x)
            vmem_limit_bytes=32 * 1024 * 1024,      # within every gen's scoped VMEM
        ),
    )(x, w1, b1, w2, b2, wse1, wse2)

    # drop over-width junk columns + channel padding, back to NCHW
    out = out.reshape(B, Ho, Wm, Pp)[:, :, :Wo, :P]
    return jnp.transpose(out, (0, 3, 1, 2)).astype(x_nchw.dtype)


def basic_block_reference(x, params, *, stride=1, seon=False, eps=1e-5):
    """Pure-JAX (XLA) reference matching the PyTorch forward (eval-mode BN)."""
    def conv(x, w, s, p):
        return jax.lax.conv_general_dilated(
            x, w, (s, s), [(p, p), (p, p)],
            dimension_numbers=("NCHW", "OIHW", "NCHW"))

    def bn(x, g, b, m, v):
        g, b, m, v = (t[None, :, None, None] for t in (g, b, m, v))
        return (x - m) / jnp.sqrt(v + eps) * g + b

    out = jax.nn.relu(bn(conv(x, params["w1"], stride, 0),
                         params["g1"], params["b1"], params["m1"], params["v1"]))
    out = jax.nn.relu(bn(conv(out, params["w2"], 1, 1),
                         params["g2"], params["b2"], params["m2"], params["v2"]))
    if seon:
        pooled = out.mean(axis=(2, 3))
        z = jax.nn.relu(pooled @ params["wfc1"].T)
        s = jax.nn.sigmoid(z @ params["wfc2"].T)
        out = out * s[:, :, None, None]
    return out


def make_params(key, inplanes, planes, reduction=16):
    ks = jax.random.split(key, 10)
    hidden = planes // reduction
    return {
        # conv weights, PyTorch OIHW
        "w1": jax.random.normal(ks[0], (planes, inplanes, 3, 3), jnp.float32) * 0.1,
        "w2": jax.random.normal(ks[1], (planes, planes, 3, 3), jnp.float32) * 0.1,
        # bn1
        "g1": jax.random.uniform(ks[2], (planes,), jnp.float32, 0.5, 1.5),
        "b1": jax.random.normal(ks[3], (planes,), jnp.float32) * 0.1,
        "m1": jax.random.normal(ks[4], (planes,), jnp.float32) * 0.1,
        "v1": jax.random.uniform(ks[5], (planes,), jnp.float32, 0.5, 1.5),
        # bn2
        "g2": jax.random.uniform(ks[6], (planes,), jnp.float32, 0.5, 1.5),
        "b2": jax.random.normal(ks[7], (planes,), jnp.float32) * 0.1,
        "m2": jax.random.normal(ks[4], (planes,), jnp.float32) * 0.05,
        "v2": jax.random.uniform(ks[5], (planes,), jnp.float32, 0.5, 1.5),
        # SE fc weights, PyTorch [out, in]
        "wfc1": jax.random.normal(ks[8], (hidden, planes), jnp.float32) * 0.2,
        "wfc2": jax.random.normal(ks[9], (planes, hidden), jnp.float32) * 0.2,
    }


if __name__ == "__main__":
    key = jax.random.PRNGKey(0)
    kx, kp = jax.random.split(key)

    # small shapes: B=2, inplanes=16, planes=32 (planes >= 16 so SE hidden > 0),
    # spatial 10x10 -> conv1 (no pad) gives 8x8 (stride 1) / 4x4 (stride 2).
    B, inplanes, planes, H, W = 2, 16, 32, 10, 10
    x = jax.random.normal(kx, (B, inplanes, H, W), jnp.float32)
    params = make_params(kp, inplanes, planes)

    ok = True
    for stride in (1, 2):
        Ho = (H - 3) // stride + 1
        Wo = (W - 3) // stride + 1
        for seon in (False, True):
            out = jax.block_until_ready(
                basic_block_forward(x, params, stride=stride, seon=seon))
            ref = basic_block_reference(x, params, stride=stride, seon=seon)
            assert out.shape == (B, planes, Ho, Wo), out.shape
            # bf16 MXU inputs / bf16 staging+output (f32 accumulation) vs f32 ref.
            err = float(jnp.max(jnp.abs(out - ref)))
            tol = 5e-2 * float(jnp.max(jnp.abs(ref))) + 1e-3
            ok &= err <= tol

    print("KERNEL_OK" if ok else "MISMATCH")
</pallas_src>

<mosaic_0001>
module attributes {stable_mosaic.version = 11 : i64} {
  func.func @_basic_block_kernel(%arg0: i32, %arg1: memref<1x104x128xbf16, #tpu.memory_space<vmem>>, %arg2: memref<9x128x128xbf16, #tpu.memory_space<vmem>>, %arg3: memref<1x128xf32, #tpu.memory_space<vmem>>, %arg4: memref<9x128x128xbf16, #tpu.memory_space<vmem>>, %arg5: memref<1x128xf32, #tpu.memory_space<vmem>>, %arg6: memref<128x128xf32, #tpu.memory_space<vmem>>, %arg7: memref<128x128xf32, #tpu.memory_space<vmem>>, %arg8: memref<1x80x128xbf16, #tpu.memory_space<vmem>>, %arg9: memref<104x128xbf16, #tpu.memory_space<vmem>>) attributes {dimension_semantics = [#tpu.dimension_semantics<parallel>], iteration_bounds = array<i64: 2>, scalar_prefetch = 0 : i64, scratch_operands = 1 : i64, tpu.core_type = #tpu.core_type<tc>, window_params = [{transform_indices = @transform_0, window_bounds = array<i64: 1, 104, 128>}, {pipeline_mode = #tpu.pipeline_mode<synchronous>, transform_indices = @transform_1, window_bounds = array<i64: 9, 128, 128>}, {pipeline_mode = #tpu.pipeline_mode<synchronous>, transform_indices = @transform_2, window_bounds = array<i64: 1, 128>}, {pipeline_mode = #tpu.pipeline_mode<synchronous>, transform_indices = @transform_3, window_bounds = array<i64: 9, 128, 128>}, {pipeline_mode = #tpu.pipeline_mode<synchronous>, transform_indices = @transform_4, window_bounds = array<i64: 1, 128>}, {pipeline_mode = #tpu.pipeline_mode<synchronous>, transform_indices = @transform_5, window_bounds = array<i64: 128, 128>}, {pipeline_mode = #tpu.pipeline_mode<synchronous>, transform_indices = @transform_6, window_bounds = array<i64: 128, 128>}, {transform_indices = @transform_7, window_bounds = array<i64: 1, 80, 128>}]} {
    %cst = arith.constant 0.000000e+00 : f32
    %0 = vector.broadcast %cst : f32 to vector<80x128xf32>
    %c0 = arith.constant 0 : index
    %c0_0 = arith.constant 0 : index
    %c0_1 = arith.constant 0 : index
    %1 = vector.load %arg1[%c0, %c0_0, %c0_1] : memref<1x104x128xbf16, #tpu.memory_space<vmem>>, vector<1x80x128xbf16>
    %2 = vector.shape_cast %1 : vector<1x80x128xbf16> to vector<80x128xbf16>
    %c0_2 = arith.constant 0 : index
    %c0_3 = arith.constant 0 : index
    %c0_4 = arith.constant 0 : index
    %3 = vector.load %arg2[%c0_2, %c0_3, %c0_4] : memref<9x128x128xbf16, #tpu.memory_space<vmem>>, vector<1x128x128xbf16>
    %4 = vector.shape_cast %3 : vector<1x128x128xbf16> to vector<128x128xbf16>
    %cst_5 = arith.constant dense<0.000000e+00> : vector<80x128xf32>
    %5 = tpu.matmul %2, %4, %cst_5 {dimension_numbers = #tpu.dot_dimension_numbers<[1], [0], [0], [1], [0, 0, 1, 1], [], []>} : vector<80x128xbf16>, vector<128x128xbf16>, vector<80x128xf32> -> vector<80x128xf32>
    %6 = arith.addf %0, %5 : vector<80x128xf32>
    %c0_6 = arith.constant 0 : index
    %c1 = arith.constant 1 : index
    %c0_7 = arith.constant 0 : index
    %7 = vector.load %arg1[%c0_6, %c1, %c0_7] : memref<1x104x128xbf16, #tpu.memory_space<vmem>>, vector<1x80x128xbf16>
    %8 = vector.shape_cast %7 : vector<1x80x128xbf16> to vector<80x128xbf16>
    %c1_8 = arith.constant 1 : index
    %c0_9 = arith.constant 0 : index
    %c0_10 = arith.constant 0 : index
    %9 = vector.load %arg2[%c1_8, %c0_9, %c0_10] : memref<9x128x128xbf16, #tpu.memory_space<vmem>>, vector<1x128x128xbf16>
    %10 = vector.shape_cast %9 : vector<1x128x128xbf16> to vector<128x128xbf16>
    %cst_11 = arith.constant dense<0.000000e+00> : vector<80x128xf32>
    %11 = tpu.matmul %8, %10, %cst_11 {dimension_numbers = #tpu.dot_dimension_numbers<[1], [0], [0], [1], [0, 0, 1, 1], [], []>} : vector<80x128xbf16>, vector<128x128xbf16>, vector<80x128xf32> -> vector<80x128xf32>
    %12 = arith.addf %6, %11 : vector<80x128xf32>
    %c0_12 = arith.constant 0 : index
    %c2 = arith.constant 2 : index
    %c0_13 = arith.constant 0 : index
    %13 = vector.load %arg1[%c0_12, %c2, %c0_13] : memref<1x104x128xbf16, #tpu.memory_space<vmem>>, vector<1x80x128xbf16>
    %14 = vector.shape_cast %13 : vector<1x80x128xbf16> to vector<80x128xbf16>
    %c2_14 = arith.constant 2 : index
    %c0_15 = arith.constant 0 : index
    %c0_16 = arith.constant 0 : index
    %15 = vector.load %arg2[%c2_14, %c0_15, %c0_16] : memref<9x128x128xbf16, #tpu.memory_space<vmem>>, vector<1x128x128xbf16>
    %16 = vector.shape_cast %15 : vector<1x128x128xbf16> to vector<128x128xbf16>
    %cst_17 = arith.constant dense<0.000000e+00> : vector<80x128xf32>
    %17 = tpu.matmul %14, %16, %cst_17 {dimension_numbers = #tpu.dot_dimension_numbers<[1], [0], [0], [1], [0, 0, 1, 1], [], []>} : vector<80x128xbf16>, vector<128x128xbf16>, vector<80x128xf32> -> vector<80x128xf32>
    %18 = arith.addf %12, %17 : vector<80x128xf32>
    %c0_18 = arith.constant 0 : index
    %c10 = arith.constant 10 : index
    %c0_19 = arith.constant 0 : index
    %19 = vector.load %arg1[%c0_18, %c10, %c0_19] : memref<1x104x128xbf16, #tpu.memory_space<vmem>>, vector<1x80x128xbf16>
    %20 = vector.shape_cast %19 : vector<1x80x128xbf16> to vector<80x128xbf16>
    %c3 = arith.constant 3 : index
    %c0_20 = arith.constant 0 : index
    %c0_21 = arith.constant 0 : index
    %21 = vector.load %arg2[%c3, %c0_20, %c0_21] : memref<9x128x128xbf16, #tpu.memory_space<vmem>>, vector<1x128x128xbf16>
    %22 = vector.shape_cast %21 : vector<1x128x128xbf16> to vector<128x128xbf16>
    %cst_22 = arith.constant dense<0.000000e+00> : vector<80x128xf32>
    %23 = tpu.matmul %20, %22, %cst_22 {dimension_numbers = #tpu.dot_dimension_numbers<[1], [0], [0], [1], [0, 0, 1, 1], [], []>} : vector<80x128xbf16>, vector<128x128xbf16>, vector<80x128xf32> -> vector<80x128xf32>
    %24 = arith.addf %18, %23 : vector<80x128xf32>
    %c0_23 = arith.constant 0 : index
    %c11 = arith.constant 11 : index
    %c0_24 = arith.constant 0 : index
    %25 = vector.load %arg1[%c0_23, %c11, %c0_24] : memref<1x104x128xbf16, #tpu.memory_space<vmem>>, vector<1x80x128xbf16>
    %26 = vector.shape_cast %25 : vector<1x80x128xbf16> to vector<80x128xbf16>
    %c4 = arith.constant 4 : index
    %c0_25 = arith.constant 0 : index
    %c0_26 = arith.constant 0 : index
    %27 = vector.load %arg2[%c4, %c0_25, %c0_26] : memref<9x128x128xbf16, #tpu.memory_space<vmem>>, vector<1x128x128xbf16>
    %28 = vector.shape_cast %27 : vector<1x128x128xbf16> to vector<128x128xbf16>
    %cst_27 = arith.constant dense<0.000000e+00> : vector<80x128xf32>
    %29 = tpu.matmul %26, %28, %cst_27 {dimension_numbers = #tpu.dot_dimension_numbers<[1], [0], [0], [1], [0, 0, 1, 1], [], []>} : vector<80x128xbf16>, vector<128x128xbf16>, vector<80x128xf32> -> vector<80x128xf32>
    %30 = arith.addf %24, %29 : vector<80x128xf32>
    %c0_28 = arith.constant 0 : index
    %c12 = arith.constant 12 : index
    %c0_29 = arith.constant 0 : index
    %31 = vector.load %arg1[%c0_28, %c12, %c0_29] : memref<1x104x128xbf16, #tpu.memory_space<vmem>>, vector<1x80x128xbf16>
    %32 = vector.shape_cast %31 : vector<1x80x128xbf16> to vector<80x128xbf16>
    %c5 = arith.constant 5 : index
    %c0_30 = arith.constant 0 : index
    %c0_31 = arith.constant 0 : index
    %33 = vector.load %arg2[%c5, %c0_30, %c0_31] : memref<9x128x128xbf16, #tpu.memory_space<vmem>>, vector<1x128x128xbf16>
    %34 = vector.shape_cast %33 : vector<1x128x128xbf16> to vector<128x128xbf16>
    %cst_32 = arith.constant dense<0.000000e+00> : vector<80x128xf32>
    %35 = tpu.matmul %32, %34, %cst_32 {dimension_numbers = #tpu.dot_dimension_numbers<[1], [0], [0], [1], [0, 0, 1, 1], [], []>} : vector<80x128xbf16>, vector<128x128xbf16>, vector<80x128xf32> -> vector<80x128xf32>
    %36 = arith.addf %30, %35 : vector<80x128xf32>
    %c0_33 = arith.constant 0 : index
    %c20 = arith.constant 20 : index
    %c0_34 = arith.constant 0 : index
    %37 = vector.load %arg1[%c0_33, %c20, %c0_34] : memref<1x104x128xbf16, #tpu.memory_space<vmem>>, vector<1x80x128xbf16>
    %38 = vector.shape_cast %37 : vector<1x80x128xbf16> to vector<80x128xbf16>
    %c6 = arith.constant 6 : index
    %c0_35 = arith.constant 0 : index
    %c0_36 = arith.constant 0 : index
    %39 = vector.load %arg2[%c6, %c0_35, %c0_36] : memref<9x128x128xbf16, #tpu.memory_space<vmem>>, vector<1x128x128xbf16>
    %40 = vector.shape_cast %39 : vector<1x128x128xbf16> to vector<128x128xbf16>
    %cst_37 = arith.constant dense<0.000000e+00> : vector<80x128xf32>
    %41 = tpu.matmul %38, %40, %cst_37 {dimension_numbers = #tpu.dot_dimension_numbers<[1], [0], [0], [1], [0, 0, 1, 1], [], []>} : vector<80x128xbf16>, vector<128x128xbf16>, vector<80x128xf32> -> vector<80x128xf32>
    %42 = arith.addf %36, %41 : vector<80x128xf32>
    %c0_38 = arith.constant 0 : index
    %c21 = arith.constant 21 : index
    %c0_39 = arith.constant 0 : index
    %43 = vector.load %arg1[%c0_38, %c21, %c0_39] : memref<1x104x128xbf16, #tpu.memory_space<vmem>>, vector<1x80x128xbf16>
    %44 = vector.shape_cast %43 : vector<1x80x128xbf16> to vector<80x128xbf16>
    %c7 = arith.constant 7 : index
    %c0_40 = arith.constant 0 : index
    %c0_41 = arith.constant 0 : index
    %45 = vector.load %arg2[%c7, %c0_40, %c0_41] : memref<9x128x128xbf16, #tpu.memory_space<vmem>>, vector<1x128x128xbf16>
    %46 = vector.shape_cast %45 : vector<1x128x128xbf16> to vector<128x128xbf16>
    %cst_42 = arith.constant dense<0.000000e+00> : vector<80x128xf32>
    %47 = tpu.matmul %44, %46, %cst_42 {dimension_numbers = #tpu.dot_dimension_numbers<[1], [0], [0], [1], [0, 0, 1, 1], [], []>} : vector<80x128xbf16>, vector<128x128xbf16>, vector<80x128xf32> -> vector<80x128xf32>
    %48 = arith.addf %42, %47 : vector<80x128xf32>
    %c0_43 = arith.constant 0 : index
    %c22 = arith.constant 22 : index
    %c0_44 = arith.constant 0 : index
    %49 = vector.load %arg1[%c0_43, %c22, %c0_44] : memref<1x104x128xbf16, #tpu.memory_space<vmem>>, vector<1x80x128xbf16>
    %50 = vector.shape_cast %49 : vector<1x80x128xbf16> to vector<80x128xbf16>
    %c8 = arith.constant 8 : index
    %c0_45 = arith.constant 0 : index
    %c0_46 = arith.constant 0 : index
    %51 = vector.load %arg2[%c8, %c0_45, %c0_46] : memref<9x128x128xbf16, #tpu.memory_space<vmem>>, vector<1x128x128xbf16>
    %52 = vector.shape_cast %51 : vector<1x128x128xbf16> to vector<128x128xbf16>
    %cst_47 = arith.constant dense<0.000000e+00> : vector<80x128xf32>
    %53 = tpu.matmul %50, %52, %cst_47 {dimension_numbers = #tpu.dot_dimension_numbers<[1], [0], [0], [1], [0, 0, 1, 1], [], []>} : vector<80x128xbf16>, vector<128x128xbf16>, vector<80x128xf32> -> vector<80x128xf32>
    %54 = arith.addf %48, %53 : vector<80x128xf32>
    %c0_48 = arith.constant 0 : index
    %c0_49 = arith.constant 0 : index
    %55 = vector.load %arg3[%c0_48, %c0_49] : memref<1x128xf32, #tpu.memory_space<vmem>>, vector<1x128xf32>
    %56 = vector.broadcast %55 : vector<1x128xf32> to vector<80x128xf32>
    %57 = arith.addf %54, %56 : vector<80x128xf32>
    %cst_50 = arith.constant 0.000000e+00 : f32
    %58 = vector.broadcast %cst_50 : f32 to vector<80x128xf32>
    %59 = arith.maximumf %57, %58 : vector<80x128xf32>
    %60 = tpu.iota {dimensions = array<i32: 0>} : vector<80x1xi32>
    %c10_i32 = arith.constant 10 : i32
    %c0_i32 = arith.constant 0 : i32
    %61 = arith.cmpi eq, %c10_i32, %c0_i32 : i32
    %c1_i32 = arith.constant 1 : i32
    %62 = arith.select %61, %c1_i32, %c10_i32 : i32
    %63 = vector.broadcast %62 : i32 to vector<80x1xi32>
    %64 = arith.remsi %60, %63 : vector<80x1xi32>
    %c0_i32_51 = arith.constant 0 : i32
    %65 = vector.broadcast %c0_i32_51 : i32 to vector<80x1xi32>
    %66 = arith.cmpi ne, %64, %65 : vector<80x1xi32>
    %c0_i32_52 = arith.constant 0 : i32
    %67 = vector.broadcast %c0_i32_52 : i32 to vector<80x1xi32>
    %68 = arith.cmpi slt, %64, %67 : vector<80x1xi32>
    %c0_i32_53 = arith.constant 0 : i32
    %69 = arith.cmpi slt, %62, %c0_i32_53 : i32
    %70 = vector.broadcast %69 : i1 to vector<80x1xi1>
    %71 = vector.broadcast %70 : vector<80x1xi1> to vector<80x1xi1>
    %72 = arith.xori %68, %71 : vector<80x1xi1>
    %73 = arith.andi %72, %66 : vector<80x1xi1>
    %74 = vector.broadcast %62 : i32 to vector<80x1xi32>
    %75 = arith.addi %64, %74 : vector<80x1xi32>
    %76 = arith.select %73, %75, %64 : vector<80x1xi1>, vector<80x1xi32>
    %c8_i32 = arith.constant 8 : i32
    %77 = vector.broadcast %c8_i32 : i32 to vector<80x1xi32>
    %78 = arith.cmpi slt, %76, %77 : vector<80x1xi32>
    %cst_54 = arith.constant 0.000000e+00 : f32
    %79 = vector.shape_cast %78 : vector<80x1xi1> to vector<80x1xi1>
    %80 = vector.broadcast %79 : vector<80x1xi1> to vector<80x128xi1>
    %81 = vector.broadcast %cst_54 : f32 to vector<80x128xf32>
    %82 = arith.select %80, %59, %81 : vector<80x128xi1>, vector<80x128xf32>
    %cst_55 = arith.constant 0.000000e+00 : bf16
    %83 = vector.broadcast %cst_55 : bf16 to vector<11x128xbf16>
    %c0_56 = arith.constant 0 : index
    %c0_57 = arith.constant 0 : index
    %84 = vector.load %arg9[%c0_56, %c0_57] : memref<104x128xbf16, #tpu.memory_space<vmem>>, vector<11x128xbf16>
    tpu.vector_store %arg9[%c0_56, %c0_57], %83 {strides = array<i32>} : memref<104x128xbf16, #tpu.memory_space<vmem>>, vector<11x128xbf16>,
    %85 = arith.truncf %82 : vector<80x128xf32> to vector<80x128xbf16>
    %c11_58 = arith.constant 11 : index
    %c0_59 = arith.constant 0 : index
    %86 = vector.load %arg9[%c11_58, %c0_59] : memref<104x128xbf16, #tpu.memory_space<vmem>>, vector<80x128xbf16>
    tpu.vector_store %arg9[%c11_58, %c0_59], %85 {strides = array<i32>} : memref<104x128xbf16, #tpu.memory_space<vmem>>, vector<80x128xbf16>,
    %cst_60 = arith.constant 0.000000e+00 : bf16
    %87 = vector.broadcast %cst_60 : bf16 to vector<13x128xbf16>
    %c91 = arith.constant 91 : index
    %c0_61 = arith.constant 0 : index
    %88 = vector.load %arg9[%c91, %c0_61] : memref<104x128xbf16, #tpu.memory_space<vmem>>, vector<13x128xbf16>
    tpu.vector_store %arg9[%c91, %c0_61], %87 {strides = array<i32>} : memref<104x128xbf16, #tpu.memory_space<vmem>>, vector<13x128xbf16>,
    %cst_62 = arith.constant 0.000000e+00 : f32
    %89 = vector.broadcast %cst_62 : f32 to vector<80x128xf32>
    %c0_63 = arith.constant 0 : index
    %c0_64 = arith.constant 0 : index
    %90 = vector.load %arg9[%c0_63, %c0_64] : memref<104x128xbf16, #tpu.memory_space<vmem>>, vector<80x128xbf16>
    %c0_65 = arith.constant 0 : index
    %c0_66 = arith.constant 0 : index
    %c0_67 = arith.constant 0 : index
    %91 = vector.load %arg4[%c0_65, %c0_66, %c0_67] : memref<9x128x128xbf16, #tpu.memory_space<vmem>>, vector<1x128x128xbf16>
    %92 = vector.shape_cast %91 : vector<1x128x128xbf16> to vector<128x128xbf16>
    %cst_68 = arith.constant dense<0.000000e+00> : vector<80x128xf32>
    %93 = tpu.matmul %90, %92, %cst_68 {dimension_numbers = #tpu.dot_dimension_numbers<[1], [0], [0], [1], [0, 0, 1, 1], [], []>} : vector<80x128xbf16>, vector<128x128xbf16>, vector<80x128xf32> -> vector<80x128xf32>
    %94 = arith.addf %89, %93 : vector<80x128xf32>
    %c1_69 = arith.constant 1 : index
    %c0_70 = arith.constant 0 : index
    %95 = vector.load %arg9[%c1_69, %c0_70] : memref<104x128xbf16, #tpu.memory_space<vmem>>, vector<80x128xbf16>
    %c1_71 = arith.constant 1 : index
    %c0_72 = arith.constant 0 : index
    %c0_73 = arith.constant 0 : index
    %96 = vector.load %arg4[%c1_71, %c0_72, %c0_73] : memref<9x128x128xbf16, #tpu.memory_space<vmem>>, vector<1x128x128xbf16>
    %97 = vector.shape_cast %96 : vector<1x128x128xbf16> to vector<128x128xbf16>
    %cst_74 = arith.constant dense<0.000000e+00> : vector<80x128xf32>
    %98 = tpu.matmul %95, %97, %cst_74 {dimension_numbers = #tpu.dot_dimension_numbers<[1], [0], [0], [1], [0, 0, 1, 1], [], []>} : vector<80x128xbf16>, vector<128x128xbf16>, vector<80x128xf32> -> vector<80x128xf32>
    %99 = arith.addf %94, %98 : vector<80x128xf32>
    %c2_75 = arith.constant 2 : index
    %c0_76 = arith.constant 0 : index
    %100 = vector.load %arg9[%c2_75, %c0_76] : memref<104x128xbf16, #tpu.memory_space<vmem>>, vector<80x128xbf16>
    %c2_77 = arith.constant 2 : index
    %c0_78 = arith.constant 0 : index
    %c0_79 = arith.constant 0 : index
    %101 = vector.load %arg4[%c2_77, %c0_78, %c0_79] : memref<9x128x128xbf16, #tpu.memory_space<vmem>>, vector<1x128x128xbf16>
    %102 = vector.shape_cast %101 : vector<1x128x128xbf16> to vector<128x128xbf16>
    %cst_80 = arith.constant dense<0.000000e+00> : vector<80x128xf32>
    %103 = tpu.matmul %100, %102, %cst_80 {dimension_numbers = #tpu.dot_dimension_numbers<[1], [0], [0], [1], [0, 0, 1, 1], [], []>} : vector<80x128xbf16>, vector<128x128xbf16>, vector<80x128xf32> -> vector<80x128xf32>
    %104 = arith.addf %99, %103 : vector<80x128xf32>
    %c10_81 = arith.constant 10 : index
    %c0_82 = arith.constant 0 : index
    %105 = vector.load %arg9[%c10_81, %c0_82] : memref<104x128xbf16, #tpu.memory_space<vmem>>, vector<80x128xbf16>
    %c3_83 = arith.constant 3 : index
    %c0_84 = arith.constant 0 : index
    %c0_85 = arith.constant 0 : index
    %106 = vector.load %arg4[%c3_83, %c0_84, %c0_85] : memref<9x128x128xbf16, #tpu.memory_space<vmem>>, vector<1x128x128xbf16>
    %107 = vector.shape_cast %106 : vector<1x128x128xbf16> to vector<128x128xbf16>
    %cst_86 = arith.constant dense<0.000000e+00> : vector<80x128xf32>
    %108 = tpu.matmul %105, %107, %cst_86 {dimension_numbers = #tpu.dot_dimension_numbers<[1], [0], [0], [1], [0, 0, 1, 1], [], []>} : vector<80x128xbf16>, vector<128x128xbf16>, vector<80x128xf32> -> vector<80x128xf32>
    %109 = arith.addf %104, %108 : vector<80x128xf32>
    %c11_87 = arith.constant 11 : index
    %c0_88 = arith.constant 0 : index
    %110 = vector.load %arg9[%c11_87, %c0_88] : memref<104x128xbf16, #tpu.memory_space<vmem>>, vector<80x128xbf16>
    %c4_89 = arith.constant 4 : index
    %c0_90 = arith.constant 0 : index
    %c0_91 = arith.constant 0 : index
    %111 = vector.load %arg4[%c4_89, %c0_90, %c0_91] : memref<9x128x128xbf16, #tpu.memory_space<vmem>>, vector<1x128x128xbf16>
    %112 = vector.shape_cast %111 : vector<1x128x128xbf16> to vector<128x128xbf16>
    %cst_92 = arith.constant dense<0.000000e+00> : vector<80x128xf32>
    %113 = tpu.matmul %110, %112, %cst_92 {dimension_numbers = #tpu.dot_dimension_numbers<[1], [0], [0], [1], [0, 0, 1, 1], [], []>} : vector<80x128xbf16>, vector<128x128xbf16>, vector<80x128xf32> -> vector<80x128xf32>
    %114 = arith.addf %109, %113 : vector<80x128xf32>
    %c12_93 = arith.constant 12 : index
    %c0_94 = arith.constant 0 : index
    %115 = vector.load %arg9[%c12_93, %c0_94] : memref<104x128xbf16, #tpu.memory_space<vmem>>, vector<80x128xbf16>
    %c5_95 = arith.constant 5 : index
    %c0_96 = arith.constant 0 : index
    %c0_97 = arith.constant 0 : index
    %116 = vector.load %arg4[%c5_95, %c0_96, %c0_97] : memref<9x128x128xbf16, #tpu.memory_space<vmem>>, vector<1x128x128xbf16>
    %117 = vector.shape_cast %116 : vector<1x128x128xbf16> to vector<128x128xbf16>
    %cst_98 = arith.constant dense<0.000000e+00> : vector<80x128xf32>
    %118 = tpu.matmul %115, %117, %cst_98 {dimension_numbers = #tpu.dot_dimension_numbers<[1], [0], [0], [1], [0, 0, 1, 1], [], []>} : vector<80x128xbf16>, vector<128x128xbf16>, vector<80x128xf32> -> vector<80x128xf32>
    %119 = arith.addf %114, %118 : vector<80x128xf32>
    %c20_99 = arith.constant 20 : index
    %c0_100 = arith.constant 0 : index
    %120 = vector.load %arg9[%c20_99, %c0_100] : memref<104x128xbf16, #tpu.memory_space<vmem>>, vector<80x128xbf16>
    %c6_101 = arith.constant 6 : index
    %c0_102 = arith.constant 0 : index
    %c0_103 = arith.constant 0 : index
    %121 = vector.load %arg4[%c6_101, %c0_102, %c0_103] : memref<9x128x128xbf16, #tpu.memory_space<vmem>>, vector<1x128x128xbf16>
    %122 = vector.shape_cast %121 : vector<1x128x128xbf16> to vector<128x128xbf16>
    %cst_104 = arith.constant dense<0.000000e+00> : vector<80x128xf32>
    %123 = tpu.matmul %120, %122, %cst_104 {dimension_numbers = #tpu.dot_dimension_numbers<[1], [0], [0], [1], [0, 0, 1, 1], [], []>} : vector<80x128xbf16>, vector<128x128xbf16>, vector<80x128xf32> -> vector<80x128xf32>
    %124 = arith.addf %119, %123 : vector<80x128xf32>
    %c21_105 = arith.constant 21 : index
    %c0_106 = arith.constant 0 : index
    %125 = vector.load %arg9[%c21_105, %c0_106] : memref<104x128xbf16, #tpu.memory_space<vmem>>, vector<80x128xbf16>
    %c7_107 = arith.constant 7 : index
    %c0_108 = arith.constant 0 : index
    %c0_109 = arith.constant 0 : index
    %126 = vector.load %arg4[%c7_107, %c0_108, %c0_109] : memref<9x128x128xbf16, #tpu.memory_space<vmem>>, vector<1x128x128xbf16>
    %127 = vector.shape_cast %126 : vector<1x128x128xbf16> to vector<128x128xbf16>
    %cst_110 = arith.constant dense<0.000000e+00> : vector<80x128xf32>
    %128 = tpu.matmul %125, %127, %cst_110 {dimension_numbers = #tpu.dot_dimension_numbers<[1], [0], [0], [1], [0, 0, 1, 1], [], []>} : vector<80x128xbf16>, vector<128x128xbf16>, vector<80x128xf32> -> vector<80x128xf32>
    %129 = arith.addf %124, %128 : vector<80x128xf32>
    %c22_111 = arith.constant 22 : index
    %c0_112 = arith.constant 0 : index
    %130 = vector.load %arg9[%c22_111, %c0_112] : memref<104x128xbf16, #tpu.memory_space<vmem>>, vector<80x128xbf16>
    %c8_113 = arith.constant 8 : index
    %c0_114 = arith.constant 0 : index
    %c0_115 = arith.constant 0 : index
    %131 = vector.load %arg4[%c8_113, %c0_114, %c0_115] : memref<9x128x128xbf16, #tpu.memory_space<vmem>>, vector<1x128x128xbf16>
    %132 = vector.shape_cast %131 : vector<1x128x128xbf16> to vector<128x128xbf16>
    %cst_116 = arith.constant dense<0.000000e+00> : vector<80x128xf32>
    %133 = tpu.matmul %130, %132, %cst_116 {dimension_numbers = #tpu.dot_dimension_numbers<[1], [0], [0], [1], [0, 0, 1, 1], [], []>} : vector<80x128xbf16>, vector<128x128xbf16>, vector<80x128xf32> -> vector<80x128xf32>
    %134 = arith.addf %129, %133 : vector<80x128xf32>
    %c0_117 = arith.constant 0 : index
    %c0_118 = arith.constant 0 : index
    %135 = vector.load %arg5[%c0_117, %c0_118] : memref<1x128xf32, #tpu.memory_space<vmem>>, vector<1x128xf32>
    %136 = vector.broadcast %135 : vector<1x128xf32> to vector<80x128xf32>
    %137 = arith.addf %134, %136 : vector<80x128xf32>
    %cst_119 = arith.constant 0.000000e+00 : f32
    %138 = vector.broadcast %cst_119 : f32 to vector<80x128xf32>
    %139 = arith.maximumf %137, %138 : vector<80x128xf32>
    %140 = arith.truncf %139 : vector<80x128xf32> to vector<80x128xbf16>
    %c0_120 = arith.constant 0 : index
    %c0_121 = arith.constant 0 : index
    %c0_122 = arith.constant 0 : index
    %141 = vector.load %arg8[%c0_120, %c0_121, %c0_122] : memref<1x80x128xbf16, #tpu.memory_space<vmem>>, vector<1x80x128xbf16>
    %142 = vector.shape_cast %141 : vector<1x80x128xbf16> to vector<80x128xbf16>
    %143 = vector.shape_cast %140 : vector<80x128xbf16> to vector<1x80x128xbf16>
    tpu.vector_store %arg8[%c0_120, %c0_121, %c0_122], %143 {strides = array<i32>} : memref<1x80x128xbf16, #tpu.memory_space<vmem>>, vector<1x80x128xbf16>,
    return
  }
  func.func @transform_0(%arg0: i32) -> (i32, i32, i32) {
    %c0_i32 = arith.constant 0 : i32
    %c0_i32_0 = arith.constant 0 : i32
    %c0_i32_1 = arith.constant 0 : i32
    return %arg0, %c0_i32, %c0_i32_0 : i32, i32, i32
  }
  func.func @transform_1(%arg0: i32) -> (i32, i32, i32) {
    %c0_i32 = arith.constant 0 : i32
    %c0_i32_0 = arith.constant 0 : i32
    %c0_i32_1 = arith.constant 0 : i32
    %c0_i32_2 = arith.constant 0 : i32
    return %c0_i32, %c0_i32_0, %c0_i32_1 : i32, i32, i32
  }
  func.func @transform_2(%arg0: i32) -> (i32, i32) {
    %c0_i32 = arith.constant 0 : i32
    %c0_i32_0 = arith.constant 0 : i32
    %c0_i32_1 = arith.constant 0 : i32
    return %c0_i32, %c0_i32_0 : i32, i32
  }
  func.func @transform_3(%arg0: i32) -> (i32, i32, i32) {
    %c0_i32 = arith.constant 0 : i32
    %c0_i32_0 = arith.constant 0 : i32
    %c0_i32_1 = arith.constant 0 : i32
    %c0_i32_2 = arith.constant 0 : i32
    return %c0_i32, %c0_i32_0, %c0_i32_1 : i32, i32, i32
  }
  func.func @transform_4(%arg0: i32) -> (i32, i32) {
    %c0_i32 = arith.constant 0 : i32
    %c0_i32_0 = arith.constant 0 : i32
    %c0_i32_1 = arith.constant 0 : i32
    return %c0_i32, %c0_i32_0 : i32, i32
  }
  func.func @transform_5(%arg0: i32) -> (i32, i32) {
    %c0_i32 = arith.constant 0 : i32
    %c0_i32_0 = arith.constant 0 : i32
    %c0_i32_1 = arith.constant 0 : i32
    return %c0_i32, %c0_i32_0 : i32, i32
  }
  func.func @transform_6(%arg0: i32) -> (i32, i32) {
    %c0_i32 = arith.constant 0 : i32
    %c0_i32_0 = arith.constant 0 : i32
    %c0_i32_1 = arith.constant 0 : i32
    return %c0_i32, %c0_i32_0 : i32, i32
  }
  func.func @transform_7(%arg0: i32) -> (i32, i32, i32) {
    %c0_i32 = arith.constant 0 : i32
    %c0_i32_0 = arith.constant 0 : i32
    %c0_i32_1 = arith.constant 0 : i32
    return %arg0, %c0_i32, %c0_i32_0 : i32, i32, i32
  }
}

</mosaic_0001>

<bundles_post_ra>
// kernel: tpu_custom_call.1
= control target key start
LH: loop header
LB: loop body
LE: loop exit
PB: predicated region body
PF: predicated region fallthrough
CT: control target
= control target key end

     0   :  { %s6243_s0 = inlined_call_operand.hbm [shape: bf16[2,104,128], index: 0, kind: input, shape index: {}]   ;;  %s6244_s1 = inlined_call_operand.hbm [shape: bf16[9,128,128], index: 1, kind: input, shape index: {}]   ;;  %s6245_s2 = inlined_call_operand.vmem [shape: f32[1,128], index: 2, kind: input, shape index: {}]   ;;  %s6246_s3 = inlined_call_operand.hbm [shape: bf16[9,128,128], index: 3, kind: input, shape index: {}]   ;;  %s6247_s4 = inlined_call_operand.vmem [shape: f32[1,128], index: 4, kind: input, shape index: {}]   ;;  %s6248_s5 = inlined_call_operand.hbm [shape: f32[128,128], index: 5, kind: input, shape index: {}]   ;;  %s6249_s6 = inlined_call_operand.hbm [shape: f32[128,128], index: 6, kind: input, shape index: {}]   ;;  %s6250_s7 = inlined_call_operand.hbm [shape: bf16[2,80,128], index: 7, kind: output, shape index: {}]  }
   0x1   :  { %6256 = sst [smem:[#allocation17_spill]] %s6244_s1 }
   0x2   :  { %6257 = sst [smem:[#allocation18_spill]] %s6246_s3 }
   0x3   :  { %6258 = sst [smem:[#allocation19_spill]] %s6248_s5 }
   0x4   :  { %12 = vsyncpa [#allocation4], 0 }
   0x5   :  { %14 = vsyncpa [#allocation4 + $0x1], 0 }
   0x6   :  { %15 = vsyncpa [#allocation7], 0 }
   0x7   :  { %16 = vsyncpa [#allocation10], 0 }
   0x8   :  { %17 = vsyncpa [#allocation5], 0 }
   0x9   :  { %19 = vsyncpa [#allocation5 + $0x1], 0  ;;  %s5096_s24 = smov 0   ;;  %s5098_s25 = smov 0  }
   0xa   :  { %s5100_s26 = smov 0   ;;  %s5102_s27 = smov 0  }
   0xb LB: > { %s5117_s28 = sadd.s32 4294967295, %s5043_s27   ;;  %s3803_s29 = sadd.s32 4294967294, %s5043_s27   ;;  %s5043_s27 = sphi %s5102_s27, %s6340_s27   ;;  %s5039_s26 = sphi %s5100_s26, %s6339_s26   ;;  %s5035_s25 = sphi %s5098_s25, %s6338_s25   ;;  %s5031_s24 = sphi %s5096_s24, %s6337_s24  }
   0xc   : > { %p45_p0 = scmp.ne.s32.totalorder %s5035_s25, %s5031_s24  ;;  %p46_p1 = scmp.eq.s32.totalorder %s5117_s28, 0 }
   0xd   : > { %p195_p2 = scmp.eq.s32.totalorder %s5117_s28, 1  ;;  %p201_p3 = scmp.eq.s32.totalorder %s3803_s29, 1 }
   0xe   : > { %p5126_p4 = por %p46_p1, %p45_p0  ;;  %p3804_p5 = scmp.ge.s32.totalorder %s5043_s27, 1 }
   0xf   : > { %p5131_p6 = por %p201_p3, %p45_p0  ;;  %p208_p7 = scmp.lt.s32.totalorder %s5043_s27, 3 }
  0x10   : > { %s6261_s1 = sld [smem:[#allocation17_spill]]  ;;  %s5045_s13 = smov [#allocation6]  }
  0x11   : > { %p5139_p8 = pnand %p3804_p5, %p208_p7  ;;  %s221_s14 = sshll.u32 %s5045_s13, 4  ;;  %s222_s14 = int_to_ptr.vmem [resolvable:$true] %s221_s14 }
  0x12   : > { %s6264_s5 = sld [smem:[#allocation19_spill]]  ;;  %s6251_s19 = smov 64  }
  0x13   : > { %p4743_p9 = pneg %p5139_p8  ;;  %s6252_s20 = smov 4  }
  0x14   : > { %s5048_s21 = smov [#allocation9]   ;;  %s5049_s23 = smov 128  }
  0x15   : > { %p5147_p10 = pnand %p4743_p9, %p46_p1  ;;  %s255_s22 = sshll.u32 %s5048_s21, 4  ;;  %s256_s22 = int_to_ptr.vmem [resolvable:$true] %s255_s22 }
  0x16   : > { %s219_s11 = sshll.u32 %s6261_s1, 4  ;;  %s5050_s29 = smov 8   ;;  %s220_s11 = int_to_ptr.hbm [resolvable:$true] %s219_s11 }
  0x17   : > { %4746 = dma.hbm_to_vmem [thread:$0]  (!%p5147_p10), %s220_s11, 9216, %s222_s14, [#allocation7], %s6251_s19, %s6251_s19, %s6252_s20  }
  0x18   : > { %s253_s18 = sshll.u32 %s6264_s5, 4  ;;  %s6265_s3 = sld [smem:[#allocation18_spill]]  ;;  %s254_s18 = int_to_ptr.hbm [resolvable:$true] %s253_s18 }
  0x19   : > { %4752 = dma.hbm_to_vmem [thread:$0]  (!%p5147_p10), %s254_s18, 2048, %s256_s22, [#allocation10], %s5049_s23, %s5049_s23, %s5050_s29  }
  0x1a   : > { %s5051_s11 = smov [#allocation8]   ;;  %s267_s21 = sshll.u32 %s6249_s6, 4  ;;  %s268_s21 = int_to_ptr.hbm [resolvable:$true] %s267_s21 }
  0x1b   : > { %s238_s14 = sshll.u32 %s5051_s11, 4  ;;  %s5052_s18 = smov [#allocation11]   ;;  %s239_s14 = int_to_ptr.vmem [resolvable:$true] %s238_s14 }
  0x1c   : > { %s269_s22 = sshll.u32 %s5052_s18, 4  ;;  %s5176_s9 = sadd.s32 1, %s5043_s27   ;;  %s270_s22 = int_to_ptr.vmem [resolvable:$true] %s269_s22 }
  0x1d   : > { %4755 = dma.hbm_to_vmem [thread:$0]  (!%p5147_p10), %s268_s21, 2048, %s270_s22, [#allocation10], %s5049_s23, %s5049_s23, %s5050_s29  }
  0x1e   : > { %s236_s13 = sshll.u32 %s6265_s3, 4  ;;  %s32_s10 = sadd.s32 1, %s5039_s26  ;;  %s237_s13 = int_to_ptr.hbm [resolvable:$true] %s236_s13 }
  0x1f   : > { %4749 = dma.hbm_to_vmem [thread:$0]  (!%p5147_p10), %s237_s13, 9216, %s239_s14, [#allocation7], %s6251_s19, %s6251_s19, %s6252_s20  }
  0x20   : > { %s29_s11 = ssub.s32 %s5043_s27, %s5176_s9  ;;  %p39_p12 = scmp.ne.s32.totalorder %s5039_s26, %s5035_s25 }
  0x21   : > { %p30_p13 = scmp.eq.s32.totalorder %s29_s11, 0  ;;  %p40_p0 = scmp.eq.s32.totalorder %s5043_s27, 0 }
  0x22   : > { %p5186_p3 = por %p195_p2, %p39_p12  ;;  %p4768_p5 = scmp.lt.s32.totalorder %s5043_s27, 2 }
  0x23   : > { %s5192_s13 = scalar_select %p30_p13, %s5039_s26, %s32_s10  }
  0x24   : > { %p41_p7 = por %p40_p0, %p39_p12  ;;  %s283_s14 = sand.u32 1, %s5039_s26  }
  0x25   : > { %s4718_s15 = smul.u32 52, %s283_s14  ;;  %s284_s10 = scalar_lea.sflag [#allocation4], %s283_s14 }
  0x26   : > { %s4719_s23 = smul.u32 52, %s5043_s27  ;;  %p5196_p9 = pnand %p4768_p5, %p41_p7 }
  0x27   : > { %s287_s22 = scalar_lea.vmem [#allocation3], %s4718_s15  ;;  %s4946_s17 = scalar_lea.hbm %s6243_s0, 104 }
  0x28   : > { %s292_s18 = scalar_lea.hbm %s6243_s0, %s4719_s23  ;;  %s295_s11 = sshll.u32 %s287_s22, 4  ;;  %s296_s11 = int_to_ptr.vmem [resolvable:$true] %s295_s11 }
  0x29   : > { %s293_s19 = sshll.u32 %s292_s18, 4  ;;  %p4943_p10 = pneg %p5196_p9  ;;  %s294_s19 = int_to_ptr.hbm [resolvable:$true] %s293_s19 }
  0x2a   : > { %s4939_s20 = sshra.s32 %s294_s19, 4  ;;  %s4940_s20 = int_to_ptr.hbm [resolvable:$true] %s4939_s20 }
  0x2b   : > { %s4941_s1 = scalar_lea.hbm %s4940_s20, 52  ;;  %p4947_p0 = scmp.lt.s32.totalorder %s4940_s20, %s6243_s0 }
  0x2c   : > { %p4942_p2 = scmp.ne.s32.totalorder %s4940_s20, %s4941_s1  ;;  %p4948_p5 = scmp.lt.s32.totalorder %s4946_s17, %s4941_s1 }
  0x2e   : > { %p4944_p12 = pnand %p4943_p10, %p4942_p2  ;;  %p4949_p7 = por %p4948_p5, %p4947_p0 }
  0x30   : > { %p4945_p13 = pneg %p4944_p12 }
  0x32   : > { %p4950_p11 = pnand %p4949_p7, %p4945_p13 }
  0x34   : > { %4953 = shalt.err (!%p4950_p11)
}
  0x35   : > { %s6268_s14 = smov 4   ;;  %s6269_s15 = smov 64  }
  0x36   : > { %4759 = dma.hbm_to_vmem [thread:$0]  (!%p5196_p9), %s294_s19, 832, %s296_s11, %s284_s10, %s6269_s15, %s6269_s15, %s6268_s14  }
  0x37   : > { %307 = sbr.rel (%p5139_p8) target bundleno = 776 (0x308), region = 48  ;;  %s5219_s3 = sand.u32 (!%p5139_p8), 1, %s5035_s25  }
  0x38   : > { %s4720_s5 = smul.u32 (!%p5139_p8), 52, %s5219_s3  ;;  %s310_s1 = scalar_lea.sflag (!%p5139_p8), [#allocation4], %s5219_s3 }
  0x3a   : > { %s5223_s20 = scalar_lea.vmem (!%p5139_p8), [#allocation3], %s4720_s5 }
  0x3c   : > { %5014 = dma.done.wait (%p5126_p4), %s310_s1, 832  }
  0x3d   : > { %5016 = vsyncadd (%p5126_p4), %s310_s1, 4294966464 }
  0x3e   : > { %5018 = dma.done.wait (%p46_p1), [#allocation7], 18432  }
  0x3f   : > { %5020 = vsyncadd (%p46_p1), [#allocation7], 4294948864 }
  0x40   : > { %5022 = dma.done.wait (%p46_p1), [#allocation10], 4096  }
  0x41   : > { %5024 = vsyncadd (%p46_p1), [#allocation10], 4294963200  ;;  %v4510_v0 = vld [vmem:[#allocation6 + $0x78] sm:$0xff]  ;;  %v4509_v2 = vld [vmem:[#allocation6 + $0x70] sm:$0xff]  ;;  %vm438_vm0 = vsmask.f32 7424 }
  0x42   : > { %v4502_v1 = vld [vmem:[#allocation6 + $0x38] sm:$0xff]  ;;  %4702 = vmatpush.bf16.msra.mxu2 %v4510_v0  ;;  %v4501_v3 = vld [vmem:[#allocation6 + $0x30] sm:$0xff]  ;;  %536 = vmatpush.bf16.msra.mxu0 %v4510_v0  ;;  %v4508_v4 = vld [vmem:[#allocation6 + $0x68] sm:$0xff]  ;;  %vm972_vm1 = vsmask.f32 6400  ;;  %vm6254_vm2 = vcmask 1045504  }
  0x43   : > { %4710 = vmatpush.bf16.msra.mxu3 %v4502_v1  ;;  %623 = vmatpush.bf16.msra.mxu1 %v4502_v1  ;;  %v4500_v5 = vld [vmem:[#allocation6 + $0x28] sm:$0xff]  ;;  %v4507_v6 = vld [vmem:[#allocation6 + $0x60] sm:$0xff]  ;;  %v4506_v8 = vld [vmem:[#allocation6 + $0x58] sm:$0xff]  ;;  %vm678_vm3 = vcmask 1046528   ;;  %vm6255_vm4 = vcmask 1044480   ;;  %vm2135_vm10 = vcmask 1041408  }
  0x44   : > { %v4499_v7 = vld [vmem:[#allocation6 + $0x20] sm:$0xff]  ;;  %v4498_v9 = vld [vmem:[#allocation6 + $0x18] sm:$0xff]  ;;  %v4505_v11 = vld [vmem:[#allocation6 + $0x50] sm:$0xff]  ;;  %vm6253_vm5 = vsmask.f32 5376  ;;  %s4721_s18 = smul.u32 40, %s5219_s3 }
  0x45   : > { %v5238_v10 = vld [vmem:[%s5223_s20 + $0x10] sm:$0xff]  ;;  %v4497_v12 = vld [vmem:[#allocation6 + $0x10] sm:$0xff]  ;;  %vm2136_vm11 = vsmask.f32 1280  ;;  %s4722_s11 = smul.u32 40, %s5117_s28  ;;  %s3677_s15 = scalar_lea.sflag [#allocation5], %s5219_s3 }
  0x46   : > { %4703 = vmatpush.bf16.msra.mxu2 %v4509_v2  ;;  %537 = vmatpush.bf16.msra.mxu0 %v4509_v2  ;;  %v5241_v13 = vld [vmem:[%s5223_s20 + $0x18] sm:$0xff]  ;;  %v455_v14 = vshll.u32 %v5238_v10, 16  ;;  %v4660_v15 = vld [vmem:[%s5223_s20] sm:$0xff]   ;;  %v5246_v16 = vld [vmem:[%s5223_s20 + $0x8] sm:$0xff]  ;;  %v459_v21 = vshrl.u32 %v5238_v10, 16  ;;  %s6190_s22 = scalar_lea.vmem [#allocation12], %s4721_s18 }
  0x47   : > { %4711 = vmatpush.bf16.msra.mxu3 %v4501_v3  ;;  %624 = vmatpush.bf16.msra.mxu1 %v4501_v3  ;;  %v442_v17 = vshll.u32 %v4660_v15, 16  ;;  %v4504_v18 = vld [vmem:[#allocation6 + $0x48] sm:$0xff]  ;;  %v463_v22 = vshll.u32 %v5241_v13, 16  ;;  %v440_v23 = vshrl.u32 %v4660_v15, 16  ;;  %v447_v25 = vshll.u32 %v5246_v16, 16  ;;  %v4503_v26 = vld [vmem:[#allocation6 + $0x40] sm:$0xff]  ;;  %vm5494_vm13 = vmand %vm2135_vm10, %vm2136_vm11  ;;  %s3688_s21 = scalar_lea.hbm %s6250_s7, %s4722_s11 }
  0x48   : > { %v4496_v19 = vld [vmem:[#allocation6 + $0x8] sm:$0xff]  ;;  %v5248_v20 = vrot.slane %v455_v14, 1  ;;  %v4495_v27 = vld [vmem:[#allocation6] sm:$0xff]  ;;  %v4518_v30 = vld [vmem:[#allocation6 + $0xb8] sm:$0xff]  ;;  %v467_v45 = vshrl.u32 %v5241_v13, 16  ;;  %v451_v51 = vshrl.u32 %v5246_v16, 16 }
  0x49   : > { %v444_v24 = vrot.slane %v442_v17, 1  ;;  %v465_v29 = vrot.slane %v463_v22, 1  ;;  %v4530_v31 = vld [vmem:[#allocation6 + $0xf8] sm:$0xff]  ;;  %v449_v33 = vrot.slane %v447_v25, 1  ;;  %v4517_v37 = vld [vmem:[#allocation6 + $0xb0] sm:$0xff]  ;;  %v4516_v43 = vld [vmem:[#allocation6 + $0xa8] sm:$0xff] }
  0x4a   : > { %4704 = vmatpush.bf16.msra.mxu2 %v4508_v4  ;;  %538 = vmatpush.bf16.msra.mxu0 %v4508_v4  ;;  %v461_v28 = vor.u32 %v459_v21, %v5248_v20  ;;  %v4538_v35 = vld [vmem:[#allocation6 + $0x138] sm:$0xff]  ;;  %v4529_v38 = vld [vmem:[#allocation6 + $0xf0] sm:$0xff]  ;;  %v4528_v44 = vld [vmem:[#allocation6 + $0xe8] sm:$0xff]  ;;  %s3689_s23 = sshll.u32 %s6190_s22, 4  ;;  %s3691_s14 = sshll.u32 %s3688_s21, 4  ;;  %s3690_s23 = int_to_ptr.vmem [resolvable:$true] %s3689_s23  ;;  %s3692_s14 = int_to_ptr.hbm [resolvable:$true] %s3691_s14 }
  0x4b   : > { %4712 = vmatpush.bf16.msra.mxu3 %v4500_v5  ;;  %625 = vmatpush.bf16.msra.mxu1 %v4500_v5  ;;  %v445_v32 = vor.u32 %v444_v24, %v440_v23  ;;  %v4546_v36 = vld [vmem:[#allocation6 + $0x178] sm:$0xff]  ;;  %v4537_v41 = vld [vmem:[#allocation6 + $0x130] sm:$0xff]  ;;  %v4536_v47 = vld [vmem:[#allocation6 + $0x128] sm:$0xff]  ;;  %v469_v54 = vor.u32 %v467_v45, %v465_v29  ;;  %v453_v63 = vor.u32 %v451_v51, %v449_v33  ;;  %s4983_s28 = sshra.s32 %s3692_s14, 4  ;;  %s4989_s30 = scalar_lea.hbm %s6250_s7, 80  ;;  %s4984_s28 = int_to_ptr.hbm [resolvable:$true] %s4983_s28 }
  0x4c   : > { %v466_v34 = vsel %vm438_vm0, %v461_v28, %v465_v29  ;;  %v5258_v40 = vld [vmem:[%s5223_s20 + $0x20] sm:$0xff]  ;;  %v4515_v49 = vld [vmem:[#allocation6 + $0xa0] sm:$0xff]  ;;  %s4985_s5 = scalar_lea.hbm %s4984_s28, 40  ;;  %p4990_p11 = scmp.lt.s32.totalorder %s4984_s28, %s6250_s7 }
  0x4d   : > { %v450_v39 = vsel %vm438_vm0, %v445_v32, %v449_v33  ;;  %v4545_v42 = vld [vmem:[#allocation6 + $0x170] sm:$0xff]  ;;  %v471_v46 = vshll.u32 %v5258_v40, 16  ;;  %v4544_v48 = vld [vmem:[#allocation6 + $0x168] sm:$0xff]  ;;  %v4527_v50 = vld [vmem:[#allocation6 + $0xe0] sm:$0xff]  ;;  %v475_v23 = vshrl.u32 %v5258_v40, 16  ;;  %p4986_p1 = scmp.ne.s32.totalorder %s4984_s28, %s4985_s5  ;;  %p4991_p9 = scmp.lt.s32.totalorder %s4989_s30, %s4985_s5 }
  0x4e   : > { %4705 = vmatpush.bf16.msra.mxu2 %v4507_v6  ;;  %539 = vmatpush.bf16.msra.mxu0 %v4507_v6  ;;  %v787_v52 = vld [vmem:[%s5223_s20 + $0x4] sm:$0xe]  ;;  %v5265_v53 = vld [vmem:[%s5223_s20 + $0x8] sm:$0xff]   ;;  %v4512_v14 = vld [vmem:[#allocation6 + $0x88] sm:$0xff] }
  0x4f   : > { %4713 = vmatpush.bf16.msra.mxu3 %v4499_v7  ;;  %626 = vmatpush.bf16.msra.mxu1 %v4499_v7  ;;  %v473_v55 = vrot.slane %v471_v46, 1  ;;  %v4535_v56 = vld [vmem:[#allocation6 + $0x120] sm:$0xff]  ;;  %v4514_v58 = vld [vmem:[#allocation6 + $0x98] sm:$0xff]  ;;  %v826_v61 = vunpack.c.l.b16 %v787_v52  ;;  %v827_v62 = vunpack.c.l.b16 %v5265_v53  ;;  %v4513_v4 = vld [vmem:[#allocation6 + $0x90] sm:$0xff]  ;;  %v458_v7 = vsel %vm438_vm0, %v453_v63, %v5248_v20  ;;  %p4987_p4 = pnand %p4986_p1, %p5186_p3  ;;  %p4992_p2 = por %p4991_p9, %p4990_p11 }
  0x50   : > { %v4543_v57 = vld [vmem:[#allocation6 + $0x160] sm:$0xff]  ;;  %v4526_v59 = vld [vmem:[#allocation6 + $0xd8] sm:$0xff]  ;;  %v4525_v5 = vld [vmem:[#allocation6 + $0xd0] sm:$0xff]  ;;  %v682_v52 = vrot.slane %v5238_v10, 1 }
  0x51   : > { %v392_v60 = vld [vmem:[%s5223_s20 + $0x28] sm:$0x1]  ;;  %v474_v0 = vsel %vm438_vm0, %v469_v54, %v473_v55  ;;  %v4534_v2 = vld [vmem:[#allocation6 + $0x118] sm:$0xff]  ;;  %v5270_v6 = vpack.c.b16 %v827_v62, %v826_v61  ;;  %v4532_v25 = vld [vmem:[#allocation6 + $0x108] sm:$0xff]  ;;  %p4988_p8 = pneg %p4987_p4 }
  0x52   : > { %4706 = vmatpush.bf16.msra.mxu2 %v4506_v8  ;;  %540 = vmatpush.bf16.msra.mxu0 %v4506_v8  ;;  %v431_v1 = vunpack.c.l.b16 %v392_v60  ;;  %v4542_v3 = vld [vmem:[#allocation6 + $0x158] sm:$0xff]  ;;  %v4523_v28 = vld [vmem:[#allocation6 + $0xc0] sm:$0xff]  ;;  %v4556_v54 = vld [vmem:[#allocation6 + $0x1a8] sm:$0xff] }
  0x53   : > { %4714 = vmatpush.bf16.msra.mxu3 %v4498_v9  ;;  %627 = vmatpush.bf16.msra.mxu1 %v4498_v9  ;;  %v5276_v8 = vld [vmem:[%s5223_s20 + $0xc] sm:$0xff]  ;;  %v1123_v17 = vld [vmem:[%s5223_s20 + $0x4] sm:$0xc]  ;;  %p4993_p10 = pnand %p4992_p2, %p4988_p8 }
  0x54   : > { %v5278_v9 = vpack.c.b16 %v431_v1, %v431_v1  ;;  %v982_v20 = vshrl.u32 %v5276_v8, 16  ;;  %v985_v21 = vshll.u32 %v5276_v8, 16  ;;  %v1142_v22 = vunpack.c.l.b16 %v1123_v17  ;;  %v4558_v29 = vld [vmem:[#allocation6 + $0x1b8] sm:$0xff]  ;;  %v4572_v60 = vld [vmem:[#allocation6 + $0x228] sm:$0xff]  ;;  %v4555_v63 = vld [vmem:[#allocation6 + $0x1a0] sm:$0xff] }
  0x55   : > { %v5314_v17 = vld [vmem:[%s5223_s20 + $0x1c] sm:$0xff] }
  0x56   : > { %4707 = vmatpush.bf16.msra.mxu2 %v4505_v11  ;;  %541 = vmatpush.bf16.msra.mxu0 %v4505_v11  ;;  %v4533_v11 = vld [vmem:[#allocation6 + $0x110] sm:$0xff]  ;;  %v479_v24 = vshll.u32 %v5278_v9, 16  ;;  %v984_v33 = vrot.slane %v982_v20, 1  ;;  %v4554_v20 = vld [vmem:[#allocation6 + $0x198] sm:$0xff] }
  0x57   : > { %4715 = vmatpush.bf16.msra.mxu3 %v4497_v12  ;;  %628 = vmatpush.bf16.msra.mxu1 %v4497_v12  ;;  %v4541_v12 = vld [vmem:[#allocation6 + $0x150] sm:$0xff] }
  0x5a   : > { %4708 = vmatpush.bf16.msra.mxu2 %v4504_v18  ;;  %542 = vmatpush.bf16.msra.mxu0 %v4504_v18  ;;  %v974_v18 = vshrl.u32 %v5270_v6, 16 }
  0x5b   : > { %4716 = vmatpush.bf16.msra.mxu3 %v4496_v19  ;;  %629 = vmatpush.bf16.msra.mxu1 %v4496_v19  ;;  %v977_v19 = vshll.u32 %v5270_v6, 16 }
  0x5d   : > { %v979_v32 = vrot.slane %v977_v19, 2 }
  0x5e   : > { %4709 = vmatpush.bf16.msra.mxu2 %v4503_v26  ;;  %543 = vmatpush.bf16.msra.mxu0 %v4503_v26  ;;  %v4540_v26 = vld [vmem:[#allocation6 + $0x148] sm:$0xff] }
  0x5f   : > { %4717 = vmatpush.bf16.msra.mxu3 %v4495_v27  ;;  %630 = vmatpush.bf16.msra.mxu1 %v4495_v27  ;;  %v4511_v27 = vld [vmem:[#allocation6 + $0x80] sm:$0xff] }
  0x61   : > { %554 = vmatmul.bf16.vlgmr.msra.gmra.mxu2 %v466_v34  ;;  %544 = vmatmul.bf16.vlgmr.msra.gmra.mxu0 %v450_v39  ;;  %v987_v34 = vrot.slane %v985_v21, 2  ;;  %v4539_v39 = vld [vmem:[#allocation6 + $0x140] sm:$0xff]  ;;  %v1000_v21 = vshrl.u32 %v5314_v17, 16 }
  0x62   : > { %743 = vmatpush.bf16.msrb.mxu2 %v4518_v30  ;;  %641 = vmatmul.bf16.vlgmr.msra.gmra.mxu3 %v5238_v10  ;;  %v976_v30 = vrot.slane %v974_v18, 1 }
  0x63   : > { %907 = vmatpush.bf16.msrb.mxu3 %v4530_v31  ;;  %1079 = vmatpush.bf16.msrb.mxu0 %v4538_v35  ;;  %v4566_v31 = vld [vmem:[#allocation6 + $0x1f8] sm:$0xff]  ;;  %v1143_v35 = vpack.c.b16 %v827_v62, %v1142_v22  ;;  %v988_v45 = vor.u32 %v987_v34, %v984_v33  ;;  %v1003_v22 = vshll.u32 %v5314_v17, 16  ;;  %v4553_v33 = vld [vmem:[#allocation6 + $0x190] sm:$0xff] }
  0x64   : > { %1209 = vmatpush.bf16.msrb.mxu1 %v4546_v36  ;;  %v477_v36 = vor.u32 %v475_v23, %v473_v55  ;;  %v4573_v55 = vld [vmem:[#allocation6 + $0x230] sm:$0xff]  ;;  %v1002_v23 = vrot.slane %v1000_v21, 1  ;;  %v4570_v34 = vld [vmem:[#allocation6 + $0x218] sm:$0xff] }
  0x65   : > { %631 = vmatmul.bf16.vlgmr.msra.gmra.mxu1 %v4660_v15  ;;  %v4524_v15 = vld [vmem:[#allocation6 + $0xc8] sm:$0xff]  ;;  %v1145_v46 = vrot.slane %v1143_v35, 2  ;;  %v4561_v35 = vld [vmem:[#allocation6 + $0x1d0] sm:$0xff] }
  0x66   : > { %744 = vmatpush.bf16.msrb.mxu2 %v4517_v37  ;;  %v481_v37 = vrot.slane %v479_v24, 1  ;;  %v1005_v24 = vrot.slane %v1003_v22, 2 }
  0x67   : > { %908 = vmatpush.bf16.msrb.mxu3 %v4529_v38  ;;  %1080 = vmatpush.bf16.msrb.mxu0 %v4537_v41  ;;  %v4531_v38 = vld [vmem:[#allocation6 + $0x100] sm:$0xff]  ;;  %v4574_v41 = vld [vmem:[#allocation6 + $0x238] sm:$0xff] }
  0x68   : > { %1210 = vmatpush.bf16.msrb.mxu1 %v4545_v42  ;;  %v4557_v42 = vld [vmem:[#allocation6 + $0x1b0] sm:$0xff] }
  0x6a   : > { %745 = vmatpush.bf16.msrb.mxu2 %v4516_v43  ;;  %v4565_v43 = vld [vmem:[#allocation6 + $0x1f0] sm:$0xff] }
  0x6b   : > { %909 = vmatpush.bf16.msrb.mxu3 %v4528_v44  ;;  %1081 = vmatpush.bf16.msrb.mxu0 %v4536_v47  ;;  %v980_v44 = vor.u32 %v979_v32, %v976_v30  ;;  %v1146_v47 = vrot.slane %v5276_v8, 2  ;;  %v5325_v30 = vld [vmem:[%s5223_s20 + $0x24] sm:$0xff] }
  0x6c   : > { %1211 = vmatpush.bf16.msrb.mxu1 %v4544_v48  ;;  %v482_v48 = vsel %vm438_vm0, %v477_v36, %v481_v37  ;;  %v4552_v36 = vld [vmem:[#allocation6 + $0x188] sm:$0xff]  ;;  %v4569_v37 = vld [vmem:[#allocation6 + $0x210] sm:$0xff] }
  0x6d   : > { %v1147_v51 = vsel %vm6254_vm2, %v1145_v46, %v1146_v47 }
  0x6e   : > { %746 = vmatpush.bf16.msrb.mxu2 %v4515_v49  ;;  %v5291_v49 = vld [vmem:[%s5223_s20 + $0x14] sm:$0xff] }
  0x6f   : > { %910 = vmatpush.bf16.msrb.mxu3 %v4527_v50  ;;  %1082 = vmatpush.bf16.msrb.mxu0 %v4535_v56  ;;  %v989_v50 = vsel %vm972_vm1, %v980_v44, %v988_v45  ;;  %v4564_v56 = vld [vmem:[#allocation6 + $0x1e8] sm:$0xff]  ;;  %v991_v62 = vshrl.u32 %v5291_v49, 16  ;;  %v994_v10 = vshll.u32 %v5291_v49, 16  ;;  %v848_v44 = vrot.slane %v5314_v17, 1 }
  0x70   : > { %1212 = vmatpush.bf16.msrb.mxu1 %v4543_v57  ;;  %v684_v57 = vrot.slane %v5241_v13, 1 }
  0x71   : > { %559 = vmatmul.bf16.gmra.mxu2 %v474_v0  ;;  %549 = vmatmul.bf16.gmra.mxu0 %v458_v7  ;;  %v993_v1 = vrot.slane %v991_v62, 1  ;;  %v844_v7 = vrot.slane %v5276_v8, 1  ;;  %v4562_v8 = vld [vmem:[#allocation6 + $0x1d8] sm:$0xff] }
  0x72   : > { %747 = vmatpush.bf16.msrb.mxu2 %v4514_v58  ;;  %646 = vmatmul.bf16.gmra.mxu3 %v5241_v13  ;;  %v4692_v58 = vld [vmem:[%s5223_s20] sm:$0xf0]  ;;  %v5303_v61 = vsel %vm678_vm3, %v682_v52, %v684_v57  ;;  %v1293_v13 = vunpack.c.h.b16 %v5265_v53 }
  0x73   : > { %911 = vmatpush.bf16.msrb.mxu3 %v4526_v59  ;;  %1083 = vmatpush.bf16.msrb.mxu0 %v4534_v2  ;;  %v4693_v59 = vld [vmem:[%s5223_s20] sm:$0xe]  ;;  %v996_v2 = vrot.slane %v994_v10, 2  ;;  %v686_v10 = vrot.slane %v5258_v40, 1 }
  0x74   : > { %1213 = vmatpush.bf16.msrb.mxu1 %v4542_v3  ;;  %v4694_v0 = vor.u32 %v4693_v59, %v4692_v58  ;;  %v4567_v58 = vld [vmem:[#allocation6 + $0x200] sm:$0xff] }
  0x75   : > { %636 = vmatmul.bf16.gmra.mxu1 %v5246_v16 }
  0x76   : > { %748 = vmatpush.bf16.msrb.mxu2 %v4513_v4  ;;  %v679_v3 = vrot.slane %v4694_v0, 1  ;;  %v680_v4 = vrot.slane %v5246_v16, 1  ;;  %v4563_v16 = vld [vmem:[#allocation6 + $0x1e0] sm:$0xff] }
  0x77   : > { %912 = vmatpush.bf16.msrb.mxu3 %v4525_v5  ;;  %1084 = vmatpush.bf16.msrb.mxu0 %v4533_v11  ;;  %v843_v5 = vrot.slane %v5270_v6, 1  ;;  %v997_v11 = vor.u32 %v996_v2, %v993_v1  ;;  %v4571_v6 = vld [vmem:[#allocation6 + $0x220] sm:$0xff]  ;;  %v687_v2 = vsel %vm678_vm3, %v684_v57, %v686_v10 }
  0x78   : > { %1214 = vmatpush.bf16.msrb.mxu1 %v4541_v12  ;;  %v1148_v12 = vrot.slane %v5291_v49, 2 }
  0x79   : > { %v998_v18 = vsel %vm972_vm1, %v988_v45, %v997_v11  ;;  %v951_v45 = vld [vmem:[%s5223_s20 + $0x2c] sm:$0x3] }
  0x7a   : > { %749 = vmatpush.bf16.msrb.mxu2 %v4512_v14  ;;  %v681_v14 = vsel %vm678_vm3, %v679_v3, %v680_v4  ;;  %v1149_v19 = vsel %vm6254_vm2, %v1146_v47, %v1148_v12  ;;  %v1152_v47 = vrot.slane %v5325_v30, 2 }
  0x7b   : > { %913 = vmatpush.bf16.msrb.mxu3 %v4524_v15  ;;  %1085 = vmatpush.bf16.msrb.mxu0 %v4532_v25  ;;  %v845_v15 = vsel %vm678_vm3, %v843_v5, %v844_v7  ;;  %v846_v25 = vrot.slane %v5291_v49, 1 }
  0x7c   : > { %1215 = vmatpush.bf16.msrb.mxu1 %v4540_v26  ;;  %v1006_v26 = vor.u32 %v1005_v24, %v1002_v23 }
  0x7d   : > { %v849_v49 = vsel %vm678_vm3, %v846_v25, %v848_v44 }
  0x7e   : > { %750 = vmatpush.bf16.msrb.mxu2 %v4511_v27  ;;  %v1150_v27 = vrot.slane %v5314_v17, 2  ;;  %v688_v17 = vrot.slane %v5278_v9, 1 }
  0x7f   : > { %914 = vmatpush.bf16.msrb.mxu3 %v4523_v28  ;;  %1086 = vmatpush.bf16.msrb.mxu0 %v4531_v38  ;;  %v683_v28 = vsel %vm678_vm3, %v680_v4, %v682_v52  ;;  %v1009_v38 = vshrl.u32 %v5325_v30, 16  ;;  %v797_v4 = vld [vmem:[%s5223_s20 + $0x2c] sm:$0x1] }
  0x80   : > { %1216 = vmatpush.bf16.msrb.mxu1 %v4539_v39  ;;  %v1151_v32 = vsel %vm6254_vm2, %v1148_v12, %v1150_v27  ;;  %v1012_v39 = vshll.u32 %v5325_v30, 16 }
  0x81   : > { %564 = vmatmul.bf16.gmra.mxu2 %v482_v48  ;;  %v970_v48 = vunpack.c.l.b16 %v951_v45 }
  0x82   : > { %1373 = vmatpush.bf16.msra.mxu2 %v4558_v29  ;;  %651 = vmatmul.bf16.gmra.mxu3 %v5258_v40  ;;  %v847_v29 = vsel %vm678_vm3, %v844_v7, %v846_v25  ;;  %v836_v40 = vunpack.c.l.b16 %v797_v4 }
  0x83   : > { %1545 = vmatpush.bf16.msra.mxu3 %v4566_v31  ;;  %1675 = vmatpush.bf16.msra.mxu0 %v4574_v41  ;;  %v1007_v31 = vsel %vm972_vm1, %v997_v11, %v1006_v26  ;;  %v4560_v41 = vld [vmem:[#allocation6 + $0x1c8] sm:$0xff]  ;;  %v971_v52 = vpack.c.b16 %v970_v48, %v970_v48  ;;  %v1589_v11 = vld [vmem:[%s5223_s20 + $0x8] sm:$0x8] }
  0x84   : > { %1087 = vmatmul.bf16.vlgmr.msrb.gmra.mxu0 %v989_v50  ;;  %v1608_v12 = vunpack.c.l.b16 %v1589_v11 }
  0x85   : > { %1217 = vmatmul.bf16.vlgmr.msrb.gmra.mxu1 %v1147_v51  ;;  %v1153_v51 = vsel %vm6254_vm2, %v1150_v27, %v1152_v47  ;;  %v1018_v59 = vshrl.u32 %v971_v52, 16  ;;  %v1154_v1 = vrot.slane %v971_v52, 2 }
  0x86   : > { %1374 = vmatpush.bf16.msra.mxu2 %v4557_v42  ;;  %v1011_v42 = vrot.slane %v1009_v38, 1  ;;  %v1609_v57 = vpack.c.b16 %v1293_v13, %v1608_v12  ;;  %v4550_v12 = vld [vmem:[%s5223_s20 + $0x28] sm:$0xff] }
  0x87   : > { %1546 = vmatpush.bf16.msra.mxu3 %v4565_v43  ;;  %1676 = vmatpush.bf16.msra.mxu0 %v4573_v55  ;;  %v1014_v43 = vrot.slane %v1012_v39, 2  ;;  %v4568_v55 = vld [vmem:[#allocation6 + $0x208] sm:$0xff]  ;;  %v1155_v7 = vsel %vm6254_vm2, %v1152_v47, %v1154_v1 }
  0x89   : > { %v1015_v46 = vor.u32 %v1014_v43, %v1011_v42 }
  0x8a   : > { %1375 = vmatpush.bf16.msra.mxu2 %v4556_v54  ;;  %v4551_v54 = vld [vmem:[#allocation6 + $0x180] sm:$0xff] }
  0x8b   : > { %1547 = vmatpush.bf16.msra.mxu3 %v4564_v56  ;;  %1677 = vmatpush.bf16.msra.mxu0 %v4572_v60  ;;  %v1016_v50 = vsel %vm972_vm1, %v1006_v26, %v1015_v46  ;;  %v4559_v56 = vld [vmem:[#allocation6 + $0x1c0] sm:$0xff]  ;;  %v1021_v60 = vshll.u32 %v971_v52, 16 }
  0x8d   : > { %v1023_v62 = vrot.slane %v1021_v60, 2 }
  0x8e   : > { %1376 = vmatpush.bf16.msra.mxu2 %v4555_v63  ;;  %v850_v63 = vrot.slane %v5325_v30, 1 }
  0x8f   : > { %1548 = vmatpush.bf16.msra.mxu3 %v4563_v16  ;;  %1678 = vmatpush.bf16.msra.mxu0 %v4571_v6  ;;  %v4547_v16 = vld [vmem:[%s5223_s20 + $0x10] sm:$0xff] }
  0x90   : > { %v851_v3 = vsel %vm678_vm3, %v848_v44, %v850_v63  ;;  %v1612_v6 = vrot.slane %v4547_v16, 3  ;;  %v1448_v25 = vshrl.u32 %v4547_v16, 16  ;;  %v1451_v9 = vshll.u32 %v4547_v16, 16 }
  0x91   : > { %751 = vmatmul.bf16.vlgmr.msrb.gmra.mxu2 %v681_v14  ;;  %v842_v14 = vpack.c.b16 %v836_v40, %v836_v40 }
  0x92   : > { %915 = vmatmul.bf16.vlgmr.msrb.gmra.mxu3 %v845_v15  ;;  %1377 = vmatpush.bf16.msra.mxu2 %v4554_v20  ;;  %v1253_v15 = vld [vmem:[%s5223_s20 + $0x8] sm:$0xc]  ;;  %v1611_v20 = vrot.slane %v1609_v57, 3 }
  0x93   : > { %1549 = vmatpush.bf16.msra.mxu3 %v4562_v8  ;;  %1679 = vmatpush.bf16.msra.mxu0 %v4570_v34  ;;  %v689_v8 = vsel %vm678_vm3, %v686_v10, %v688_v17  ;;  %v4548_v34 = vld [vmem:[%s5223_s20 + $0x18] sm:$0xff] }
  0x94   : > { %1092 = vmatmul.bf16.gmra.mxu0 %v998_v18  ;;  %v852_v18 = vrot.slane %v842_v14, 1  ;;  %v1613_v23 = vsel %vm6255_vm4, %v1611_v20, %v1612_v6  ;;  %v1460_v42 = vshll.u32 %v4548_v34, 16  ;;  %v1478_v20 = vshll.u32 %v4550_v12, 16 }
  0x95   : > { %1222 = vmatmul.bf16.gmra.mxu1 %v1149_v19  ;;  %v1292_v19 = vunpack.c.l.b16 %v1253_v15 }
  0x96   : > { %1378 = vmatpush.bf16.msra.mxu2 %v4553_v33  ;;  %v853_v21 = vsel %vm678_vm3, %v850_v63, %v852_v18  ;;  %v1462_v47 = vrot.slane %v1460_v42, 3 }
  0x97   : > { %1550 = vmatpush.bf16.msra.mxu3 %v4561_v35  ;;  %1680 = vmatpush.bf16.msra.mxu0 %v4569_v37  ;;  %v1303_v22 = vpack.c.b16 %v1293_v13, %v1292_v19  ;;  %v1614_v35 = vrot.slane %v4548_v34, 3  ;;  %v1618_v13 = vrot.slane %v4550_v12, 3 }
  0x99   : > { %v1440_v53 = vshrl.u32 %v1303_v22, 16  ;;  %v1443_v24 = vshll.u32 %v1303_v22, 16  ;;  %v1309_v30 = vrot.slane %v1303_v22, 2  ;;  %v1615_v39 = vsel %vm6255_vm4, %v1612_v6, %v1614_v35  ;;  %v1417_v22 = vld [vmem:[%s5223_s20 + $0x30] sm:$0x7] }
  0x9a   : > { %1379 = vmatpush.bf16.msra.mxu2 %v4552_v36 }
  0x9b   : > { %1551 = vmatpush.bf16.msra.mxu3 %v4560_v41  ;;  %1681 = vmatpush.bf16.msra.mxu0 %v4568_v55  ;;  %v1442_v26 = vrot.slane %v1440_v53, 2  ;;  %v1445_v27 = vrot.slane %v1443_v24, 3  ;;  %v1457_v41 = vshrl.u32 %v4548_v34, 16  ;;  %v1480_v24 = vrot.slane %v1478_v20, 3 }
  0x9e   : > { %1380 = vmatpush.bf16.msra.mxu2 %v4551_v54 }
  0x9f   : > { %1552 = vmatpush.bf16.msra.mxu3 %v4559_v56  ;;  %1682 = vmatpush.bf16.msra.mxu0 %v4567_v58 }
  0xa1   : > { %756 = vmatmul.bf16.gmra.mxu2 %v683_v28  ;;  %v1450_v28 = vrot.slane %v1448_v25, 2  ;;  %v1436_v25 = vunpack.c.l.b16 %v1417_v22 }
  0xa2   : > { %920 = vmatmul.bf16.gmra.mxu3 %v847_v29  ;;  %v1453_v29 = vrot.slane %v1451_v9, 3 }
  0xa4   : > { %1097 = vmatmul.bf16.gmra.mxu0 %v1007_v31  ;;  %v1310_v31 = vrot.slane %v4547_v16, 2  ;;  %v1454_v33 = vor.u32 %v1453_v29, %v1450_v28  ;;  %v1475_v16 = vshrl.u32 %v4550_v12, 16  ;;  %v1437_v28 = vpack.c.b16 %v1436_v25, %v1436_v25 }
  0xa5   : > { %1227 = vmatmul.bf16.gmra.mxu1 %v1151_v32  ;;  %v1446_v32 = vor.u32 %v1445_v27, %v1442_v26  ;;  %v1316_v26 = vrot.slane %v4550_v12, 2 }
  0xa6   : > { %v1311_v36 = vsel %vm6254_vm2, %v1309_v30, %v1310_v31  ;;  %v1477_v53 = vrot.slane %v1475_v16, 2  ;;  %v1487_v42 = vshll.u32 %v1437_v28, 16 }
  0xa7   : > { %v1455_v37 = vsel %vm6253_vm5, %v1446_v32, %v1454_v33  ;;  %v1620_v32 = vrot.slane %v1437_v28, 3 }
  0xa8   : > { %v1481_v27 = vor.u32 %v1480_v24, %v1477_v53 }
  0xb1   : > { %761 = vmatmul.bf16.gmra.mxu2 %v5303_v61  ;;  %v1020_v61 = vrot.slane %v1018_v59, 1 }
  0xb2   : > { %925 = vmatmul.bf16.gmra.mxu3 %v849_v49  ;;  %v1312_v49 = vrot.slane %v4548_v34, 2 }
  0xb3   : > { %v1024_v0 = vor.u32 %v1023_v62, %v1020_v61 }
  0xb4   : > { %1102 = vmatmul.bf16.gmra.mxu0 %v1016_v50  ;;  %v1313_v58 = vsel %vm6254_vm2, %v1310_v31, %v1312_v49 }
  0xb5   : > { %1232 = vmatmul.bf16.gmra.mxu1 %v1153_v51  ;;  %v1025_v5 = vsel %vm972_vm1, %v1015_v46, %v1024_v0  ;;  %v1459_v46 = vrot.slane %v1457_v41, 2  ;;  %v4549_v51 = vld [vmem:[%s5223_s20 + $0x20] sm:$0xff]  ;;  %v1484_v41 = vshrl.u32 %v1437_v28, 16 }
  0xb6   : > { %v1616_v56 = vrot.slane %v4549_v51, 3  ;;  %v1466_v10 = vshrl.u32 %v4549_v51, 16  ;;  %v1469_v63 = vshll.u32 %v4549_v51, 16  ;;  %v1314_v40 = vrot.slane %v4549_v51, 2 }
  0xb7   : > { %v1463_v50 = vor.u32 %v1462_v47, %v1459_v46  ;;  %v1486_v51 = vrot.slane %v1484_v41, 2 }
  0xb8   : > { %v1617_v62 = vsel %vm6255_vm4, %v1614_v35, %v1616_v56  ;;  %v1471_v4 = vrot.slane %v1469_v63, 3  ;;  %v1315_v57 = vsel %vm6254_vm2, %v1312_v49, %v1314_v40  ;;  %v1619_v19 = vsel %vm6255_vm4, %v1616_v56, %v1618_v13  ;;  %v1263_v35 = vld [vmem:[%s5223_s20 + $0x30] sm:$0x3] }
  0xb9   : > { %v1464_v59 = vsel %vm6253_vm5, %v1454_v33, %v1463_v50  ;;  %v1317_v33 = vsel %vm6254_vm2, %v1314_v40, %v1316_v26 }
  0xc1   : > { %766 = vmatmul.bf16.gmra.mxu2 %v687_v2 }
  0xc2   : > { %930 = vmatmul.bf16.gmra.mxu3 %v851_v3  ;;  %v1468_v3 = vrot.slane %v1466_v10, 2 }
  0xc4   : > { %1107 = vmatmul.bf16.gmra.mxu0 %v1025_v5  ;;  %v1472_v11 = vor.u32 %v1471_v4, %v1468_v3 }
  0xc5   : > { %1237 = vmatmul.bf16.gmra.mxu1 %v1155_v7 }
  0xc6   : > { %v1473_v17 = vsel %vm6253_vm5, %v1463_v50, %v1472_v11  ;;  %v1482_v34 = vsel %vm6253_vm5, %v1472_v11, %v1481_v27 }
  0xd1   : > { %771 = vmatmul.bf16.gmra.mxu2 %v689_v8 }
  0xd2   : > { %935 = vmatmul.bf16.gmra.mxu3 %v853_v21 }
  0xd4   : > { %1683 = vmatmul.bf16.vlgmr.msra.gmra.mxu0 %v1613_v23 }
  0xde   : > { %v5358_v38 = vpop.f32.mrf.mxu0 }
  0xe1   : > { %1381 = vmatmul.bf16.vlgmr.msra.gmra.mxu2 %v1311_v36 }
  0xe2   : > { %1553 = vmatmul.bf16.vlgmr.msra.gmra.mxu3 %v1455_v37  ;;  %v632_v60 = vpop.f32.mrf.mxu1  ;;  %v1621_v37 = vsel %vm6255_vm4, %v1618_v13, %v1620_v32  ;;  %v4594_v13 = vld [vmem:[#allocation8 + $0x78] sm:$0xff] }
  0xe3   : > { %2454 = vmatpush.bf16.msra.mxu1 %v4594_v13 }
  0xe4   : > { %v555_v43 = vpop.f32.mrf.mxu2  ;;  %1688 = vmatmul.bf16.gmra.mxu0 %v1615_v39  ;;  %v1302_v39 = vunpack.c.l.b16 %v1263_v35 }
  0xe5   : > { %v642_v44 = vpop.f32.mrf.mxu3 }
  0xe6   : > { %v5361_v45 = vadd.f32 %v642_v44, %v555_v43  ;;  %v5363_v48 = vpop.f32.mrf.mxu0  ;;  %v633_v43 = vadd.f32 %v632_v60, %v5358_v38  ;;  %v1308_v50 = vpack.c.b16 %v1302_v39, %v1302_v39 }
  0xea   : > { %v5375_v5 = vpop.f32.mrf.mxu1 }
  0xec   : > { %v557_v52 = vpop.f32.mrf.mxu2 }
  0xed   : > { %v644_v54 = vpop.f32.mrf.mxu3 }
  0xee   : > { %v5366_v55 = vadd.f32 %v644_v54, %v557_v52  ;;  %v5370_v61 = vpop.f32.mrf.mxu0  ;;  %v1489_v52 = vrot.slane %v1487_v42, 3 }
  0xf1   : > { %1386 = vmatmul.bf16.gmra.mxu2 %v1313_v58 }
  0xf2   : > { %1558 = vmatmul.bf16.gmra.mxu3 %v1464_v59  ;;  %v637_v6 = vpop.f32.mrf.mxu1  ;;  %v1318_v59 = vrot.slane %v1308_v50, 2 }
  0xf3   : > { %v638_v3 = vadd.f32 %v637_v6, %v5370_v61  ;;  %v4593_v6 = vld [vmem:[#allocation8 + $0x70] sm:$0xff] }
  0xf4   : > { %v560_v0 = vpop.f32.mrf.mxu2  ;;  %1693 = vmatmul.bf16.gmra.mxu0 %v1617_v62  ;;  %v1490_v62 = vor.u32 %v1489_v52, %v1486_v51  ;;  %v1319_v38 = vsel %vm6254_vm2, %v1316_v26, %v1318_v59  ;;  %2455 = vmatpush.bf16.msra.mxu1 %v4593_v6  ;;  %v635_v52 = vadd.f32 %v5375_v5, %v5363_v48 }
  0xf5   : > { %v647_v1 = vpop.f32.mrf.mxu3 }
  0xf6   : > { %v5373_v2 = vadd.f32 %v647_v1, %v560_v0  ;;  %v5377_v7 = vpop.f32.mrf.mxu0  ;;  %v1491_v60 = vsel %vm6253_vm5, %v1481_v27, %v1490_v62 }
  0xfa   : > { %v5396_v31 = vpop.f32.mrf.mxu1 }
  0xfc   : > { %v5380_v14 = vpop.f32.mrf.mxu2 }
  0xfd   : > { %v5382_v15 = vpop.f32.mrf.mxu3 }
 0x101   : > { %1391 = vmatmul.bf16.gmra.mxu2 %v1315_v57  ;;  %v1088_v18 = vpop.f32.mrf.mxu0 }
 0x102   : > { %1563 = vmatmul.bf16.gmra.mxu3 %v1473_v17  ;;  %v5403_v49 = vpop.f32.mrf.mxu1 }
 0x104   : > { %v565_v8 = vpop.f32.mrf.mxu2  ;;  %1698 = vmatmul.bf16.gmra.mxu0 %v1619_v19 }
 0x105   : > { %v652_v21 = vpop.f32.mrf.mxu3 }
 0x106   : > { %v5388_v23 = vadd.f32 %v652_v21, %v565_v8  ;;  %v1743_v8 = vlaneseq }
 0x108   : > { %v5430_v21 = vshrl.u32 %v1743_v8, 7 }
 0x109   : > { %v5390_v9 = vpop.f32.mrf.mxu0 }
 0x10a   : > { %v5413_v0 = vpop.f32.mrf.mxu1  ;;  %v1757_v25 = vand.u32 65535, %v5430_v21  ;;  %v1758_v27 = vshrl.u32 %v5430_v21, 16 }
 0x10c   : > { %v5392_v29 = vpop.f32.mrf.mxu2  ;;  %v1761_v28 = vmul.u32 52428, %v1757_v25  ;;  %v1762_v35 = vmul.u32 52429, %v1758_v27 }
 0x10d   : > { %v5394_v30 = vpop.f32.mrf.mxu3 }
 0x10e   : > { %v1766_v39 = vshll.u32 %v1762_v35, 16  ;;  %v1765_v59 = vshrl.u32 %v1761_v28, 16  ;;  %v1767_v13 = vshrl.u32 %v1762_v35, 16 }
 0x111   : > { %1396 = vmatmul.bf16.gmra.mxu2 %v1317_v33  ;;  %v1093_v36 = vpop.f32.mrf.mxu0 }
 0x112   : > { %1568 = vmatmul.bf16.gmra.mxu3 %v1482_v34  ;;  %v5418_v17 = vpop.f32.mrf.mxu1  ;;  %v1760_v34 = vmul.u32 52429, %v1757_v25 }
 0x114   : > { %v752_v44 = vpop.f32.mrf.mxu2  ;;  %1703 = vmatmul.bf16.gmra.mxu0 %v1621_v37  ;;  %v1763_v37 = vmul.u32 52428, %v1758_v27 }
 0x115   : > { %v916_v46 = vpop.f32.mrf.mxu3  ;;  %v777_v47 = vadd.f32 %v752_v44, %v633_v43  ;;  %v5444_v43 = vadd.s32 8, %v5430_v21 }
 0x117   : > { %v941_v54 = vadd.f32 %v916_v46, %v777_v47  ;;  %v5053_v46 = vmov 0   ;;  %v1786_v51 = vand.u32 65535, %v5444_v43 }
 0x118   : > { %2134 = vst [vmem:[#allocation2] sm:$0xf] %v5053_v46 }
 0x119   : > { %v5405_v56 = vadd.f32 %v1088_v18, %v941_v54  ;;  %v5407_v58 = vpop.f32.mrf.mxu0  ;;  %2284 = vst [vmem:[#allocation2 + $0x30] sm:$0xf] %v5053_v46  ;;  %v4592_v54 = vld [vmem:[#allocation8 + $0x68] sm:$0xff] }
 0x11a   : > { %v5428_v61 = vpop.f32.mrf.mxu1  ;;  %2456 = vmatpush.bf16.msra.mxu1 %v4592_v54 }
 0x11c   : > { %v754_v10 = vpop.f32.mrf.mxu2 }
 0x11d   : > { %v5409_v63 = vpop.f32.mrf.mxu3 }
 0x121   : > { %1401 = vmatmul.bf16.gmra.mxu2 %v1319_v38  ;;  %v1098_v1 = vpop.f32.mrf.mxu0  ;;  %v1787_v38 = vshrl.u32 %v5444_v43, 16 }
 0x122   : > { %1573 = vmatmul.bf16.gmra.mxu3 %v1491_v60  ;;  %v5446_v44 = vpop.f32.mrf.mxu1  ;;  %v4586_v60 = vld [vmem:[#allocation8 + $0x38] sm:$0xff] }
 0x123   : > { %2541 = vmatpush.bf16.msrb.mxu2 %v4586_v60  ;;  %v1792_v48 = vmul.u32 52428, %v1787_v38 }
 0x124   : > { %v757_v4 = vpop.f32.mrf.mxu2 }
 0x125   : > { %v921_v40 = vpop.f32.mrf.mxu3  ;;  %v779_v11 = vadd.f32 %v757_v4, %v638_v3  ;;  %v1790_v3 = vmul.u32 52428, %v1786_v51  ;;  %v778_v4 = vadd.f32 %v754_v10, %v635_v52  ;;  %v4585_v10 = vld [vmem:[#allocation8 + $0x30] sm:$0xff] }
 0x127   : > { %v943_v12 = vadd.f32 %v921_v40, %v779_v11  ;;  %v1789_v11 = vmul.u32 52429, %v1786_v51  ;;  %v1793_v6 = vshll.u32 %v1790_v3, 16  ;;  %v942_v27 = vadd.f32 %v5409_v63, %v778_v4  ;;  %2542 = vmatpush.bf16.msrb.mxu2 %v4585_v10 }
 0x129   : > { %v5416_v57 = vadd.f32 %v1093_v36, %v943_v12  ;;  %v5420_v18 = vpop.f32.mrf.mxu0  ;;  %v1764_v36 = vshll.u32 %v1761_v28, 16  ;;  %v1791_v12 = vmul.u32 52429, %v1787_v38  ;;  %vm1797_vm8 = vc.u32 %v1789_v11, %v1793_v6 }
 0x12b   : > { %vm1768_vm6 = vc.u32 %v1760_v34, %v1764_v36  ;;  %v1770_v42 = vadd.s32 %v1764_v36, %v1760_v34  ;;  %v1795_v5 = vshll.u32 %v1791_v12, 16  ;;  %v1798_v34 = vsel %vm1797_vm8, 1, %v5053_v46 }
 0x12c   : > { %v5422_v19 = vpop.f32.mrf.mxu2  ;;  %v1769_v47 = vsel %vm1768_vm6, 1, %v5053_v46  ;;  %v1796_v54 = vshrl.u32 %v1791_v12, 16 }
 0x12d   : > { %v5424_v16 = vpop.f32.mrf.mxu3  ;;  %v1771_v50 = vadd.s32 %v1769_v47, %v1763_v37  ;;  %vm1772_vm7 = vc.u32 %v1770_v42, %v1766_v39  ;;  %v1800_v39 = vadd.s32 %v1798_v34, %v1792_v48  ;;  %v1794_v42 = vshrl.u32 %v1790_v3, 16 }
 0x12e   : > { %v1773_v62 = vsel %vm1772_vm7, 1, %v5053_v46  ;;  %v1114_v3 = vadd.f32 %v5390_v9, %v942_v27  ;;  %v5512_v34 = vadd.f32 %v5418_v17, %v5416_v57 }
 0x131   : > { %v5426_v20 = vpop.f32.mrf.mxu0 }
 0x134   : > { %v762_v22 = vpop.f32.mrf.mxu2 }
 0x135   : > { %v926_v53 = vpop.f32.mrf.mxu3  ;;  %v781_v24 = vadd.f32 %v762_v22, %v5361_v45  ;;  %v5459_v22 = vadd.s32 16, %v5430_v21 }
 0x137   : > { %v945_v26 = vadd.f32 %v926_v53, %v781_v24  ;;  %v640_v53 = vadd.f32 %v5396_v31, %v5377_v7  ;;  %v1815_v35 = vand.u32 65535, %v5459_v22  ;;  %v5468_v7 = vpop.f32.mrf.mxu1  ;;  %v1816_v63 = vshrl.u32 %v5459_v22, 16 }
 0x139   : > { %v5435_v32 = vadd.f32 %v1098_v1, %v945_v26  ;;  %v5437_v33 = vpop.f32.mrf.mxu0  ;;  %v1775_v1 = vadd.s32 %v1773_v62, %v1771_v50  ;;  %v1799_v26 = vadd.s32 %v1793_v6, %v1789_v11  ;;  %v780_v36 = vadd.f32 %v5422_v19, %v640_v53  ;;  %v4584_v50 = vld [vmem:[#allocation8 + $0x28] sm:$0xff] }
 0x13a   : > { %v1819_v51 = vmul.u32 52428, %v1815_v35  ;;  %v1818_v19 = vmul.u32 52429, %v1815_v35  ;;  %2543 = vmatpush.bf16.msrb.mxu2 %v4584_v50  ;;  %v1821_v6 = vmul.u32 52428, %v1816_v63 }
 0x13b   : > { %v1776_v8 = vadd.s32 %v1775_v1, %v1765_v59  ;;  %vm1801_vm9 = vc.u32 %v1799_v26, %v1795_v5  ;;  %v5475_v59 = vmul.u32 52429, %v1816_v63  ;;  %v650_v1 = vadd.f32 %v5382_v15, %v5380_v14  ;;  %v4582_v26 = vld [vmem:[#allocation8 + $0x18] sm:$0xff] }
 0x13c   : > { %v5439_v41 = vpop.f32.mrf.mxu2  ;;  %v1802_v47 = vsel %vm1801_vm9, 1, %v5053_v46  ;;  %v1822_v60 = vshll.u32 %v1819_v51, 16  ;;  %v944_v4 = vadd.f32 %v5424_v16, %v780_v36  ;;  %v5487_v5 = vadd.s32 24, %v5430_v21  ;;  %v2138_v16 = vld [vmem:[#allocation2 + $0x4] sm:$0x3] }
 0x13d   : > { %v5441_v45 = vpop.f32.mrf.mxu3  ;;  %v1777_v37 = vadd.s32 %v1776_v8, %v1767_v13  ;;  %v4583_v8 = vld [vmem:[#allocation8 + $0x20] sm:$0xff]  ;;  %v1824_v48 = vshll.u32 %v5475_v59, 16  ;;  %v5491_v15 = vadd.f32 %v5394_v30, %v5392_v29  ;;  %v2139_v30 = vsel %vm5494_vm13, 0, %v2138_v16 }
 0x13e   : > { %vm1826_vm12 = vc.u32 %v1818_v19, %v1822_v60  ;;  %2544 = vmatpush.bf16.msrb.mxu2 %v4583_v8  ;;  %v1828_v53 = vadd.s32 %v1822_v60, %v1818_v19  ;;  %v1116_v29 = vadd.f32 %v5407_v58, %v944_v4  ;;  %2140 = vst [vmem:[#allocation2 + $0x4] sm:$0x3] %v2139_v30  ;;  %v1823_v27 = vshrl.u32 %v1819_v51, 16  ;;  %v4602_v51 = vld [vmem:[#allocation8 + $0xb8] sm:$0xff] }
 0x13f   : > { %v1778_v62 = vshrl.u32 %v1777_v37, 3  ;;  %v1844_v58 = vand.u32 65535, %v5487_v5  ;;  %v1845_v37 = vshrl.u32 %v5487_v5, 16  ;;  %v5528_v57 = vadd.f32 %v5446_v44, %v5435_v32  ;;  %2660 = vmatpush.bf16.msrb.mxu3 %v4602_v51 }
 0x140   : > { %vm1830_vm14 = vc.u32 %v1828_v53, %v1824_v48  ;;  %v5534_v19 = vadd.s32 32, %v5430_v21 }
 0x141   : > { %v5456_v40 = vpop.f32.mrf.mxu0  ;;  %v1779_v9 = vmul.u32 10, %v1778_v62  ;;  %v5539_v44 = vmul.u32 52429, %v1845_v37 }
 0x142   : > { %2545 = vmatpush.bf16.msrb.mxu2 %v4582_v26  ;;  %v1874_v16 = vshrl.u32 %v5534_v19, 16 }
 0x143   : > { %v5519_v35 = vsub.s32 %v5430_v21, %v1779_v9 }
 0x144   : > { %v767_v24 = vpop.f32.mrf.mxu2 }
 0x145   : > { %v931_v25 = vpop.f32.mrf.mxu3  ;;  %v783_v28 = vadd.f32 %v767_v24, %v5373_v2  ;;  %v1804_v2 = vadd.s32 %v1802_v47, %v1800_v39  ;;  %v5501_v24 = vadd.f32 %v5403_v49, %v5405_v56  ;;  %v5514_v49 = vpop.f32.mrf.mxu1  ;;  %v5524_v39 = vadd.f32 %v5428_v61, %v1116_v29 }
 0x146   : > { %vm2044_vm15 = vcmp.ne.s32.totalorder %v5519_v35, 0  ;;  %vm2054_vm6 = vcmp.lt.s32.totalorder %v5519_v35, 0 }
 0x147   : > { %v947_v31 = vadd.f32 %v931_v25, %v783_v28  ;;  %v1805_v38 = vadd.s32 %v1804_v2, %v1794_v42  ;;  %v5504_v25 = vadd.f32 %v5413_v0, %v1114_v3  ;;  %v1831_v0 = vsel %vm1830_vm14, 1, %v5053_v46  ;;  %v4581_v2 = vld [vmem:[#allocation8 + $0x10] sm:$0xff]  ;;  %vm5564_vm9 = vmand %vm2054_vm6, %vm2044_vm15 }
 0x148   : > { %2546 = vmatpush.bf16.msrb.mxu2 %v4581_v2  ;;  %v5545_v3 = vadd.s32 10, %v5519_v35 }
 0x149   : > { %v5473_v52 = vadd.f32 %v5426_v20, %v947_v31  ;;  %v5481_v11 = vpop.f32.mrf.mxu0  ;;  %v782_v20 = vadd.f32 %v5439_v41, %v5366_v55  ;;  %v1806_v14 = vadd.s32 %v1805_v38, %v1796_v54  ;;  %v1827_v41 = vsel %vm1826_vm12, 1, %v5053_v46 }
 0x14a   : > { %v1829_v28 = vadd.s32 %v1827_v41, %v1821_v6  ;;  %v5530_v31 = vmul.u32 52428, %v1844_v58  ;;  %v1847_v54 = vmul.u32 52429, %v1844_v58  ;;  %v1850_v38 = vmul.u32 52428, %v1845_v37  ;;  %v4600_v37 = vld [vmem:[#allocation8 + $0xa8] sm:$0xff] }
 0x14b   : > { %v946_v10 = vadd.f32 %v5441_v45, %v782_v20  ;;  %v1807_v56 = vshrl.u32 %v1806_v14, 3  ;;  %v1825_v45 = vshrl.u32 %v5475_v59, 16  ;;  %v4580_v20 = vld [vmem:[#allocation8 + $0x8] sm:$0xff]  ;;  %v1873_v6 = vand.u32 65535, %v5534_v19  ;;  %v4591_v14 = vld [vmem:[#allocation8 + $0x60] sm:$0xff] }
 0x14c   : > { %v769_v12 = vpop.f32.mrf.mxu2  ;;  %v1833_v36 = vadd.s32 %v1831_v0, %v1829_v28  ;;  %v1851_v62 = vshll.u32 %v5530_v31, 16  ;;  %2547 = vmatpush.bf16.msrb.mxu2 %v4580_v20  ;;  %v1852_v53 = vshrl.u32 %v5530_v31, 16  ;;  %2457 = vmatpush.bf16.msra.mxu1 %v4591_v14  ;;  %v1854_v58 = vshrl.u32 %v5539_v44, 16 }
 0x14d   : > { %v933_v13 = vpop.f32.mrf.mxu3  ;;  %v784_v17 = vadd.f32 %v769_v12, %v650_v1  ;;  %v1118_v42 = vadd.f32 %v5420_v18, %v946_v10  ;;  %v1808_v32 = vmul.u32 10, %v1807_v56  ;;  %v4601_v12 = vld [vmem:[#allocation8 + $0xb0] sm:$0xff]  ;;  %v5558_v30 = vpop.f32.mrf.mxu1  ;;  %v1876_v10 = vmul.u32 52429, %v1873_v6 }
 0x14e   : > { %v1834_v50 = vadd.s32 %v1833_v36, %v1823_v27  ;;  %vm1855_vm7 = vc.u32 %v1847_v54, %v1851_v62  ;;  %v1857_v8 = vadd.s32 %v1851_v62, %v1847_v54  ;;  %2661 = vmatpush.bf16.msrb.mxu3 %v4601_v12  ;;  %v5569_v26 = vmul.u32 52428, %v1873_v6  ;;  %v4579_v36 = vld [vmem:[#allocation8] sm:$0xff] }
 0x14f   : > { %v948_v60 = vadd.f32 %v933_v13, %v784_v17  ;;  %v5553_v9 = vsub.s32 %v5444_v43, %v1808_v32  ;;  %v1856_v13 = vsel %vm1855_vm7, 1, %v5053_v46  ;;  %v5571_v27 = vmul.u32 52429, %v1874_v16  ;;  %v4614_v17 = vld [vmem:[#allocation8 + $0xf8] sm:$0xff] }
 0x150   : > { %v1835_v18 = vadd.s32 %v1834_v50, %v1825_v45  ;;  %v1858_v29 = vadd.s32 %v1856_v13, %v1850_v38  ;;  %v5574_v28 = vadd.f32 %v5468_v7, %v1118_v42  ;;  %v5580_v31 = vadd.s32 40, %v5430_v21  ;;  %2548 = vmatpush.bf16.msrb.mxu2 %v4579_v36  ;;  %2824 = vmatpush.bf16.msrb.mxu0 %v4614_v17 }
 0x151   : > { %v5537_v59 = vpop.f32.mrf.mxu0  ;;  %v1879_v7 = vmul.u32 52428, %v1874_v16  ;;  %v1880_v42 = vshll.u32 %v5569_v26, 16  ;;  %v1120_v50 = vadd.f32 %v5437_v33, %v948_v60  ;;  %v2084_v2 = vsel %vm5564_vm9, %v5545_v3, %v5519_v35  ;;  %v4613_v35 = vld [vmem:[#allocation8 + $0xf0] sm:$0xff] }
 0x152   : > { %v1836_v4 = vshrl.u32 %v1835_v18, 3  ;;  %2662 = vmatpush.bf16.msrb.mxu3 %v4600_v37  ;;  %v1882_v54 = vshll.u32 %v5571_v27, 16  ;;  %vm2045_vm10 = vcmp.ne.s32.totalorder %v5553_v9, 0  ;;  %vm2055_vm12 = vcmp.lt.s32.totalorder %v5553_v9, 0  ;;  %v4590_v18 = vld [vmem:[#allocation8 + $0x58] sm:$0xff] }
 0x153   : > { %vm1884_vm14 = vc.u32 %v1876_v10, %v1880_v42  ;;  %v5601_v33 = vadd.s32 10, %v5553_v9  ;;  %v1903_v3 = vshrl.u32 %v5580_v31, 16  ;;  %2458 = vmatpush.bf16.msra.mxu1 %v4590_v18  ;;  %vm5624_vm9 = vcmp.lt.s32.totalorder %v2084_v2, 8 }
 0x154   : > { %v772_v47 = vpop.f32.mrf.mxu2  ;;  %v1837_v41 = vmul.u32 10, %v1836_v4  ;;  %v1885_v32 = vsel %vm1884_vm14, 1, %v5053_v46  ;;  %2825 = vmatpush.bf16.msrb.mxu0 %v4613_v35  ;;  %v1883_v13 = vshrl.u32 %v5571_v27, 16  ;;  %v5632_v43 = vadd.s32 48, %v5430_v21 }
 0x155   : > { %v936_v63 = vpop.f32.mrf.mxu3  ;;  %v785_v61 = vadd.f32 %v772_v47, %v5388_v23  ;;  %v1853_v23 = vshll.u32 %v5539_v44, 16  ;;  %v5584_v47 = vadd.f32 %v5514_v49, %v5473_v52  ;;  %v1902_v44 = vand.u32 65535, %v5580_v31 }
 0x156   : > { %v1887_v38 = vadd.s32 %v1885_v32, %v1879_v7  ;;  %v1908_v36 = vmul.u32 52428, %v1903_v3  ;;  %v5656_v7 = vld [vmem:[%s6245_s2] ss:$0 sm:$0xff]  ;;  %vm2263_vm14 = vcmask 1043457  }
 0x157   : > { %v949_v1 = vadd.f32 %v936_v63, %v785_v61  ;;  %vm1859_vm8 = vc.u32 %v1857_v8, %v1853_v23  ;;  %v5587_v63 = vsub.s32 %v5459_v22, %v1837_v41  ;;  %v1886_v22 = vadd.s32 %v1880_v42, %v1876_v10  ;;  %v4599_v61 = vld [vmem:[#allocation8 + $0xa0] sm:$0xff]  ;;  %v4598_v41 = vld [vmem:[#allocation8 + $0x98] sm:$0xff]  ;;  %v1238_v10 = vpop.f32.mrf.mxu1 }
 0x158   : > { %2663 = vmatpush.bf16.msrb.mxu3 %v4599_v61  ;;  %v1905_v20 = vmul.u32 52429, %v1902_v44  ;;  %v5622_v12 = vmul.u32 52428, %v1902_v44 }
 0x159   : > { %v5550_v48 = vadd.f32 %v5456_v40, %v949_v1  ;;  %v1860_v40 = vsel %vm1859_vm8, 1, %v5053_v46  ;;  %v5596_v52 = vpop.f32.mrf.mxu0  ;;  %vm2046_vm15 = vcmp.ne.s32.totalorder %v5587_v63, 0  ;;  %vm2056_vm6 = vcmp.lt.s32.totalorder %v5587_v63, 0  ;;  %vm5614_vm8 = vmand %vm2055_vm12, %vm2045_vm10 }
 0x15a   : > { %v1862_v45 = vadd.s32 %v1860_v40, %v1858_v29  ;;  %v1881_v1 = vshrl.u32 %v5569_v26, 16  ;;  %vm1888_vm7 = vc.u32 %v1886_v22, %v1882_v54  ;;  %v5629_v29 = vmul.u32 52429, %v1903_v3  ;;  %vm5642_vm10 = vmand %vm2056_vm6, %vm2046_vm15 }
 0x15b   : > { %v1889_v4 = vsel %vm1888_vm7, 1, %v5053_v46  ;;  %v5635_v40 = vadd.f32 %v5558_v30, %v1120_v50  ;;  %v2085_v30 = vsel %vm5614_vm8, %v5601_v33, %v5553_v9  ;;  %v5659_v50 = vadd.f32 %v1238_v10, %v5550_v48 }
 0x15c   : > { %v774_v56 = vpop.f32.mrf.mxu2  ;;  %v1863_v51 = vadd.s32 %v1862_v45, %v1852_v53  ;;  %v1891_v16 = vadd.s32 %v1889_v4, %v1887_v38  ;;  %v4612_v53 = vld [vmem:[#allocation8 + $0xe8] sm:$0xff]  ;;  %2664 = vmatpush.bf16.msrb.mxu3 %v4598_v41  ;;  %v1931_v54 = vand.u32 65535, %v5632_v43  ;;  %vm2264_vm15 = vsmask.f32 7942 }
 0x15d   : > { %v5576_v0 = vpop.f32.mrf.mxu3  ;;  %v786_v62 = vadd.f32 %v774_v56, %v5491_v15  ;;  %v5619_v15 = vadd.s32 10, %v5587_v63  ;;  %2826 = vmatpush.bf16.msrb.mxu0 %v4612_v53  ;;  %v1910_v32 = vshrl.u32 %v5622_v12, 16  ;;  %v1932_v38 = vshrl.u32 %v5632_v43, 16  ;;  %vm5716_vm4 = vmand %vm2263_vm14, %vm2264_vm15 }
 0x15e   : > { %v1864_v49 = vadd.s32 %v1863_v51, %v1854_v58  ;;  %v1909_v58 = vshll.u32 %v5622_v12, 16  ;;  %v1892_v45 = vadd.s32 %v1891_v16, %v1881_v1  ;;  %v4597_v51 = vld [vmem:[#allocation8 + $0x90] sm:$0xff]  ;;  %vm5681_vm7 = vcmp.lt.s32.totalorder %v2085_v30, 8  ;;  %v4610_v12 = vld [vmem:[#allocation8 + $0xd8] sm:$0xff] }
 0x15f   : > { %v950_v37 = vadd.f32 %v5576_v0, %v786_v62  ;;  %v2086_v9 = vsel %vm5642_vm10, %v5619_v15, %v5587_v63  ;;  %v4611_v0 = vld [vmem:[#allocation8 + $0xe0] sm:$0xff]  ;;  %v1934_v16 = vmul.u32 52429, %v1931_v54  ;;  %v5691_v41 = vmul.u32 52429, %v1932_v38 }
 0x160   : > { %v1865_v60 = vshrl.u32 %v1864_v49, 3  ;;  %vm1913_vm12 = vc.u32 %v1905_v20, %v1909_v58  ;;  %v1915_v42 = vadd.s32 %v1909_v58, %v1905_v20  ;;  %v1893_v2 = vadd.s32 %v1892_v45, %v1883_v13  ;;  %v4589_v49 = vld [vmem:[#allocation8 + $0x50] sm:$0xff]  ;;  %2665 = vmatpush.bf16.msrb.mxu3 %v4597_v51  ;;  %v4596_v20 = vld [vmem:[#allocation8 + $0x88] sm:$0xff]  ;;  %v4595_v45 = vld [vmem:[#allocation8 + $0x80] sm:$0xff] }
 0x161   : > { %v5667_v33 = vpop.f32.mrf.mxu0  ;;  %v1914_v61 = vsel %vm1913_vm12, 1, %v5053_v46  ;;  %2459 = vmatpush.bf16.msra.mxu1 %v4589_v49  ;;  %2827 = vmatpush.bf16.msrb.mxu0 %v4611_v0  ;;  %v4587_v0 = vld [vmem:[#allocation8 + $0x40] sm:$0xff]  ;;  %v1941_v3 = vshrl.u32 %v5691_v41, 16 }
 0x162   : > { %v1866_v56 = vmul.u32 10, %v1865_v60  ;;  %v1894_v35 = vshrl.u32 %v1893_v2, 3  ;;  %v1916_v44 = vadd.s32 %v1914_v61, %v1908_v36  ;;  %v1937_v36 = vmul.u32 52428, %v1932_v38 }
 0x164   : > { %v1382_v8 = vpop.f32.mrf.mxu2  ;;  %v5670_v48 = vsub.s32 %v5487_v5, %v1866_v56  ;;  %v1912_v5 = vshrl.u32 %v5629_v29, 16  ;;  %v1895_v23 = vmul.u32 10, %v1894_v35  ;;  %2666 = vmatpush.bf16.msrb.mxu3 %v4596_v20 }
 0x165   : > { %v1554_v6 = vpop.f32.mrf.mxu3  ;;  %v1407_v26 = vadd.f32 %v1382_v8, %v5501_v24  ;;  %v1911_v24 = vshll.u32 %v5629_v29, 16  ;;  %v5688_v8 = vadd.s32 56, %v5430_v21  ;;  %v4588_v29 = vld [vmem:[#allocation8 + $0x48] sm:$0xff]  ;;  %2828 = vmatpush.bf16.msrb.mxu0 %v4610_v12 }
 0x166   : > { %vm2047_vm8 = vcmp.ne.s32.totalorder %v5670_v48, 0  ;;  %v5695_v53 = vsub.s32 %v5534_v19, %v1895_v23  ;;  %vm2057_vm12 = vcmp.lt.s32.totalorder %v5670_v48, 0  ;;  %2460 = vmatpush.bf16.msra.mxu1 %v4588_v29  ;;  %v4609_v19 = vld [vmem:[#allocation8 + $0xd0] sm:$0xff] }
 0x167   : > { %v1579_v17 = vadd.f32 %v1554_v6, %v1407_v26  ;;  %vm1917_vm6 = vc.u32 %v1915_v42, %v1911_v24  ;;  %v1940_v42 = vshll.u32 %v5691_v41, 16  ;;  %vm5728_vm14 = vmand %vm2057_vm12, %vm2047_vm8 }
 0x168   : > { %v1918_v62 = vsel %vm1917_vm6, 1, %v5053_v46  ;;  %vm2151_vm6 = vsmask.f32 5392  ;;  %vm2048_vm5 = vcmp.ne.s32.totalorder %v5695_v53, 0  ;;  %2667 = vmatpush.bf16.msrb.mxu3 %v4595_v45  ;;  %vm2058_vm2 = vcmp.lt.s32.totalorder %v5695_v53, 0 }
 0x169   : > { %v1709_v22 = vadd.f32 %v5537_v59, %v1579_v17  ;;  %v5676_v59 = vadd.f32 %v5481_v11, %v950_v37  ;;  %v1920_v4 = vadd.s32 %v1918_v62, %v1916_v44  ;;  %v5685_v11 = vmul.u32 52428, %v1931_v54  ;;  %v5711_v49 = vpop.f32.mrf.mxu0  ;;  %2829 = vmatpush.bf16.msrb.mxu0 %v4609_v19  ;;  %v4607_v19 = vld [vmem:[#allocation8 + $0xc0] sm:$0xff]  ;;  %vm5782_vm8 = vmor %vm2136_vm11, %vm2151_vm6 }
 0x16a   : > { %v1960_v37 = vand.u32 65535, %v5688_v8  ;;  %2461 = vmatpush.bf16.msra.mxu1 %v4587_v0 }
 0x16b   : > { %v1723_v18 = vadd.f32 %v5656_v7, %v1709_v22  ;;  %v1921_v10 = vadd.s32 %v1920_v4, %v1910_v32  ;;  %v1938_v26 = vshll.u32 %v5685_v11, 16  ;;  %v1939_v24 = vshrl.u32 %v5685_v11, 16 }
 0x16c   : > { %v1384_v60 = vpop.f32.mrf.mxu2  ;;  %v1963_v15 = vmul.u32 52429, %v1960_v37 }
 0x16d   : > { %v1556_v1 = vpop.f32.mrf.mxu3  ;;  %v1733_v6 = vmax.f32 %v1723_v18, 0.0  ;;  %v1408_v13 = vadd.f32 %v1384_v60, %v5504_v25  ;;  %v5702_v25 = vadd.s32 10, %v5670_v48  ;;  %v1922_v14 = vadd.s32 %v1921_v10, %v1912_v5  ;;  %v4608_v60 = vld [vmem:[#allocation8 + $0xc8] sm:$0xff] }
 0x16e   : > { %v1944_v61 = vadd.s32 %v1938_v26, %v1934_v16  ;;  %v5721_v5 = vadd.s32 10, %v5695_v53  ;;  %2830 = vmatpush.bf16.msrb.mxu0 %v4608_v60 }
 0x16f   : > { %v2124_v56 = vsel %vm5624_vm9, %v1733_v6, 0.0  ;;  %v1580_v58 = vadd.f32 %v1556_v1, %v1408_v13  ;;  %vm1942_vm9 = vc.u32 %v1934_v16, %v1938_v26  ;;  %v2266_v1 = vld [vmem:[#allocation2 + $0x4] sm:$0xe]  ;;  %v1961_v13 = vshrl.u32 %v5688_v8, 16 }
 0x170   : > { %v2141_v30 = vpack.c.bf16 %v2124_v56, %v2124_v56  ;;  %v1943_v54 = vsel %vm1942_vm9, 1, %v5053_v46  ;;  %vm1946_vm15 = vc.u32 %v1944_v61, %v1940_v42  ;;  %vm5736_vm9 = vmand %vm2058_vm2, %vm2048_vm5  ;;  %v5742_v16 = vmul.u32 52428, %v1960_v37 }
 0x171   : > { %v1710_v17 = vadd.f32 %v5596_v52, %v1580_v58  ;;  %v1923_v52 = vshrl.u32 %v1922_v14, 3  ;;  %v1945_v38 = vadd.s32 %v1943_v54, %v1937_v36  ;;  %vm5756_vm2 = vcmp.lt.s32.totalorder %v2086_v9, 8 }
 0x172   : > { %v2154_v2 = vshrl.u32 %v2141_v30, 16  ;;  %v2157_v51 = vshll.u32 %v2141_v30, 16  ;;  %v2087_v36 = vsel %vm5728_vm14, %v5702_v25, %v5670_v48  ;;  %v2088_v63 = vsel %vm5736_vm9, %v5721_v5, %v5695_v53  ;;  %2831 = vmatpush.bf16.msrb.mxu0 %v4607_v19 }
 0x173   : > { %v1724_v22 = vadd.f32 %v5656_v7, %v1710_v17  ;;  %v1924_v12 = vmul.u32 10, %v1923_v52  ;;  %v5770_v14 = vmul.u32 52429, %v1961_v13  ;;  %v1966_v61 = vmul.u32 52428, %v1961_v13 }
 0x174   : > { %v2156_v35 = vrot.slane %v2154_v2, 6  ;;  %v2159_v32 = vrot.slane %v2157_v51, 7  ;;  %v1387_v62 = vpop.f32.mrf.mxu2  ;;  %vm5818_vm14 = vcmp.lt.s32.totalorder %v2088_v63, 8 }
 0x175   : > { %v1559_v18 = vpop.f32.mrf.mxu3  ;;  %v1734_v23 = vmax.f32 %v1724_v22, 0.0  ;;  %v1409_v4 = vadd.f32 %v1387_v62, %v5512_v34  ;;  %v1947_v34 = vsel %vm1946_vm15, 1, %v5053_v46  ;;  %v5747_v26 = vsub.s32 %v5580_v31, %v1924_v12  ;;  %v1694_v22 = vpop.f32.mrf.mxu0  ;;  %v4696_v12 = vld [vmem:[#allocation2] sm:$0xe] }
 0x176   : > { %v2160_v11 = vor.u32 %v2159_v32, %v2156_v35  ;;  %v1949_v56 = vadd.s32 %v1947_v34, %v1945_v38  ;;  %v1969_v38 = vshll.u32 %v5770_v14, 16 }
 0x177   : > { %v2125_v29 = vsel %vm5681_vm7, %v1734_v23, 0.0  ;;  %v1581_v10 = vadd.f32 %v1559_v18, %v1409_v4  ;;  %vm2049_vm5 = vcmp.ne.s32.totalorder %v5747_v26, 0  ;;  %vm2059_vm10 = vcmp.lt.s32.totalorder %v5747_v26, 0 }
 0x178   : > { %v2267_v58 = vsel %vm5716_vm4, %v2160_v11, %v2266_v1  ;;  %v2142_v30 = vpack.c.bf16 %v2125_v29, %v2125_v29  ;;  %v1950_v17 = vadd.s32 %v1949_v56, %v1939_v24  ;;  %v2161_v48 = vrot.slane %v2160_v11, 4  ;;  %vm5794_vm12 = vmand %vm2059_vm10, %vm2049_vm5 }
 0x179   : > { %2268 = vst [vmem:[#allocation2 + $0x4] sm:$0xe] %v2267_v58  ;;  %v1711_v31 = vadd.f32 %v5667_v33, %v1581_v10  ;;  %v1967_v33 = vshll.u32 %v5742_v16, 16  ;;  %vm5776_vm7 = vcmp.lt.s32.totalorder %v2087_v36, 8  ;;  %v5788_v52 = vadd.s32 10, %v5747_v26 }
 0x17a   : > { %v2163_v27 = vshrl.u32 %v2142_v30, 16  ;;  %v2166_v9 = vshll.u32 %v2142_v30, 16  ;;  %v1951_v24 = vadd.s32 %v1950_v17, %v1941_v3  ;;  %v1968_v18 = vshrl.u32 %v5742_v16, 16 }
 0x17b   : > { %v1725_v41 = vadd.f32 %v5656_v7, %v1711_v31  ;;  %vm1971_vm11 = vc.u32 %v1963_v15, %v1967_v33  ;;  %v1973_v60 = vadd.s32 %v1967_v33, %v1963_v15  ;;  %v2089_v13 = vsel %vm5794_vm12, %v5788_v52, %v5747_v26 }
 0x17c   : > { %v2165_v25 = vrot.slane %v2163_v27, 6  ;;  %v2168_v42 = vrot.slane %v2166_v9, 7  ;;  %v1389_v2 = vpop.f32.mrf.mxu2  ;;  %v1952_v62 = vshrl.u32 %v1951_v24, 3  ;;  %v1972_v11 = vsel %vm1971_vm11, 1, %v5053_v46 }
 0x17d   : > { %v1561_v53 = vpop.f32.mrf.mxu3  ;;  %v1735_v0 = vmax.f32 %v1725_v41, 0.0  ;;  %v1410_v54 = vadd.f32 %v1389_v2, %v5524_v39  ;;  %v1970_v29 = vshrl.u32 %v5770_v14, 16  ;;  %v5815_v30 = vadd.s32 64, %v5430_v21  ;;  %v1696_v2 = vpop.f32.mrf.mxu0 }
 0x17e   : > { %v2169_v35 = vor.u32 %v2168_v42, %v2165_v25  ;;  %v1953_v20 = vmul.u32 10, %v1952_v62  ;;  %v1974_v3 = vadd.s32 %v1972_v11, %v1966_v61  ;;  %vm1975_vm6 = vc.u32 %v1973_v60, %v1969_v38 }
 0x17f   : > { %v2126_v39 = vsel %vm5756_vm2, %v1735_v0, 0.0  ;;  %v1582_v5 = vadd.f32 %v1561_v53, %v1410_v54  ;;  %v1976_v33 = vsel %vm1975_vm6, 1, %v5053_v46  ;;  %v1989_v25 = vand.u32 65535, %v5815_v30 }
 0x180   : > { %v2170_v1 = vsel %vm5782_vm8, %v2161_v48, %v2169_v35  ;;  %v2143_v23 = vpack.c.bf16 %v2126_v39, %v2126_v39  ;;  %v4664_v4 = vld [vmem:[#allocation2] sm:$0xff]   ;;  %v5812_v58 = vsub.s32 %v5632_v43, %v1953_v20  ;;  %v2171_v45 = vrot.slane %v2169_v35, 4  ;;  %v4622_v35 = vld [vmem:[#allocation8 + $0x138] sm:$0xff] }
 0x181   : > { %2269 = vst [vmem:[#allocation2 + $0x8] sm:$0xf] %v2170_v1  ;;  %v1712_v6 = vadd.f32 %v5711_v49, %v1582_v5  ;;  %v2360_v34 = vshll.u32 %v4664_v4, 16  ;;  %2549 = vmatmul.bf16.vlgmr.msrb.gmra.mxu2 %v4664_v4  ;;  %v4695_v16 = vld [vmem:[#allocation2] sm:$0xf0]  ;;  %v2358_v41 = vshrl.u32 %v4664_v4, 16  ;;  %2995 = vmatpush.bf16.msrb.mxu1 %v4622_v35 }
 0x182   : > { %v2173_v10 = vshrl.u32 %v2143_v23, 16  ;;  %v2176_v56 = vshll.u32 %v2143_v23, 16  ;;  %v4697_v9 = vor.u32 %v4696_v12, %v4695_v16  ;;  %vm2050_vm15 = vcmp.ne.s32.totalorder %v5812_v58, 0  ;;  %v5826_v48 = vld [vmem:[#allocation2 + $0x4] sm:$0xe] }
 0x183   : > { %v1726_v49 = vadd.f32 %v5656_v7, %v1712_v6  ;;  %v2362_v36 = vrot.slane %v2360_v34, 1  ;;  %vm2060_vm9 = vcmp.lt.s32.totalorder %v5812_v58, 0  ;;  %v5832_v53 = vadd.s32 10, %v5812_v58 }
 0x184   : > { %v2175_v19 = vrot.slane %v2173_v10, 6  ;;  %v2178_v31 = vrot.slane %v2176_v56, 7  ;;  %v1392_v26 = vpop.f32.mrf.mxu2  ;;  %vm5836_vm2 = vmand %vm2060_vm9, %vm2050_vm15  ;;  %v5840_v52 = vrot.slane %v4697_v9, 1  ;;  %v2743_v62 = vunpack.c.l.b16 %v5826_v48 }
 0x185   : > { %v1564_v15 = vpop.f32.mrf.mxu3  ;;  %v1736_v43 = vmax.f32 %v1726_v49, 0.0  ;;  %v1411_v17 = vadd.f32 %v1392_v26, %v5528_v57  ;;  %v1978_v57 = vadd.s32 %v1976_v33, %v1974_v3  ;;  %v5842_v61 = vor.u32 %v2362_v36, %v2358_v41  ;;  %v1699_v27 = vpop.f32.mrf.mxu0 }
 0x186   : > { %v2179_v14 = vor.u32 %v2178_v31, %v2175_v19  ;;  %v1990_v39 = vshrl.u32 %v5815_v30, 16  ;;  %v1992_v60 = vmul.u32 52429, %v1989_v25  ;;  %v5846_v1 = vmul.u32 52428, %v1989_v25 }
 0x187   : > { %v2127_v63 = vsel %vm5776_vm7, %v1736_v43, 0.0  ;;  %v1583_v42 = vadd.f32 %v1564_v15, %v1411_v17  ;;  %v1979_v32 = vadd.s32 %v1978_v57, %v1968_v18  ;;  %v2090_v4 = vsel %vm5836_vm2, %v5832_v53, %v5812_v58 }
 0x188   : > { %v2180_v24 = vsel %vm5782_vm8, %v2171_v45, %v2179_v14  ;;  %v2144_v0 = vpack.c.bf16 %v2127_v63, %v2127_v63  ;;  %v5853_v20 = vmul.u32 52429, %v1990_v39  ;;  %vm5855_vm5 = vcmp.lt.s32.totalorder %v2089_v13, 8  ;;  %v4621_v63 = vld [vmem:[#allocation8 + $0x130] sm:$0xff] }
 0x189   : > { %2270 = vst [vmem:[#allocation2 + $0xc] sm:$0xf] %v2180_v24  ;;  %v1713_v37 = vadd.f32 %v1694_v22, %v1583_v42  ;;  %v1980_v22 = vadd.s32 %v1979_v32, %v1970_v29  ;;  %v1995_v16 = vmul.u32 52428, %v1990_v39  ;;  %v1996_v10 = vshll.u32 %v5846_v1, 16  ;;  %2996 = vmatpush.bf16.msrb.mxu1 %v4621_v63 }
 0x18a   : > { %v2183_v5 = vshrl.u32 %v2144_v0, 16  ;;  %v2186_v38 = vshll.u32 %v2144_v0, 16  ;;  %v1998_v58 = vshll.u32 %v5853_v20, 16  ;;  %v2181_v29 = vrot.slane %v2179_v14, 4 }
 0x18b   : > { %v1727_v23 = vadd.f32 %v5656_v7, %v1713_v37  ;;  %v1981_v49 = vshrl.u32 %v1980_v22, 3  ;;  %vm2000_vm10 = vc.u32 %v1992_v60, %v1996_v10  ;;  %v2002_v19 = vadd.s32 %v1996_v10, %v1992_v60 }
 0x18c   : > { %v2185_v18 = vrot.slane %v2183_v5, 6  ;;  %v2188_v12 = vrot.slane %v2186_v38, 7  ;;  %v1394_v11 = vpop.f32.mrf.mxu2  ;;  %v2001_v26 = vsel %vm2000_vm10, 1, %v5053_v46  ;;  %v5872_v14 = vadd.s32 72, %v5430_v21 }
 0x18d   : > { %v1566_v6 = vpop.f32.mrf.mxu3  ;;  %v1737_v56 = vmax.f32 %v1727_v23, 0.0  ;;  %v1412_v45 = vadd.f32 %v1394_v11, %v5574_v28  ;;  %v1982_v36 = vmul.u32 10, %v1981_v49  ;;  %v2003_v17 = vadd.s32 %v2001_v26, %v1995_v16  ;;  %v4630_v16 = vld [vmem:[#allocation8 + $0x178] sm:$0xff] }
 0x18e   : > { %v2189_v3 = vor.u32 %v2188_v12, %v2185_v18  ;;  %vm5878_vm7 = vc.u32 %v2002_v19, %v1998_v58  ;;  %vm5889_vm6 = vcmp.lt.s32.totalorder %v2090_v4, 8  ;;  %v1997_v22 = vshrl.u32 %v5846_v1, 16  ;;  %3124 = vmatpush.bf16.msra.mxu2 %v4630_v16 }
 0x18f   : > { %v2128_v31 = vsel %vm5818_vm14, %v1737_v56, 0.0  ;;  %v1584_v13 = vadd.f32 %v1566_v6, %v1412_v45  ;;  %v5875_v33 = vsub.s32 %v5688_v8, %v1982_v36  ;;  %v1999_v48 = vshrl.u32 %v5853_v20, 16  ;;  %v1701_v36 = vpop.f32.mrf.mxu0 }
 0x190   : > { %v2190_v15 = vsel %vm5782_vm8, %v2181_v29, %v2189_v3  ;;  %v2145_v9 = vpack.c.bf16 %v2128_v31, %v2128_v31  ;;  %v5867_v43 = vld [vmem:[#allocation2 + $0x8] sm:$0xff]  ;;  %v2191_v18 = vrot.slane %v2189_v3, 4  ;;  %v2018_v58 = vand.u32 65535, %v5872_v14 }
 0x191   : > { %v5869_v28 = vld [vmem:[#allocation2 + $0x8] sm:$0xff]   ;;  %2271 = vst [vmem:[#allocation2 + $0x10] sm:$0xf] %v2190_v15  ;;  %v1714_v41 = vadd.f32 %v1696_v2, %v1584_v13  ;;  %2554 = vmatmul.bf16.gmra.mxu2 %v5867_v43  ;;  %v2597_v21 = vrot.slane %v5867_v43, 1  ;;  %v2365_v24 = vshll.u32 %v5867_v43, 16  ;;  %vm2051_vm12 = vcmp.ne.s32.totalorder %v5875_v33, 0 }
 0x192   : > { %v2744_v25 = vunpack.c.l.b16 %v5869_v28  ;;  %v2193_v53 = vshrl.u32 %v2145_v9, 16  ;;  %v2196_v57 = vshll.u32 %v2145_v9, 16  ;;  %vm2061_vm11 = vcmp.lt.s32.totalorder %v5875_v33, 0 }
 0x193   : > { %v1728_v2 = vadd.f32 %v5656_v7, %v1714_v41  ;;  %v2081_v8 = vadd.s32 10, %v5875_v33  ;;  %v2598_v39 = vsel %vm678_vm3, %v5840_v52, %v2597_v21  ;;  %v2367_v5 = vrot.slane %v2365_v24, 1  ;;  %vm5898_vm14 = vmand %vm2061_vm11, %vm2051_vm12 }
 0x194   : > { %v2195_v0 = vrot.slane %v2193_v53, 6  ;;  %v2198_v54 = vrot.slane %v2196_v57, 7  ;;  %v1397_v37 = vpop.f32.mrf.mxu2  ;;  %2668 = vmatmul.bf16.vlgmr.msrb.gmra.mxu3 %v2598_v39  ;;  %v5906_v4 = vpack.c.b16 %v2744_v25, %v2743_v62  ;;  %v2019_v20 = vshrl.u32 %v5872_v14, 16 }
 0x195   : > { %v1569_v35 = vpop.f32.mrf.mxu3  ;;  %v1738_v38 = vmax.f32 %v1728_v2, 0.0  ;;  %v1413_v60 = vadd.f32 %v1397_v37, %v5584_v47  ;;  %v2368_v52 = vsel %vm438_vm0, %v5842_v61, %v2367_v5  ;;  %v2005_v47 = vsel %vm5878_vm7, 1, %v5053_v46 }
 0x196   : > { %v2199_v12 = vor.u32 %v2198_v54, %v2195_v0  ;;  %2462 = vmatmul.bf16.vlgmr.msra.gmra.mxu1 %v2368_v52  ;;  %v2007_v62 = vadd.s32 %v2005_v47, %v2003_v17  ;;  %v2091_v61 = vsel %vm5898_vm14, %v2081_v8, %v5875_v33  ;;  %v2760_v45 = vrot.slane %v5906_v4, 1  ;;  %v4629_v17 = vld [vmem:[#allocation8 + $0x170] sm:$0xff] }
 0x197   : > { %v2129_v11 = vsel %vm5855_vm5, %v1738_v38, 0.0  ;;  %v1585_v6 = vadd.f32 %v1569_v35, %v1413_v60  ;;  %v2369_v31 = vshrl.u32 %v5867_v43, 16  ;;  %v2021_v15 = vmul.u32 52429, %v2018_v58  ;;  %3125 = vmatpush.bf16.msra.mxu2 %v4629_v17  ;;  %v1704_v17 = vpop.f32.mrf.mxu0 }
 0x198   : > { %v2200_v1 = vsel %vm5782_vm8, %v2191_v18, %v2199_v12  ;;  %v2146_v10 = vpack.c.bf16 %v2129_v11, %v2129_v11  ;;  %v5922_v56 = vld [vmem:[#allocation2 + $0xc] sm:$0xff]  ;;  %v2008_v49 = vadd.s32 %v2007_v62, %v1997_v22  ;;  %v5930_v9 = vmul.u32 52428, %v2018_v58  ;;  %v4628_v22 = vld [vmem:[#allocation8 + $0x168] sm:$0xff] }
 0x199   : > { %2272 = vst [vmem:[#allocation2 + $0x14] sm:$0xf] %v2200_v1  ;;  %v1715_v34 = vadd.f32 %v1699_v27, %v1585_v6  ;;  %v2761_v19 = vrot.slane %v5922_v56, 1  ;;  %v5935_v53 = vmul.u32 52429, %v2019_v20  ;;  %vm5938_vm15 = vcmp.lt.s32.totalorder %v2091_v61, 8  ;;  %v4627_v61 = vld [vmem:[#allocation8 + $0x160] sm:$0xff] }
 0x19a   : > { %v2203_v29 = vshrl.u32 %v2146_v10, 16  ;;  %v2206_v3 = vshll.u32 %v2146_v10, 16  ;;  %v2009_v26 = vadd.s32 %v2008_v49, %v1999_v48  ;;  %v2201_v0 = vrot.slane %v2199_v12, 4 }
 0x19b   : > { %v1729_v13 = vadd.f32 %v5656_v7, %v1715_v34  ;;  %v2762_v42 = vsel %vm678_vm3, %v2760_v45, %v2761_v19  ;;  %v2371_v37 = vor.u32 %v2369_v31, %v2367_v5  ;;  %v2025_v35 = vshll.u32 %v5930_v9, 16  ;;  %3126 = vmatpush.bf16.msra.mxu2 %v4628_v22 }
 0x19c   : > { %v2205_v41 = vrot.slane %v2203_v29, 6  ;;  %v2208_v27 = vrot.slane %v2206_v3, 7  ;;  %v1399_v33 = vpop.f32.mrf.mxu2  ;;  %2832 = vmatmul.bf16.vlgmr.msrb.gmra.mxu0 %v2762_v42  ;;  %v2010_v8 = vshrl.u32 %v2009_v26, 3  ;;  %v2024_v23 = vmul.u32 52428, %v2019_v20 }
 0x19d   : > { %v1571_v63 = vpop.f32.mrf.mxu3  ;;  %v1739_v57 = vmax.f32 %v1729_v13, 0.0  ;;  %v1414_v24 = vadd.f32 %v1399_v33, %v5635_v40  ;;  %v2027_v47 = vshll.u32 %v5935_v53, 16  ;;  %vm2029_vm9 = vc.u32 %v2021_v15, %v2025_v35  ;;  %v4626_v33 = vld [vmem:[#allocation8 + $0x158] sm:$0xff] }
 0x19e   : > { %v2209_v54 = vor.u32 %v2208_v27, %v2205_v41  ;;  %v2011_v60 = vmul.u32 10, %v2010_v8  ;;  %v2030_v32 = vsel %vm2029_vm9, 1, %v5053_v46  ;;  %v2031_v11 = vadd.s32 %v2025_v35, %v2021_v15 }
 0x19f   : > { %v2130_v39 = vsel %vm5889_vm6, %v1739_v57, 0.0  ;;  %v1586_v38 = vadd.f32 %v1571_v63, %v1414_v24  ;;  %v2026_v13 = vshrl.u32 %v5930_v9, 16  ;;  %3127 = vmatpush.bf16.msra.mxu2 %v4627_v61  ;;  %v2028_v41 = vshrl.u32 %v5935_v53, 16  ;;  %v1240_v9 = vpop.f32.mrf.mxu1  ;;  %v4624_v61 = vld [vmem:[#allocation8 + $0x148] sm:$0xff] }
 0x1a0   : > { %v2210_v40 = vsel %vm5782_vm8, %v2201_v0, %v2209_v54  ;;  %v2147_v18 = vpack.c.bf16 %v2130_v39, %v2130_v39  ;;  %v5947_v52 = vld [vmem:[#allocation2 + $0x10] sm:$0xff]  ;;  %v2012_v12 = vsub.s32 %v5815_v30, %v2011_v60  ;;  %v2211_v26 = vrot.slane %v2209_v54, 4 }
 0x1a1   : > { %2273 = vst [vmem:[#allocation2 + $0x18] sm:$0xf] %v2210_v40  ;;  %v1716_v5 = vadd.f32 %v1701_v36, %v1586_v38  ;;  %2559 = vmatmul.bf16.gmra.mxu2 %v5947_v52  ;;  %v2599_v62 = vrot.slane %v5947_v52, 1  ;;  %v2373_v16 = vshll.u32 %v5947_v52, 16  ;;  %v2032_v36 = vadd.s32 %v2030_v32, %v2024_v23  ;;  %v4625_v60 = vld [vmem:[#allocation8 + $0x150] sm:$0xff] }
 0x1a2   : > { %v2213_v6 = vshrl.u32 %v2147_v18, 16  ;;  %v2216_v48 = vshll.u32 %v2147_v18, 16  ;;  %vm2052_vm2 = vcmp.ne.s32.totalorder %v2012_v12, 0  ;;  %vm2062_vm5 = vcmp.lt.s32.totalorder %v2012_v12, 0 }
 0x1a3   : > { %v1730_v1 = vadd.f32 %v5656_v7, %v1716_v5  ;;  %v2082_v10 = vadd.s32 10, %v2012_v12  ;;  %v2600_v58 = vsel %vm678_vm3, %v2597_v21, %v2599_v62  ;;  %v5961_v20 = vrot.slane %v2373_v16, 1  ;;  %vm5964_vm10 = vmand %vm2062_vm5, %vm2052_vm2  ;;  %3128 = vmatpush.bf16.msra.mxu2 %v4626_v33 }
 0x1a4   : > { %v2215_v45 = vrot.slane %v2213_v6, 6  ;;  %v2218_v30 = vrot.slane %v2216_v48, 7  ;;  %v1402_v34 = vpop.f32.mrf.mxu2  ;;  %2673 = vmatmul.bf16.gmra.mxu3 %v2600_v58  ;;  %vm2033_vm7 = vc.u32 %v2031_v11, %v2027_v47  ;;  %v1252_v35 = vadd.f32 %v1240_v9, %v5676_v59  ;;  %v4620_v48 = vld [vmem:[#allocation8 + $0x128] sm:$0xff]  ;;  %v4619_v58 = vld [vmem:[#allocation8 + $0x120] sm:$0xff] }
 0x1a5   : > { %v1574_v49 = vpop.f32.mrf.mxu3  ;;  %v1740_v29 = vmax.f32 %v1730_v1, 0.0  ;;  %v1415_v3 = vadd.f32 %v1402_v34, %v5659_v50  ;;  %v2376_v43 = vsel %vm438_vm0, %v2371_v37, %v5961_v20  ;;  %v2034_v27 = vsel %vm2033_vm7, 1, %v5053_v46  ;;  %v4642_v37 = vld [vmem:[#allocation8 + $0x1b8] sm:$0xff]  ;;  %2997 = vmatpush.bf16.msrb.mxu1 %v4620_v48 }
 0x1a6   : > { %v2219_v15 = vor.u32 %v2218_v30, %v2215_v45  ;;  %2467 = vmatmul.bf16.gmra.mxu1 %v2376_v43  ;;  %v2092_v57 = vsel %vm5964_vm10, %v2082_v10, %v2012_v12  ;;  %v2036_v24 = vadd.s32 %v2034_v27, %v2032_v36  ;;  %3288 = vmatpush.bf16.msra.mxu3 %v4642_v37  ;;  %v4641_v10 = vld [vmem:[#allocation8 + $0x1b0] sm:$0xff]  ;;  %v1706_v30 = vpop.f32.mrf.mxu0  ;;  %v2377_v31 = vshrl.u32 %v5947_v52, 16  ;;  %v4623_v36 = vld [vmem:[#allocation8 + $0x140] sm:$0xff] }
 0x1a7   : > { %v2131_v21 = vsel %vm5938_vm15, %v1740_v29, 0.0  ;;  %v1587_v50 = vadd.f32 %v1574_v49, %v1415_v3  ;;  %vm5984_vm12 = vcmp.lt.s32.totalorder %v2092_v57, 8  ;;  %3129 = vmatpush.bf16.msra.mxu2 %v4625_v60  ;;  %v4650_v29 = vld [vmem:[#allocation8 + $0x1f8] sm:$0xff]  ;;  %v2893_v9 = vshll.u32 %v5906_v4, 16  ;;  %v4645_v57 = vld [vmem:[#allocation8 + $0x1d0] sm:$0xff] }
 0x1a8   : > { %v2220_v63 = vsel %vm5782_vm8, %v2211_v26, %v2219_v15  ;;  %v2148_v42 = vpack.c.bf16 %v2131_v21, %v2131_v21  ;;  %v5979_v8 = vld [vmem:[#allocation2 + $0x14] sm:$0xff]  ;;  %v2037_v53 = vadd.s32 %v2036_v24, %v2026_v13  ;;  %v2221_v12 = vrot.slane %v2219_v15, 4  ;;  %v4640_v13 = vld [vmem:[#allocation8 + $0x1a8] sm:$0xff]  ;;  %3459 = vmatpush.bf16.msra.mxu0 %v4650_v29 }
 0x1a9   : > { %2274 = vst [vmem:[#allocation2 + $0x1c] sm:$0xf] %v2220_v63  ;;  %v1717_v2 = vadd.f32 %v1704_v17, %v1587_v50  ;;  %v2763_v46 = vrot.slane %v5979_v8, 1  ;;  %v2890_v26 = vshrl.u32 %v5906_v4, 16  ;;  %v4649_v50 = vld [vmem:[#allocation8 + $0x1f0] sm:$0xff]  ;;  %v2379_v27 = vor.u32 %v2377_v31, %v5961_v20  ;;  %2998 = vmatpush.bf16.msrb.mxu1 %v4619_v58  ;;  %v4618_v4 = vld [vmem:[#allocation8 + $0x118] sm:$0xff] }
 0x1aa   : > { %v2223_v0 = vshrl.u32 %v2148_v42, 16  ;;  %v2226_v54 = vshll.u32 %v2148_v42, 16  ;;  %v2038_v18 = vadd.s32 %v2037_v53, %v2028_v41  ;;  %3289 = vmatpush.bf16.msra.mxu3 %v4641_v10  ;;  %v4648_v53 = vld [vmem:[#allocation8 + $0x1e8] sm:$0xff]  ;;  %v2901_v38 = vshll.u32 %v5922_v56, 16  ;;  %v4646_v58 = vld [vmem:[#allocation8 + $0x1d8] sm:$0xff] }
 0x1ab   : > { %v1731_v39 = vadd.f32 %v5656_v7, %v1717_v2  ;;  %v2764_v47 = vsel %vm678_vm3, %v2761_v19, %v2763_v46  ;;  %3130 = vmatpush.bf16.msra.mxu2 %v4624_v61  ;;  %v4639_v2 = vld [vmem:[#allocation8 + $0x1a0] sm:$0xff]  ;;  %v2892_v37 = vrot.slane %v2890_v26, 1  ;;  %v2907_v48 = vshrl.u32 %v5979_v8, 16  ;;  %v4616_v61 = vld [vmem:[#allocation8 + $0x108] sm:$0xff]  ;;  %v2278_v26 = vld [vmem:[#allocation2 + $0x2c] sm:$0x3] }
 0x1ac   : > { %v2225_v23 = vrot.slane %v2223_v0, 6  ;;  %v2228_v22 = vrot.slane %v2226_v54, 7  ;;  %v1404_v40 = vpop.f32.mrf.mxu2  ;;  %2837 = vmatmul.bf16.gmra.mxu0 %v2764_v47  ;;  %v2039_v6 = vshrl.u32 %v2038_v18, 3  ;;  %v2903_v47 = vrot.slane %v2901_v38, 2  ;;  %v4658_v38 = vld [vmem:[#allocation8 + $0x238] sm:$0xff] }
 0x1ad   : > { %v1741_v5 = vmax.f32 %v1731_v39, 0.0  ;;  %v1416_v59 = vadd.f32 %v1404_v40, %v1252_v35  ;;  %v1576_v11 = vpop.f32.mrf.mxu3  ;;  %3460 = vmatpush.bf16.msra.mxu0 %v4649_v50  ;;  %v2898_v35 = vshrl.u32 %v5922_v56, 16  ;;  %2999 = vmatpush.bf16.msrb.mxu1 %v4618_v4  ;;  %v4617_v40 = vld [vmem:[#allocation8 + $0x110] sm:$0xff]  ;;  %v2909_v29 = vrot.slane %v2907_v48, 1 }
 0x1ae   : > { %v2229_v32 = vor.u32 %v2228_v22, %v2225_v23  ;;  %v2040_v34 = vmul.u32 10, %v2039_v6  ;;  %3290 = vmatpush.bf16.msra.mxu3 %v4640_v13  ;;  %vm6318_vm9 = vcmask 1045504  }
 0x1af   : > { %v2132_v16 = vsel %vm5984_vm12, %v1741_v5, 0.0  ;;  %v1588_v1 = vadd.f32 %v1576_v11, %v1416_v59  ;;  %3131 = vmatpush.bf16.msra.mxu2 %v4623_v36  ;;  %v2900_v18 = vrot.slane %v2898_v35, 1 }
 0x1b0   : > { %v2230_v45 = vsel %vm5782_vm8, %v2221_v12, %v2229_v32  ;;  %v2149_v19 = vpack.c.bf16 %v2132_v16, %v2132_v16  ;;  %v5997_v49 = vld [vmem:[#allocation2 + $0x18] sm:$0xff]  ;;  %v2041_v43 = vsub.s32 %v5872_v14, %v2040_v34  ;;  %v2231_v0 = vrot.slane %v2229_v32, 4  ;;  %v4637_v34 = vld [vmem:[#allocation8 + $0x190] sm:$0xff] }
 0x1b1   : > { %2275 = vst [vmem:[#allocation2 + $0x20] sm:$0xf] %v2230_v45  ;;  %v1718_v3 = vadd.f32 %v1706_v30, %v1588_v1  ;;  %2564 = vmatmul.bf16.gmra.mxu2 %v5997_v49  ;;  %v2601_v21 = vrot.slane %v5997_v49, 1  ;;  %v2381_v33 = vshll.u32 %v5997_v49, 16  ;;  %v4638_v12 = vld [vmem:[#allocation8 + $0x198] sm:$0xff]  ;;  %3461 = vmatpush.bf16.msra.mxu0 %v4648_v53  ;;  %v4647_v32 = vld [vmem:[#allocation8 + $0x1e0] sm:$0xff]  ;;  %v2904_v6 = vor.u32 %v2903_v47, %v2900_v18 }
 0x1b2   : > { %v2233_v15 = vshrl.u32 %v2149_v19, 16  ;;  %v2236_v17 = vshll.u32 %v2149_v19, 16  ;;  %vm2053_vm11 = vcmp.ne.s32.totalorder %v2041_v43, 0  ;;  %vm2063_vm6 = vcmp.lt.s32.totalorder %v2041_v43, 0  ;;  %3291 = vmatpush.bf16.msra.mxu3 %v4639_v2  ;;  %3000 = vmatpush.bf16.msrb.mxu1 %v4617_v40 }
 0x1b3   : > { %v1732_v41 = vadd.f32 %v5656_v7, %v1718_v3  ;;  %vm6008_vm14 = vmand %vm2063_vm6, %vm2053_vm11  ;;  %v2083_v24 = vadd.s32 10, %v2041_v43  ;;  %v2602_v7 = vsel %vm678_vm3, %v2599_v62, %v2601_v21  ;;  %v6017_v20 = vrot.slane %v2381_v33, 1 }
 0x1b4   : > { %v2235_v63 = vrot.slane %v2233_v15, 6  ;;  %v2238_v42 = vrot.slane %v2236_v17, 7  ;;  %2678 = vmatmul.bf16.gmra.mxu3 %v2602_v7  ;;  %v2895_v62 = vrot.slane %v2893_v9, 2  ;;  %v2910_v3 = vshll.u32 %v5979_v8, 16  ;;  %v4615_v17 = vld [vmem:[#allocation8 + $0x100] sm:$0xff] }
 0x1b5   : > { %v1742_v14 = vmax.f32 %v1732_v41, 0.0  ;;  %v2093_v39 = vsel %vm6008_vm14, %v2083_v24, %v2041_v43  ;;  %v2384_v52 = vsel %vm438_vm0, %v2379_v27, %v6017_v20  ;;  %3462 = vmatpush.bf16.msra.mxu0 %v4647_v32  ;;  %v2385_v15 = vshrl.u32 %v5997_v49, 16 }
 0x1b6   : > { %v2239_v54 = vor.u32 %v2238_v42, %v2235_v63  ;;  %vm2103_vm15 = vcmp.lt.s32.totalorder %v2093_v39, 8  ;;  %2472 = vmatmul.bf16.gmra.mxu1 %v2384_v52  ;;  %v2896_v11 = vor.u32 %v2895_v62, %v2892_v37  ;;  %3292 = vmatpush.bf16.msra.mxu3 %v4638_v12  ;;  %v3208_v43 = vunpack.c.h.b16 %v5869_v28  ;;  %v6049_v63 = vld [vmem:[#allocation2 + $0x10] sm:$0xff]  ;;  %v3039_v37 = vld [vmem:[#allocation2 + $0x4] sm:$0xc]  ;;  %v4635_v39 = vld [vmem:[#allocation8 + $0x180] sm:$0xff] }
 0x1b7   : > { %v2133_v22 = vsel %vm2103_vm15, %v1742_v14, 0.0  ;;  %3001 = vmatpush.bf16.msrb.mxu1 %v4616_v61  ;;  %v2912_v50 = vrot.slane %v2910_v3, 2  ;;  %v2387_v42 = vor.u32 %v2385_v15, %v6017_v20  ;;  %v4636_v14 = vld [vmem:[#allocation8 + $0x188] sm:$0xff]  ;;  %v6060_v20 = vld [vmem:[#allocation2 + $0x18] sm:$0xff]  ;;  %v4657_v3 = vld [vmem:[#allocation8 + $0x230] sm:$0xff] }
 0x1b8   : > { %v2240_v60 = vsel %vm5782_vm8, %v2231_v0, %v2239_v54  ;;  %v6027_v23 = vld [vmem:[#allocation2 + $0x1c] sm:$0xff]  ;;  %v2150_v5 = vpack.c.bf16 %v2133_v22, %v2133_v22  ;;  %v6037_v45 = vsel %vm972_vm1, %v2896_v11, %v2904_v6  ;;  %v2241_v31 = vrot.slane %v2239_v54, 4  ;;  %v4644_v52 = vld [vmem:[#allocation8 + $0x1c8] sm:$0xff] }
 0x1b9   : > { %2276 = vst [vmem:[#allocation2 + $0x24] sm:$0xf] %v2240_v60  ;;  %v2765_v59 = vrot.slane %v6027_v23, 1  ;;  %3463 = vmatpush.bf16.msra.mxu0 %v4646_v58  ;;  %v2913_v24 = vor.u32 %v2912_v50, %v2909_v29  ;;  %v2916_v0 = vshrl.u32 %v6027_v23, 16  ;;  %v2919_v53 = vshll.u32 %v6027_v23, 16 }
 0x1ba   : > { %v2243_v16 = vshrl.u32 %v2150_v5, 16  ;;  %v2246_v1 = vshll.u32 %v2150_v5, 16  ;;  %3293 = vmatpush.bf16.msra.mxu3 %v4637_v34  ;;  %v3058_v22 = vunpack.c.l.b16 %v3039_v37  ;;  %v3527_v18 = vrot.slane %v6060_v20, 3 }
 0x1bb   : > { %v2766_v10 = vsel %vm678_vm3, %v2763_v46, %v2765_v59  ;;  %v3503_v46 = vld [vmem:[#allocation2 + $0x8] sm:$0x8]  ;;  %3002 = vmatpush.bf16.msrb.mxu1 %v4615_v17  ;;  %v6063_v54 = vsel %vm972_vm1, %v2904_v6, %v2913_v24  ;;  %v2918_v35 = vrot.slane %v2916_v0, 1  ;;  %v2921_v62 = vrot.slane %v2919_v53, 2 }
 0x1bc   : > { %2842 = vmatmul.bf16.gmra.mxu0 %v2766_v10  ;;  %v2245_v19 = vrot.slane %v2243_v16, 6  ;;  %v2248_v30 = vrot.slane %v2246_v1, 7  ;;  %v3522_v7 = vunpack.c.l.b16 %v3503_v46  ;;  %v3059_v32 = vpack.c.b16 %v2744_v25, %v3058_v22  ;;  %v4643_v10 = vld [vmem:[#allocation8 + $0x1c0] sm:$0xff] }
 0x1bd   : > { %3464 = vmatpush.bf16.msra.mxu0 %v4645_v57  ;;  %v2922_v40 = vor.u32 %v2921_v62, %v2918_v35  ;;  %v4656_v57 = vld [vmem:[#allocation8 + $0x228] sm:$0xff]  ;;  %v3225_v37 = vrot.slane %v6049_v63, 2  ;;  %v3332_v35 = vld [vmem:[#allocation2 + $0x30] sm:$0x7] }
 0x1be   : > { %v2249_v13 = vor.u32 %v2248_v30, %v2245_v19  ;;  %v3523_v49 = vpack.c.b16 %v3208_v43, %v3522_v7  ;;  %3294 = vmatpush.bf16.msra.mxu3 %v4636_v14  ;;  %v3061_v19 = vrot.slane %v5922_v56, 2  ;;  %v3060_v34 = vrot.slane %v3059_v32, 2 }
 0x1bf   : > { %3588 = vmatpush.bf16.msra.mxu1 %v4658_v38  ;;  %v6079_v6 = vsel %vm972_vm1, %v2913_v24, %v2922_v40  ;;  %v3351_v62 = vunpack.c.l.b16 %v3332_v35 }
 0x1c0   : > { %v6040_v36 = vld [vmem:[#allocation2 + $0x20] sm:$0xff]  ;;  %v2250_v41 = vsel %vm5782_vm8, %v2241_v31, %v2249_v13  ;;  %v2251_v27 = vrot.slane %v2249_v13, 4  ;;  %v3524_v60 = vrot.slane %v3523_v49, 3  ;;  %v3062_v31 = vsel %vm6318_vm9, %v3060_v34, %v3061_v19 }
 0x1c1   : > { %2569 = vmatmul.bf16.gmra.mxu2 %v6040_v36  ;;  %v2603_v33 = vrot.slane %v6040_v36, 1  ;;  %v2389_v9 = vshll.u32 %v6040_v36, 16  ;;  %2277 = vst [vmem:[#allocation2 + $0x28] sm:$0xf] %v2250_v41  ;;  %3465 = vmatpush.bf16.msra.mxu0 %v4644_v52  ;;  %v3362_v49 = vshrl.u32 %v6049_v63, 16  ;;  %v3371_v34 = vshrl.u32 %v6060_v20, 16 }
 0x1c2   : > { %v2279_v51 = vsel %vm5494_vm13, %v2251_v27, %v2278_v26  ;;  %vm6316_vm13 = vcmask 1044480   ;;  %3295 = vmatpush.bf16.msra.mxu3 %v4635_v39  ;;  %v2393_v26 = vshrl.u32 %v6040_v36, 16  ;;  %v6098_v27 = vld [vmem:[#allocation2 + $0x20] sm:$0xff] }
 0x1c3   : > { %v2604_v4 = vsel %vm678_vm3, %v2601_v21, %v2603_v33  ;;  %v2391_v2 = vrot.slane %v2389_v9, 1  ;;  %2280 = vst [vmem:[#allocation2 + $0x2c] sm:$0x3] %v2279_v51  ;;  %v3525_v21 = vrot.slane %v6049_v63, 3  ;;  %vm6317_vm8 = vmmov %vm6316_vm13  ;;  %3589 = vmatpush.bf16.msra.mxu1 %v4657_v3  ;;  %v3529_v7 = vrot.slane %v6098_v27, 3 }
 0x1c4   : > { %2683 = vmatmul.bf16.gmra.mxu3 %v2604_v4  ;;  %v3168_v51 = vld [vmem:[#allocation2 + $0x8] sm:$0xc]  ;;  %v3063_v4 = vrot.slane %v5979_v8, 2 }
 0x1c5   : > { %v2392_v55 = vsel %vm438_vm0, %v2387_v42, %v2391_v2  ;;  %v6074_v12 = vsel %vm6316_vm13, %v3524_v60, %v3525_v21  ;;  %v6082_v48 = vsel %vm6317_vm8, %v3525_v21, %v3527_v18  ;;  %3466 = vmatpush.bf16.msra.mxu0 %v4643_v10  ;;  %v2395_v41 = vor.u32 %v2393_v26, %v2391_v2 }
 0x1c6   : > { %2477 = vmatmul.bf16.gmra.mxu1 %v2392_v55  ;;  %v3207_v2 = vunpack.c.l.b16 %v3168_v51  ;;  %v3365_v21 = vshll.u32 %v6049_v63, 16  ;;  %v3364_v60 = vrot.slane %v3362_v49, 2  ;;  %v3229_v26 = vrot.slane %v6098_v27, 2 }
 0x1c7   : > { %3590 = vmatpush.bf16.msra.mxu1 %v4656_v57 }
 0x1c8   : > { %v6071_v47 = vld [vmem:[#allocation2 + $0x24] sm:$0xff]  ;;  %v3218_v53 = vpack.c.b16 %v3208_v43, %v3207_v2  ;;  %v3367_v28 = vrot.slane %v3365_v21, 3  ;;  %v4655_v43 = vld [vmem:[#allocation8 + $0x220] sm:$0xff]  ;;  %v3178_v21 = vld [vmem:[#allocation2 + $0x30] sm:$0x3] }
 0x1c9   : > { %v2311_v5 = vld [vmem:[#allocation2 + $0x28] sm:$0x1]  ;;  %v2767_v1 = vrot.slane %v6071_v47, 1  ;;  %v2925_v56 = vshrl.u32 %v6071_v47, 16  ;;  %v2928_v46 = vshll.u32 %v6071_v47, 16 }
 0x1ca   : > { %v2350_v11 = vunpack.c.l.b16 %v2311_v5  ;;  %v2281_v16 = vld [vmem:[#allocation2 + $0x2c] sm:$0xe]  ;;  %v2714_v29 = vld [vmem:[#allocation2 + $0x2c] sm:$0x1]  ;;  %v3224_v39 = vrot.slane %v3218_v53, 2  ;;  %v3354_v52 = vshrl.u32 %v3218_v53, 16  ;;  %v6123_v5 = vpack.c.b16 %v3351_v62, %v3351_v62 }
 0x1cb   : > { %v2282_v61 = vsel %vm5716_vm4, 0, %v2281_v16  ;;  %v2768_v25 = vsel %vm678_vm3, %v2765_v59, %v2767_v1  ;;  %v2753_v44 = vunpack.c.l.b16 %v2714_v29  ;;  %v2927_v59 = vrot.slane %v2925_v56, 1  ;;  %vm6319_vm4 = vmmov %vm6317_vm8  ;;  %3591 = vmatpush.bf16.msra.mxu1 %v4655_v43 }
 0x1cc   : > { %v2356_v30 = vpack.c.b16 %v2350_v11, %v2350_v11  ;;  %2283 = vst [vmem:[#allocation2 + $0x2c] sm:$0xe] %v2282_v61  ;;  %2847 = vmatmul.bf16.gmra.mxu0 %v2768_v25  ;;  %v2930_v17 = vrot.slane %v2928_v46, 2  ;;  %v3357_v8 = vshll.u32 %v3218_v53, 16  ;;  %v3356_v22 = vrot.slane %v3354_v52, 2  ;;  %vm6323_vm5 = vmmov %vm6319_vm4 }
 0x1cd   : > { %v2759_v9 = vpack.c.b16 %v2753_v44, %v2753_v44  ;;  %v3368_v63 = vor.u32 %v3367_v28, %v3364_v60  ;;  %v3533_v16 = vrot.slane %v6123_v5, 3  ;;  %vm6324_vm10 = vmmov %vm6319_vm4  ;;  %v3227_v25 = vrot.slane %v6060_v20, 2 }
 0x1ce   : > { %v2397_v58 = vshll.u32 %v2356_v30, 16  ;;  %v2605_v13 = vrot.slane %v2356_v30, 1  ;;  %v6100_v42 = vor.u32 %v2930_v17, %v2927_v59  ;;  %v3373_v29 = vrot.slane %v3371_v34, 2  ;;  %v4652_v17 = vld [vmem:[#allocation8 + $0x208] sm:$0xff] }
 0x1cf   : > { %v2769_v36 = vrot.slane %v2759_v9, 1  ;;  %v3067_v44 = vrot.slane %v6071_v47, 2  ;;  %v3217_v62 = vunpack.c.l.b16 %v3178_v21  ;;  %v3401_v34 = vshll.u32 %v6123_v5, 16 }
 0x1d0   : > { %v2399_v15 = vrot.slane %v2397_v58, 1  ;;  %v2606_v50 = vsel %vm678_vm3, %v2603_v33, %v2605_v13  ;;  %v6105_v24 = vsel %vm972_vm1, %v2922_v40, %v6100_v42  ;;  %v6109_v33 = vsel %vm6319_vm4, %v3527_v18, %v3529_v7 }
 0x1d1   : > { %3132 = vmatmul.bf16.vlgmr.msra.gmra.mxu2 %v3062_v31  ;;  %v2770_v0 = vsel %vm678_vm3, %v2767_v1, %v2769_v36  ;;  %v3359_v40 = vrot.slane %v3357_v8, 3  ;;  %v3065_v1 = vrot.slane %v6027_v23, 2  ;;  %vm6322_vm3 = vsmask.f32 5376  ;;  %v4653_v31 = vld [vmem:[#allocation8 + $0x210] sm:$0xff] }
 0x1d2   : > { %v2400_v14 = vsel %vm438_vm0, %v2395_v41, %v2399_v15  ;;  %vm6320_vm0 = vmmov %vm6318_vm9  ;;  %v3374_v23 = vshll.u32 %v6060_v20, 16  ;;  %v3380_v20 = vshrl.u32 %v6098_v27, 16  ;;  %v3383_v15 = vshll.u32 %v6098_v27, 16  ;;  %v4651_v27 = vld [vmem:[#allocation8 + $0x200] sm:$0xff] }
 0x1d3   : > { %v3064_v55 = vsel %vm6320_vm0, %v3061_v19, %v3063_v4  ;;  %vm6321_vm2 = vmmov %vm6320_vm0  ;;  %v6121_v18 = vld [vmem:[#allocation2 + $0x28] sm:$0xff]  ;;  %v3360_v32 = vor.u32 %v3359_v40, %v3356_v22  ;;  %v4654_v19 = vld [vmem:[#allocation8 + $0x218] sm:$0xff] }
 0x1d4   : > { %2688 = vmatmul.bf16.gmra.mxu3 %v2606_v50  ;;  %v3226_v38 = vsel %vm6321_vm2, %v3224_v39, %v3225_v37  ;;  %v3531_v11 = vrot.slane %v6121_v18, 3  ;;  %vm6325_vm7 = vmmov %vm6320_vm0  ;;  %3592 = vmatpush.bf16.msra.mxu1 %v4654_v19  ;;  %v3376_v3 = vrot.slane %v3374_v23, 3  ;;  %v2868_v59 = vld [vmem:[#allocation2 + $0x2c] sm:$0x3]  ;;  %v3382_v47 = vrot.slane %v3380_v20, 2 }
 0x1d5   : > { %v3369_v10 = vsel %vm6322_vm3, %v3360_v32, %v3368_v63  ;;  %v3066_v30 = vsel %vm6325_vm7, %v3063_v4, %v3065_v1  ;;  %vm6326_vm12 = vmmov %vm6320_vm0  ;;  %v2887_v41 = vunpack.c.l.b16 %v2868_v59  ;;  %v3385_v9 = vrot.slane %v3383_v15, 3 }
 0x1d6   : > { %2482 = vmatmul.bf16.gmra.mxu1 %v2400_v14  ;;  %v6130_v61 = vsel %vm6323_vm5, %v3529_v7, %v3531_v11  ;;  %v3228_v58 = vsel %vm6326_vm12, %v3225_v37, %v3227_v25  ;;  %v3377_v13 = vor.u32 %v3376_v3, %v3373_v29  ;;  %vm6327_vm11 = vmmov %vm6322_vm3  ;;  %v3231_v2 = vrot.slane %v6121_v18, 2 }
 0x1d7   : > { %vm6328_vm6 = vmmov %vm6320_vm0  ;;  %v2888_v14 = vpack.c.b16 %v2887_v41, %v2887_v41  ;;  %v3386_v57 = vor.u32 %v3385_v9, %v3382_v47  ;;  %v3392_v53 = vshll.u32 %v6121_v18, 16 }
 0x1d8   : > { %3593 = vmatpush.bf16.msra.mxu1 %v4653_v31  ;;  %v3378_v56 = vsel %vm6327_vm11, %v3368_v63, %v3377_v13  ;;  %v3068_v46 = vsel %vm6328_vm6, %v3065_v1, %v3067_v44  ;;  %vm6329_vm14 = vmmov %vm6320_vm0  ;;  %v3223_v63 = vpack.c.b16 %v3217_v62, %v3217_v62 }
 0x1d9   : > { %v3230_v50 = vsel %vm6329_vm14, %v3227_v25, %v3229_v26  ;;  %v3069_v36 = vrot.slane %v2888_v14, 2  ;;  %vm6330_vm15 = vmmov %vm6322_vm3  ;;  %v3394_v49 = vrot.slane %v3392_v53, 3  ;;  %v2934_v43 = vshrl.u32 %v2888_v14, 16 }
 0x1da   : > { %v3387_v51 = vsel %vm6330_vm15, %v3377_v13, %v3386_v57  ;;  %vm6331_vm13 = vmmov %vm6320_vm0  ;;  %v2937_v22 = vshll.u32 %v2888_v14, 16  ;;  %v3233_v19 = vrot.slane %v3223_v63, 2  ;;  %v3398_v25 = vshrl.u32 %v6123_v5, 16 }
 0x1db   : > { %v3070_v4 = vsel %vm6331_vm13, %v3067_v44, %v3069_v36  ;;  %vm6332_vm8 = vmmov %vm6320_vm0  ;;  %v3403_v44 = vrot.slane %v3401_v34, 3 }
 0x1dc   : > { %2852 = vmatmul.bf16.gmra.mxu0 %v2770_v0  ;;  %3594 = vmatpush.bf16.msra.mxu1 %v4652_v17  ;;  %v3389_v0 = vshrl.u32 %v6121_v18, 16  ;;  %v3232_v37 = vsel %vm6332_vm8, %v3229_v26, %v3231_v2  ;;  %vm6333_vm9 = vmmov %vm6322_vm3  ;;  %v3400_v13 = vrot.slane %v3398_v25, 2 }
 0x1dd   : > { %vm6334_vm4 = vmmov %vm6320_vm0 }
 0x1de   : > { %v3391_v35 = vrot.slane %v3389_v0, 2  ;;  %v3234_v31 = vsel %vm6334_vm4, %v3231_v2, %v3233_v19  ;;  %v3404_v15 = vor.u32 %v3403_v44, %v3400_v13  ;;  %vm6335_vm0 = vmmov %vm6322_vm3 }
 0x1e0   : > { %3595 = vmatpush.bf16.msra.mxu1 %v4651_v27  ;;  %v3395_v60 = vor.u32 %v3394_v49, %v3391_v35 }
 0x1e1   : > { %3137 = vmatmul.bf16.gmra.mxu2 %v3064_v55 }
 0x1e2   : > { %v3396_v32 = vsel %vm6333_vm9, %v3386_v57, %v3395_v60 }
 0x1e4   : > { %3296 = vmatmul.bf16.vlgmr.msra.gmra.mxu3 %v3226_v38 }
 0x1e6   : > { %3003 = vmatmul.bf16.vlgmr.msrb.gmra.mxu1 %v6037_v45  ;;  %v6133_v45 = vsel %vm6324_vm10, %v3531_v11, %v3533_v16  ;;  %v2936_v11 = vrot.slane %v2934_v43, 1  ;;  %v2939_v16 = vrot.slane %v2937_v22, 2 }
 0x1ec   : > { %3467 = vmatmul.bf16.vlgmr.msra.gmra.mxu0 %v3369_v10 }
 0x1f1   : > { %3142 = vmatmul.bf16.gmra.mxu2 %v3066_v30 }
 0x1f4   : > { %3301 = vmatmul.bf16.gmra.mxu3 %v3228_v58  ;;  %v2940_v58 = vor.u32 %v2939_v16, %v2936_v11 }
 0x1f6   : > { %3008 = vmatmul.bf16.gmra.mxu1 %v6063_v54 }
 0x1fc   : > { %3472 = vmatmul.bf16.gmra.mxu0 %v3378_v56  ;;  %v2941_v56 = vsel %vm972_vm1, %v6100_v42, %v2940_v58 }
 0x201   : > { %3147 = vmatmul.bf16.gmra.mxu2 %v3068_v46 }
 0x204   : > { %v2550_v54 = vpop.f32.mrf.mxu2  ;;  %3306 = vmatmul.bf16.gmra.mxu3 %v3230_v50  ;;  %v3405_v50 = vsel %vm6335_vm0, %v3395_v60, %v3404_v15 }
 0x206   : > { %3013 = vmatmul.bf16.gmra.mxu1 %v6079_v6 }
 0x20c   : > { %v2552_v7 = vpop.f32.mrf.mxu2  ;;  %3477 = vmatmul.bf16.gmra.mxu0 %v3387_v51 }
 0x211   : > { %3152 = vmatmul.bf16.gmra.mxu2 %v3070_v4 }
 0x213   : > { %v2463_v55 = vpop.f32.mrf.mxu1 }
 0x214   : > { %v2551_v6 = vadd.f32 %v2550_v54, %v2463_v55  ;;  %3311 = vmatmul.bf16.gmra.mxu3 %v3232_v37  ;;  %v2555_v39 = vpop.f32.mrf.mxu2 }
 0x216   : > { %3018 = vmatmul.bf16.gmra.mxu1 %v6105_v24 }
 0x217   : > { %v2669_v52 = vpop.f32.mrf.mxu3 }
 0x218   : > { %v2694_v8 = vadd.f32 %v2669_v52, %v2551_v6 }
 0x219   : > { %v2833_v38 = vpop.f32.mrf.mxu0 }
 0x21a   : > { %v6156_v28 = vadd.f32 %v2833_v38, %v2694_v8 }
 0x21b   : > { %v2465_v40 = vpop.f32.mrf.mxu1 }
 0x21c   : > { %v2553_v18 = vadd.f32 %v2552_v7, %v2465_v40  ;;  %3482 = vmatmul.bf16.gmra.mxu0 %v3396_v32  ;;  %v2557_v10 = vpop.f32.mrf.mxu2 }
 0x21f   : > { %v2671_v1 = vpop.f32.mrf.mxu3 }
 0x220   : > { %v2695_v24 = vadd.f32 %v2671_v1, %v2553_v18 }
 0x221   : > { %v2835_v30 = vpop.f32.mrf.mxu0 }
 0x222   : > { %v6161_v23 = vadd.f32 %v2835_v30, %v2695_v24 }
 0x223   : > { %v2468_v29 = vpop.f32.mrf.mxu1 }
 0x224   : > { %v2556_v3 = vadd.f32 %v2555_v39, %v2468_v29  ;;  %3316 = vmatmul.bf16.gmra.mxu3 %v3234_v31  ;;  %v2560_v59 = vpop.f32.mrf.mxu2 }
 0x226   : > { %3023 = vmatmul.bf16.gmra.mxu1 %v2941_v56 }
 0x227   : > { %v2674_v46 = vpop.f32.mrf.mxu3 }
 0x228   : > { %v2696_v26 = vadd.f32 %v2674_v46, %v2556_v3 }
 0x229   : > { %v2838_v20 = vpop.f32.mrf.mxu0 }
 0x22a   : > { %v2860_v5 = vadd.f32 %v2838_v20, %v2696_v26 }
 0x22b   : > { %v2470_v17 = vpop.f32.mrf.mxu1 }
 0x22c   : > { %v2558_v54 = vadd.f32 %v2557_v10, %v2470_v17  ;;  %3487 = vmatmul.bf16.gmra.mxu0 %v3405_v50  ;;  %v2562_v57 = vpop.f32.mrf.mxu2 }
 0x22f   : > { %v2676_v41 = vpop.f32.mrf.mxu3 }
 0x230   : > { %v2697_v47 = vadd.f32 %v2676_v41, %v2558_v54 }
 0x231   : > { %v2840_v9 = vpop.f32.mrf.mxu0 }
 0x232   : > { %v2861_v14 = vadd.f32 %v2840_v9, %v2697_v47 }
 0x233   : > { %v2473_v7 = vpop.f32.mrf.mxu1 }
 0x234   : > { %v2561_v36 = vadd.f32 %v2560_v59, %v2473_v7  ;;  %v2565_v53 = vpop.f32.mrf.mxu2 }
 0x236   : > { %3596 = vmatmul.bf16.vlgmr.msra.gmra.mxu1 %v6074_v12 }
 0x237   : > { %v2679_v42 = vpop.f32.mrf.mxu3 }
 0x238   : > { %v2698_v51 = vadd.f32 %v2679_v42, %v2561_v36 }
 0x239   : > { %v2843_v27 = vpop.f32.mrf.mxu0 }
 0x23a   : > { %v2862_v4 = vadd.f32 %v2843_v27, %v2698_v51 }
 0x23b   : > { %v2475_v2 = vpop.f32.mrf.mxu1 }
 0x23c   : > { %v2563_v0 = vadd.f32 %v2562_v57, %v2475_v2  ;;  %v2567_v39 = vpop.f32.mrf.mxu2 }
 0x23f   : > { %v2681_v55 = vpop.f32.mrf.mxu3 }
 0x240   : > { %v2699_v6 = vadd.f32 %v2681_v55, %v2563_v0 }
 0x241   : > { %v2845_v37 = vpop.f32.mrf.mxu0 }
 0x242   : > { %v2863_v35 = vadd.f32 %v2845_v37, %v2699_v6 }
 0x243   : > { %v2478_v49 = vpop.f32.mrf.mxu1 }
 0x244   : > { %v2566_v21 = vadd.f32 %v2565_v53, %v2478_v49  ;;  %v2570_v40 = vpop.f32.mrf.mxu2 }
 0x246   : > { %3601 = vmatmul.bf16.gmra.mxu1 %v6082_v48 }
 0x247   : > { %v2684_v52 = vpop.f32.mrf.mxu3 }
 0x248   : > { %v2700_v8 = vadd.f32 %v2684_v52, %v2566_v21  ;;  %v6185_v21 = vld [vmem:[%s6247_s4] ss:$0 sm:$0xff] }
 0x249   : > { %v2848_v62 = vpop.f32.mrf.mxu0 }
 0x24a   : > { %v2864_v12 = vadd.f32 %v2848_v62, %v2700_v8 }
 0x24b   : > { %v2480_v38 = vpop.f32.mrf.mxu1 }
 0x24c   : > { %v2568_v60 = vadd.f32 %v2567_v39, %v2480_v38  ;;  %v2572_v48 = vpop.f32.mrf.mxu2 }
 0x24f   : > { %v2686_v43 = vpop.f32.mrf.mxu3 }
 0x250   : > { %v2701_v22 = vadd.f32 %v2686_v43, %v2568_v60 }
 0x251   : > { %v2850_v18 = vpop.f32.mrf.mxu0 }
 0x252   : > { %v2865_v63 = vadd.f32 %v2850_v18, %v2701_v22 }
 0x253   : > { %v2483_v32 = vpop.f32.mrf.mxu1 }
 0x254   : > { %v2571_v11 = vadd.f32 %v2570_v40, %v2483_v32  ;;  %v3133_v41 = vpop.f32.mrf.mxu2 }
 0x256   : > { %3606 = vmatmul.bf16.gmra.mxu1 %v6109_v33 }
 0x257   : > { %v2689_v16 = vpop.f32.mrf.mxu3 }
 0x258   : > { %v2702_v1 = vadd.f32 %v2689_v16, %v2571_v11 }
 0x259   : > { %v2853_v10 = vpop.f32.mrf.mxu0 }
 0x25a   : > { %v2866_v24 = vadd.f32 %v2853_v10, %v2702_v1 }
 0x25b   : > { %v2485_v19 = vpop.f32.mrf.mxu1 }
 0x25c   : > { %v2573_v30 = vadd.f32 %v2572_v48, %v2485_v19 }
 0x25f   : > { %v2691_v25 = vpop.f32.mrf.mxu3 }
 0x260   : > { %v2703_v34 = vadd.f32 %v2691_v25, %v2573_v30 }
 0x261   : > { %v2855_v58 = vpop.f32.mrf.mxu0 }
 0x262   : > { %v2867_v29 = vadd.f32 %v2855_v58, %v2703_v34 }
 0x263   : > { %v3004_v3 = vpop.f32.mrf.mxu1 }
 0x264   : > { %v3029_v31 = vadd.f32 %v3004_v3, %v6156_v28 }
 0x266   : > { %3611 = vmatmul.bf16.gmra.mxu1 %v6130_v61  ;;  %v3158_v27 = vadd.f32 %v3133_v41, %v3029_v31 }
 0x267   : > { %v3297_v28 = vpop.f32.mrf.mxu3 }
 0x268   : > { %v3322_v2 = vadd.f32 %v3297_v28, %v3158_v27 }
 0x269   : > { %v3468_v9 = vpop.f32.mrf.mxu0 }
 0x26a   : > { %v3493_v6 = vadd.f32 %v3468_v9, %v3322_v2 }
 0x26b   : > { %v3006_v13 = vpop.f32.mrf.mxu1 }
 0x26c   : > { %v3030_v44 = vadd.f32 %v3006_v13, %v6161_v23  ;;  %v3135_v23 = vpop.f32.mrf.mxu2 }
 0x26e   : > { %v3159_v0 = vadd.f32 %v3135_v23, %v3030_v44 }
 0x26f   : > { %v3299_v57 = vpop.f32.mrf.mxu3 }
 0x270   : > { %v3323_v37 = vadd.f32 %v3299_v57, %v3159_v0 }
 0x273   : > { %v3009_v33 = vpop.f32.mrf.mxu1 }
 0x274   : > { %v3031_v56 = vadd.f32 %v3009_v33, %v2860_v5 }
 0x276   : > { %3616 = vmatmul.bf16.gmra.mxu1 %v6133_v45  ;;  %v3470_v45 = vpop.f32.mrf.mxu0 }
 0x277   : > { %v3302_v51 = vpop.f32.mrf.mxu3  ;;  %v3494_v39 = vadd.f32 %v3470_v45, %v3323_v37 }
 0x27b   : > { %v3011_v46 = vpop.f32.mrf.mxu1 }
 0x27c   : > { %v3032_v26 = vadd.f32 %v3011_v46, %v2861_v14  ;;  %v3138_v14 = vpop.f32.mrf.mxu2 }
 0x27d   : > { %v3160_v38 = vadd.f32 %v3138_v14, %v3031_v56 }
 0x283   : > { %v3014_v20 = vpop.f32.mrf.mxu1 }
 0x284   : > { %v3033_v15 = vadd.f32 %v3014_v20, %v2862_v4  ;;  %v3473_v4 = vpop.f32.mrf.mxu0  ;;  %v3140_v55 = vpop.f32.mrf.mxu2 }
 0x285   : > { %v3161_v32 = vadd.f32 %v3140_v55, %v3032_v26 }
 0x28b   : > { %v3016_v59 = vpop.f32.mrf.mxu1 }
 0x28c   : > { %v3034_v17 = vadd.f32 %v3016_v59, %v2863_v35  ;;  %v3304_v35 = vpop.f32.mrf.mxu3  ;;  %v3475_v52 = vpop.f32.mrf.mxu0 }
 0x28d   : > { %v3143_v43 = vpop.f32.mrf.mxu2  ;;  %v3325_v48 = vadd.f32 %v3304_v35, %v3161_v32 }
 0x28e   : > { %v3162_v3 = vadd.f32 %v3143_v43, %v3033_v15 }
 0x28f   : > { %v3496_v30 = vadd.f32 %v3475_v52, %v3325_v48 }
 0x293   : > { %v3019_v54 = vpop.f32.mrf.mxu1 }
 0x294   : > { %v6174_v50 = vadd.f32 %v3019_v54, %v2864_v12  ;;  %v3307_v18 = vpop.f32.mrf.mxu3  ;;  %v3478_v1 = vpop.f32.mrf.mxu0 }
 0x295   : > { %v3145_v19 = vpop.f32.mrf.mxu2  ;;  %v3326_v56 = vadd.f32 %v3307_v18, %v3162_v3 }
 0x296   : > { %v3163_v46 = vadd.f32 %v3145_v19, %v3034_v17 }
 0x297   : > { %v3497_v41 = vadd.f32 %v3478_v1, %v3326_v56 }
 0x29b   : > { %v3021_v47 = vpop.f32.mrf.mxu1 }
 0x29c   : > { %v6176_v61 = vadd.f32 %v3021_v47, %v2865_v63  ;;  %v3324_v63 = vadd.f32 %v3302_v51, %v3160_v38  ;;  %v3309_v25 = vpop.f32.mrf.mxu3  ;;  %v3480_v13 = vpop.f32.mrf.mxu0 }
 0x29d   : > { %v3148_v20 = vpop.f32.mrf.mxu2  ;;  %v3327_v28 = vadd.f32 %v3309_v25, %v3163_v46 }
 0x29e   : > { %v3495_v10 = vadd.f32 %v3473_v4, %v3324_v63  ;;  %v3164_v14 = vadd.f32 %v3148_v20, %v6174_v50 }
 0x29f   : > { %v3498_v23 = vadd.f32 %v3480_v13, %v3327_v28 }
 0x2a3   : > { %v3024_v5 = vpop.f32.mrf.mxu1 }
 0x2a4   : > { %v6178_v7 = vadd.f32 %v3024_v5, %v2866_v24  ;;  %v3312_v54 = vpop.f32.mrf.mxu3  ;;  %v3483_v9 = vpop.f32.mrf.mxu0 }
 0x2a5   : > { %v3150_v45 = vpop.f32.mrf.mxu2  ;;  %v3328_v4 = vadd.f32 %v3312_v54, %v3164_v14 }
 0x2a6   : > { %v3165_v2 = vadd.f32 %v3150_v45, %v6176_v61 }
 0x2ab   : > { %v3026_v36 = vpop.f32.mrf.mxu1 }
 0x2ac   : > { %v6180_v42 = vadd.f32 %v3026_v36, %v2867_v29  ;;  %v3314_v36 = vpop.f32.mrf.mxu3 }
 0x2ad   : > { %v3329_v37 = vadd.f32 %v3314_v36, %v3165_v2  ;;  %v3153_v35 = vpop.f32.mrf.mxu2 }
 0x2ae   : > { %v3166_v50 = vadd.f32 %v3153_v35, %v6178_v7 }
 0x2b3   : > { %v3597_v53 = vpop.f32.mrf.mxu1 }
 0x2b4   : > { %v3622_v49 = vadd.f32 %v3597_v53, %v3493_v6  ;;  %v3485_v53 = vpop.f32.mrf.mxu0  ;;  %v3499_v6 = vadd.f32 %v3483_v9, %v3328_v4 }
 0x2b5   : > { %v3500_v52 = vadd.f32 %v3485_v53, %v3329_v37 }
 0x2b6   : > { %v3636_v62 = vadd.f32 %v6185_v21, %v3622_v49 }
 0x2b8   : > { %v3646_v22 = vmax.f32 %v3636_v62, 0.0 }
 0x2bb   : > { %v3599_v8 = vpop.f32.mrf.mxu1 }
 0x2bc   : > { %v3623_v12 = vadd.f32 %v3599_v8, %v3494_v39  ;;  %v3317_v39 = vpop.f32.mrf.mxu3  ;;  %v3488_v38 = vpop.f32.mrf.mxu0 }
 0x2bd   : > { %v3330_v61 = vadd.f32 %v3317_v39, %v3166_v50 }
 0x2be   : > { %v3637_v60 = vadd.f32 %v6185_v21, %v3623_v12 }
 0x2bf   : > { %v3501_v18 = vadd.f32 %v3488_v38, %v3330_v61 }
 0x2c0   : > { %v3647_v40 = vmax.f32 %v3637_v60, 0.0 }
 0x2c2   : > { %v4670_v11 = vpack.c.bf16 %v3647_v40, %v3646_v22  ;;  %v3155_v40 = vpop.f32.mrf.mxu2 }
 0x2c3   : > { %v3602_v16 = vpop.f32.mrf.mxu1  ;;  %v3167_v63 = vadd.f32 %v3155_v40, %v6180_v42 }
 0x2c4   : > { %4671 = vst [vmem:[%s6190_s22] sm:$0xff] %v4670_v11   ;;  %v3624_v24 = vadd.f32 %v3602_v16, %v3495_v10  ;;  %v3319_v11 = vpop.f32.mrf.mxu3  ;;  %v3490_v48 = vpop.f32.mrf.mxu0 }
 0x2c5   : > { %v3331_v1 = vadd.f32 %v3319_v11, %v3167_v63 }
 0x2c6   : > { %v3638_v58 = vadd.f32 %v6185_v21, %v3624_v24 }
 0x2c7   : > { %v3502_v24 = vadd.f32 %v3490_v48, %v3331_v1 }
 0x2c8   : > { %v3648_v44 = vmax.f32 %v3638_v58, 0.0 }
 0x2cb   : > { %v3604_v34 = vpop.f32.mrf.mxu1 }
 0x2cc   : > { %v3625_v29 = vadd.f32 %v3604_v34, %v3496_v30 }
 0x2ce   : > { %v3639_v31 = vadd.f32 %v6185_v21, %v3625_v29 }
 0x2d0   : > { %v3649_v33 = vmax.f32 %v3639_v31, 0.0 }
 0x2d2   : > { %v4675_v26 = vpack.c.bf16 %v3649_v33, %v3648_v44 }
 0x2d3   : > { %v3607_v59 = vpop.f32.mrf.mxu1 }
 0x2d4   : > { %4698 = vst [vmem:[%s6190_s22 + $0x8] sm:$0xff] %v4675_v26   ;;  %v3626_v47 = vadd.f32 %v3607_v59, %v3497_v41 }
 0x2d6   : > { %v3640_v15 = vadd.f32 %v6185_v21, %v3626_v47 }
 0x2d8   : > { %v3650_v51 = vmax.f32 %v3640_v15, 0.0 }
 0x2db   : > { %v3609_v57 = vpop.f32.mrf.mxu1 }
 0x2dc   : > { %v3627_v5 = vadd.f32 %v3609_v57, %v3498_v23 }
 0x2de   : > { %v3641_v17 = vadd.f32 %v6185_v21, %v3627_v5 }
 0x2e0   : > { %v3651_v27 = vmax.f32 %v3641_v17, 0.0 }
 0x2e2   : > { %v4680_v0 = vpack.c.bf16 %v3651_v27, %v3650_v51 }
 0x2e3   : > { %v3612_v55 = vpop.f32.mrf.mxu1 }
 0x2e4   : > { %4699 = vst [vmem:[%s6190_s22 + $0x10] sm:$0xff] %v4680_v0   ;;  %v3628_v49 = vadd.f32 %v3612_v55, %v3499_v6 }
 0x2e6   : > { %v3642_v62 = vadd.f32 %v6185_v21, %v3628_v49 }
 0x2e8   : > { %v3652_v43 = vmax.f32 %v3642_v62, 0.0 }
 0x2eb   : > { %v3614_v8 = vpop.f32.mrf.mxu1 }
 0x2ec   : > { %v3629_v12 = vadd.f32 %v3614_v8, %v3500_v52 }
 0x2ee   : > { %v3643_v60 = vadd.f32 %v6185_v21, %v3629_v12 }
 0x2f0   : > { %v3653_v22 = vmax.f32 %v3643_v60, 0.0 }
 0x2f2   : > { %v4685_v32 = vpack.c.bf16 %v3653_v22, %v3652_v43 }
 0x2f3   : > { %v3617_v16 = vpop.f32.mrf.mxu1 }
 0x2f4   : > { %4700 = vst [vmem:[%s6190_s22 + $0x18] sm:$0xff] %v4685_v32   ;;  %v3630_v7 = vadd.f32 %v3617_v16, %v3501_v18 }
 0x2f6   : > { %v3644_v10 = vadd.f32 %v6185_v21, %v3630_v7 }
 0x2f8   : > { %v3654_v25 = vmax.f32 %v3644_v10, 0.0 }
 0x2fb   : > { %v3619_v19 = vpop.f32.mrf.mxu1 }
 0x2fc   : > { %v3631_v30 = vadd.f32 %v3619_v19, %v3502_v24 }
 0x2fe   : > { %v3645_v42 = vadd.f32 %v6185_v21, %v3631_v30 }
 0x300   : > { %v3655_v34 = vmax.f32 %v3645_v42, 0.0 }
 0x302   : > { %v4690_v58 = vpack.c.bf16 %v3655_v34, %v3654_v25 }
 0x304   : > { %4701 = vst [vmem:[%s6190_s22 + $0x20] sm:$0xff] %v4690_v58  }
 0x305   : > { %4996 = shalt.err (!%p4993_p10)
}
 0x306   : > { %s5054_s3 = smov 64   ;;  %s5055_s29 = smov 4  }
 0x307   : > { %4741 = dma.vmem_to_hbm [thread:$0]  (%p5186_p3), %s3690_s23, 640, %s3692_s14, %s3677_s15, %s5054_s3, %s5054_s3, %s5055_s29  }
 0x308 PF: > { %s3706_s18 = sand.u32 1, %s5031_s24   ;;  %p6336_p12 = scmp.ge.s32.totalorder %s5043_s27, 2 }
 0x309   : > { %s3707_s22 = scalar_lea.sflag [#allocation5], %s3706_s18 }
 0x30a   : > { %p4761_p13 = pnand %p6336_p12, %p5131_p6 }
 0x30c   : > { %p4762_p0 = pneg %p4761_p13 }
 0x30e   : > { %5026 = dma.done.wait (%p4762_p0), %s3707_s22, 640  }
 0x30f   : > { %5028 = vsyncadd (%p4762_p0), %s3707_s22, 4294966656  ;;  %p22_p5 = scmp.ge.s32.totalorder %s5176_s9, 4   ;;  %s6337_s24 = smov %s5035_s25 }
 0x310   : > { %s6338_s25 = smov %s5039_s26  ;;  %s6339_s26 = smov %s5192_s13 }
 0x311   : > { %s6340_s27 = smov %s5176_s9  ;;  %24 = sbr.rel (!%p22_p5) target bundleno = 11 (0xb), region = 125 }
 0x316   :  { %3713 = vsyncpa [#allocation4], 1 }
 0x317   :  { %3715 = vsyncpa [#allocation4 + $0x1], 1 }
 0x318   :  { %3716 = vsyncpa [#allocation7], 1 }
 0x319   :  { %3717 = vsyncpa [#allocation10], 1 }
 0x31a   :  { %3718 = vsyncpa [#allocation5], 1 }
 0x31b   :  { %3720 = vsyncpa [#allocation5 + $0x1], 1 }

</bundles_post_ra>
